<compile_context>
chip_gen: v6e
topology: v6e:2x2x1
jax: 0.10.0
libtpu: 0.0.40
codegen_flags: <defaults>
</compile_context>

<pallas_src>
import math
import jax
import jax.numpy as jnp
from jax import lax
from jax.experimental import pallas as pl
from jax.experimental.pallas import tpu as pltpu

B, T, D = 2, 8, 32          # batch, tokens, embed_dim
HEADS   = 4
HD      = D // HEADS
DEPTH   = 2                 # number of transformer blocks
MLP_H   = 4 * D             # mlp_ratio = 4
C       = 4                 # n_classes
OUT_PAD = 128               # lane-dense output width (head padded to 128 cols)
EDL     = False             # module's `edl` flag (ReLU on logits if True)
EPS     = 1e-5
_SCALE  = 1.0 / math.sqrt(HD)
_G      = math.sqrt(2.0 / math.pi)


# ----------------------------------------------------------------------------
# in-kernel math helpers
# ----------------------------------------------------------------------------
def _layernorm(x, g, b):
    # variance via mean(x^2) - mu^2: one cross-lane reduction instead of two
    mu  = jnp.mean(x, axis=-1, keepdims=True)
    var = jnp.mean(x * x, axis=-1, keepdims=True) - mu * mu
    return (x - mu) * lax.rsqrt(var + EPS) * g + b


def _gelu(x):
    # TODO(synk): tanh-approximate GELU; if the PyTorch blocks use nn.GELU()
    # (exact erf) results differ at ~1e-3 level.
    return 0.5 * x * (1.0 + jnp.tanh(_G * (x + 0.044715 * x * x * x)))


# ----------------------------------------------------------------------------
# Pallas kernel: whole forward pass for a block of BB samples
# ----------------------------------------------------------------------------
def transformer_kernel(x_ref, pe_ref, ln1g_ref, ln1b_ref,
                       wq_ref, wk_ref, wv_ref, bq_ref, bk_ref, bv_ref,
                       wproj_ref, bproj_ref, ln2g_ref, ln2b_ref,
                       w1_ref, b1_ref, w2_ref, b2_ref,
                       ng_ref, nb_ref, wpool_ref, bpool_ref,
                       whead_ref, bhead_ref, o_ref):
    x = x_ref[...] + pe_ref[...]                       # (BB, T, D)

    for l in range(DEPTH):                             # static unroll over depth
        # ---- pre-norm multi-head self-attention + residual ----
        xn = _layernorm(x, ln1g_ref[l], ln1b_ref[l])
        attn = None
        for h in range(HEADS):                         # per-head weights pre-split:
            qh = jnp.dot(xn, wq_ref[l, h],             # no lane slicing, no concat
                         preferred_element_type=jnp.float32) + bq_ref[l, h]
            kh = jnp.dot(xn, wk_ref[l, h],
                         preferred_element_type=jnp.float32) + bk_ref[l, h]
            vh = jnp.dot(xn, wv_ref[l, h],
                         preferred_element_type=jnp.float32) + bv_ref[l, h]
            s = jnp.einsum('btk,bsk->bts', qh, kh,
                           preferred_element_type=jnp.float32) * _SCALE
            s = s - jnp.max(s, axis=-1, keepdims=True)
            p = jnp.exp(s)
            p = p * pl.reciprocal(jnp.sum(p, axis=-1, keepdims=True), approx=True)
            oh = jnp.einsum('bts,bsk->btk', p, vh,
                            preferred_element_type=jnp.float32)
            ph = jnp.dot(oh, wproj_ref[l, h],          # accumulate head @ proj-rows
                         preferred_element_type=jnp.float32)
            attn = ph if attn is None else attn + ph
        x = x + attn + bproj_ref[l]

        # ---- pre-norm MLP + residual ----
        xn = _layernorm(x, ln2g_ref[l], ln2b_ref[l])
        h1 = _gelu(jnp.dot(xn, w1_ref[l],
                           preferred_element_type=jnp.float32) + b1_ref[l])
        x = x + jnp.dot(h1, w2_ref[l],
                        preferred_element_type=jnp.float32) + b2_ref[l]

    # ---- final LayerNorm ----
    xn = _layernorm(x, ng_ref[...], nb_ref[...])

    # ---- attention pooling over tokens ----
    a = jnp.sum(xn * wpool_ref[...], axis=-1, keepdims=True) + bpool_ref[...]  # (BB,T,1)
    a = a - jnp.max(a, axis=1, keepdims=True)
    a = jnp.exp(a)
    a = a * pl.reciprocal(jnp.sum(a, axis=1, keepdims=True), approx=True)
    pooled = jnp.sum(a * xn, axis=1, keepdims=True)                            # (BB,1,D)

    # ---- classification head (lane-dense: padded to 128 outputs) ----
    logits = jnp.dot(pooled, whead_ref[...],
                     preferred_element_type=jnp.float32) + bhead_ref[...]
    if EDL:
        logits = jnp.maximum(logits, 0.0)
    o_ref[...] = logits


# ----------------------------------------------------------------------------
# parameters
# ----------------------------------------------------------------------------
def init_params(key):
    """Deterministic synthetic module parameters. Linear weights stored (in, out)."""
    def nrm(k, shape, scale=0.02):
        return scale * jax.random.normal(k, shape, dtype=jnp.float32)
    ks = iter(jax.random.split(key, 24))
    p = {
        "pos_embed": nrm(next(ks), (1, D)),
        "ln1_g": 1.0 + nrm(next(ks), (DEPTH, 1, D)),
        "ln1_b": nrm(next(ks), (DEPTH, 1, D)),
        "w_qkv": nrm(next(ks), (DEPTH, D, 3 * D)),
        "b_qkv": nrm(next(ks), (DEPTH, 1, 3 * D)),
        "w_proj": nrm(next(ks), (DEPTH, D, D)),
        "b_proj": nrm(next(ks), (DEPTH, 1, D)),
        "ln2_g": 1.0 + nrm(next(ks), (DEPTH, 1, D)),
        "ln2_b": nrm(next(ks), (DEPTH, 1, D)),
        "w_fc1": nrm(next(ks), (DEPTH, D, MLP_H)),
        "b_fc1": nrm(next(ks), (DEPTH, 1, MLP_H)),
        "w_fc2": nrm(next(ks), (DEPTH, MLP_H, D)),
        "b_fc2": nrm(next(ks), (DEPTH, 1, D)),
        "norm_g": 1.0 + nrm(next(ks), (1, D)),
        "norm_b": nrm(next(ks), (1, D)),
        "w_pool": nrm(next(ks), (1, D)),
        "b_pool": nrm(next(ks), (1, 1)),
        "w_head": nrm(next(ks), (D, C)),
        "b_head": nrm(next(ks), (1, C)),
    }
    # TODO(synk): cls_token is stored by the PyTorch module but never used in forward.
    return p


def _prepare_kernel_params(p):
    """Reorganize module params for the kernel: split QKV/proj per head and pad
    the classification head to 128 lanes (lane-dense output)."""
    wqkv, bqkv = p["w_qkv"], p["b_qkv"]

    def split_w(w):   # (DEPTH, D, D) -> (DEPTH, HEADS, D, HD)
        return w.reshape(DEPTH, D, HEADS, HD).transpose(0, 2, 1, 3)

    def split_b(b):   # (DEPTH, 1, D) -> (DEPTH, HEADS, 1, HD)
        return b.reshape(DEPTH, 1, HEADS, HD).transpose(0, 2, 1, 3)

    wq = split_w(wqkv[:, :, 0 * D:1 * D])
    wk = split_w(wqkv[:, :, 1 * D:2 * D])
    wv = split_w(wqkv[:, :, 2 * D:3 * D])
    bq = split_b(bqkv[:, :, 0 * D:1 * D])
    bk = split_b(bqkv[:, :, 1 * D:2 * D])
    bv = split_b(bqkv[:, :, 2 * D:3 * D])
    wproj = p["w_proj"].reshape(DEPTH, HEADS, HD, D)      # per-head row blocks

    whead = jnp.zeros((D, OUT_PAD), jnp.float32).at[:, :C].set(p["w_head"])
    bhead = jnp.zeros((1, OUT_PAD), jnp.float32).at[:, :C].set(p["b_head"])

    return [
        p["pos_embed"], p["ln1_g"], p["ln1_b"],
        wq, wk, wv, bq, bk, bv,
        wproj, p["b_proj"], p["ln2_g"], p["ln2_b"],
        p["w_fc1"], p["b_fc1"], p["w_fc2"], p["b_fc2"],
        p["norm_g"], p["norm_b"], p["w_pool"], p["b_pool"],
        whead, bhead,
    ]


# ----------------------------------------------------------------------------
# wrapper
# ----------------------------------------------------------------------------
def _grid_config():
    """v7x has 2 TensorCores/chip -> one batch slice per core; v5e/v6e are
    single-TC -> fold the whole batch into one grid step."""
    try:
        kind = jax.devices()[0].device_kind.lower()
    except Exception:
        kind = ""
    n_cores = 2 if "v7" in kind else 1
    g = n_cores if (B % n_cores == 0) else 1
    return B // g, g


def transformer_p_pallas(x, module_params):
    kparams = _prepare_kernel_params(module_params)
    bb, g = _grid_config()

    in_specs = [pl.BlockSpec((bb, T, D), lambda i: (i, 0, 0))]
    for w in kparams:
        # weights: full-array resident blocks, constant index map across the
        # (at most 2-step) grid, so re-fetch / double-buffer cost is negligible
        in_specs.append(pl.BlockSpec(w.shape, (lambda i, _n=w.ndim: (0,) * _n)))

    out = pl.pallas_call(
        transformer_kernel,
        out_shape=jax.ShapeDtypeStruct((B, 1, OUT_PAD), jnp.float32),
        grid_spec=pltpu.PrefetchScalarGridSpec(
            num_scalar_prefetch=0,
            grid=(g,),
            in_specs=in_specs,
            out_specs=pl.BlockSpec((bb, 1, OUT_PAD), lambda i: (i, 0, 0)),
        ),
        compiler_params=pltpu.CompilerParams(dimension_semantics=("parallel",)),
    )(x, *kparams)
    return out[:, 0, :C]                                   # (B, C)


# ----------------------------------------------------------------------------
# pure-JAX reference (independent formulation: fused QKV + head slicing)
# ----------------------------------------------------------------------------
def transformer_p_ref(x, p):
    x = x + p["pos_embed"]
    for l in range(DEPTH):
        mu = jnp.mean(x, -1, keepdims=True)
        xn = (x - mu) * lax.rsqrt(jnp.var(x, -1, keepdims=True) + EPS) \
             * p["ln1_g"][l] + p["ln1_b"][l]
        qkv = xn @ p["w_qkv"][l] + p["b_qkv"][l]           # (B,T,3D)
        q, k, v = (qkv[..., i * D:(i + 1) * D]
                   .reshape(B, T, HEADS, HD).transpose(0, 2, 1, 3)
                   for i in range(3))                      # (B,H,T,HD)
        s = jnp.einsum('bhtk,bhsk->bhts', q, k) * _SCALE
        a = jax.nn.softmax(s, axis=-1)
        o = jnp.einsum('bhts,bhsk->bhtk', a, v)
        o = o.transpose(0, 2, 1, 3).reshape(B, T, D)
        x = x + o @ p["w_proj"][l] + p["b_proj"][l]
        mu = jnp.mean(x, -1, keepdims=True)
        xn = (x - mu) * lax.rsqrt(jnp.var(x, -1, keepdims=True) + EPS) \
             * p["ln2_g"][l] + p["ln2_b"][l]
        h = _gelu(xn @ p["w_fc1"][l] + p["b_fc1"][l])
        x = x + h @ p["w_fc2"][l] + p["b_fc2"][l]
    mu = jnp.mean(x, -1, keepdims=True)
    xn = (x - mu) * lax.rsqrt(jnp.var(x, -1, keepdims=True) + EPS) \
         * p["norm_g"] + p["norm_b"]
    a = jnp.einsum('btd,d->bt', xn, p["w_pool"][0]) + p["b_pool"][0, 0]
    a = jax.nn.softmax(a, axis=1)
    pooled = jnp.einsum('bt,btd->bd', a, xn)
    logits = pooled @ p["w_head"] + p["b_head"]
    if EDL:
        logits = jnp.maximum(logits, 0.0)
    return logits


if __name__ == "__main__":
    key = jax.random.PRNGKey(0)
    kx, kp = jax.random.split(key)
    x = jax.random.normal(kx, (B, T, D), dtype=jnp.float32)
    params = init_params(kp)

    out = jax.block_until_ready(transformer_p_pallas(x, params))
    ref = jax.block_until_ready(transformer_p_ref(x, params))

    assert out.shape == (B, C), out.shape
    assert jnp.allclose(out, ref, atol=2e-3, rtol=2e-3), (out, ref)
    print("KERNEL_OK")
</pallas_src>

<mosaic_0001>
module attributes {stable_mosaic.version = 11 : i64} {
  func.func @transformer_kernel(%arg0: i32, %arg1: memref<2x8x32xf32, #tpu.memory_space<vmem>>, %arg2: memref<1x32xf32, #tpu.memory_space<vmem>>, %arg3: memref<2x1x32xf32, #tpu.memory_space<vmem>>, %arg4: memref<2x1x32xf32, #tpu.memory_space<vmem>>, %arg5: memref<2x4x32x8xf32, #tpu.memory_space<vmem>>, %arg6: memref<2x4x32x8xf32, #tpu.memory_space<vmem>>, %arg7: memref<2x4x32x8xf32, #tpu.memory_space<vmem>>, %arg8: memref<2x4x1x8xf32, #tpu.memory_space<vmem>>, %arg9: memref<2x4x1x8xf32, #tpu.memory_space<vmem>>, %arg10: memref<2x4x1x8xf32, #tpu.memory_space<vmem>>, %arg11: memref<2x4x8x32xf32, #tpu.memory_space<vmem>>, %arg12: memref<2x1x32xf32, #tpu.memory_space<vmem>>, %arg13: memref<2x1x32xf32, #tpu.memory_space<vmem>>, %arg14: memref<2x1x32xf32, #tpu.memory_space<vmem>>, %arg15: memref<2x32x128xf32, #tpu.memory_space<vmem>>, %arg16: memref<2x1x128xf32, #tpu.memory_space<vmem>>, %arg17: memref<2x128x32xf32, #tpu.memory_space<vmem>>, %arg18: memref<2x1x32xf32, #tpu.memory_space<vmem>>, %arg19: memref<1x32xf32, #tpu.memory_space<vmem>>, %arg20: memref<1x32xf32, #tpu.memory_space<vmem>>, %arg21: memref<1x32xf32, #tpu.memory_space<vmem>>, %arg22: memref<1x1xf32, #tpu.memory_space<vmem>>, %arg23: memref<32x128xf32, #tpu.memory_space<vmem>>, %arg24: memref<1x128xf32, #tpu.memory_space<vmem>>, %arg25: memref<2x1x128xf32, #tpu.memory_space<vmem>>) attributes {dimension_semantics = [#tpu.dimension_semantics<parallel>], iteration_bounds = array<i64: 1>, scalar_prefetch = 0 : i64, scratch_operands = 0 : i64, tpu.core_type = #tpu.core_type<tc>, window_params = [{transform_indices = @transform_0, window_bounds = array<i64: 2, 8, 32>}, {pipeline_mode = #tpu.pipeline_mode<synchronous>, transform_indices = @transform_1, window_bounds = array<i64: 1, 32>}, {pipeline_mode = #tpu.pipeline_mode<synchronous>, transform_indices = @transform_2, window_bounds = array<i64: 2, 1, 32>}, {pipeline_mode = #tpu.pipeline_mode<synchronous>, transform_indices = @transform_3, window_bounds = array<i64: 2, 1, 32>}, {pipeline_mode = #tpu.pipeline_mode<synchronous>, transform_indices = @transform_4, window_bounds = array<i64: 2, 4, 32, 8>}, {pipeline_mode = #tpu.pipeline_mode<synchronous>, transform_indices = @transform_5, window_bounds = array<i64: 2, 4, 32, 8>}, {pipeline_mode = #tpu.pipeline_mode<synchronous>, transform_indices = @transform_6, window_bounds = array<i64: 2, 4, 32, 8>}, {pipeline_mode = #tpu.pipeline_mode<synchronous>, transform_indices = @transform_7, window_bounds = array<i64: 2, 4, 1, 8>}, {pipeline_mode = #tpu.pipeline_mode<synchronous>, transform_indices = @transform_8, window_bounds = array<i64: 2, 4, 1, 8>}, {pipeline_mode = #tpu.pipeline_mode<synchronous>, transform_indices = @transform_9, window_bounds = array<i64: 2, 4, 1, 8>}, {pipeline_mode = #tpu.pipeline_mode<synchronous>, transform_indices = @transform_10, window_bounds = array<i64: 2, 4, 8, 32>}, {pipeline_mode = #tpu.pipeline_mode<synchronous>, transform_indices = @transform_11, window_bounds = array<i64: 2, 1, 32>}, {pipeline_mode = #tpu.pipeline_mode<synchronous>, transform_indices = @transform_12, window_bounds = array<i64: 2, 1, 32>}, {pipeline_mode = #tpu.pipeline_mode<synchronous>, transform_indices = @transform_13, window_bounds = array<i64: 2, 1, 32>}, {pipeline_mode = #tpu.pipeline_mode<synchronous>, transform_indices = @transform_14, window_bounds = array<i64: 2, 32, 128>}, {pipeline_mode = #tpu.pipeline_mode<synchronous>, transform_indices = @transform_15, window_bounds = array<i64: 2, 1, 128>}, {pipeline_mode = #tpu.pipeline_mode<synchronous>, transform_indices = @transform_16, window_bounds = array<i64: 2, 128, 32>}, {pipeline_mode = #tpu.pipeline_mode<synchronous>, transform_indices = @transform_17, window_bounds = array<i64: 2, 1, 32>}, {pipeline_mode = #tpu.pipeline_mode<synchronous>, transform_indices = @transform_18, window_bounds = array<i64: 1, 32>}, {pipeline_mode = #tpu.pipeline_mode<synchronous>, transform_indices = @transform_19, window_bounds = array<i64: 1, 32>}, {pipeline_mode = #tpu.pipeline_mode<synchronous>, transform_indices = @transform_20, window_bounds = array<i64: 1, 32>}, {pipeline_mode = #tpu.pipeline_mode<synchronous>, transform_indices = @transform_21, window_bounds = array<i64: 1, 1>}, {pipeline_mode = #tpu.pipeline_mode<synchronous>, transform_indices = @transform_22, window_bounds = array<i64: 32, 128>}, {pipeline_mode = #tpu.pipeline_mode<synchronous>, transform_indices = @transform_23, window_bounds = array<i64: 1, 128>}, {transform_indices = @transform_24, window_bounds = array<i64: 2, 1, 128>}]} {
    %c0 = arith.constant 0 : index
    %c0_0 = arith.constant 0 : index
    %c0_1 = arith.constant 0 : index
    %0 = vector.load %arg1[%c0, %c0_0, %c0_1] : memref<2x8x32xf32, #tpu.memory_space<vmem>>, vector<2x8x32xf32>
    %c0_2 = arith.constant 0 : index
    %c0_3 = arith.constant 0 : index
    %1 = vector.load %arg2[%c0_2, %c0_3] : memref<1x32xf32, #tpu.memory_space<vmem>>, vector<1x32xf32>
    %2 = vector.shape_cast %1 : vector<1x32xf32> to vector<1x1x32xf32>
    %3 = vector.broadcast %2 : vector<1x1x32xf32> to vector<2x8x32xf32>
    %4 = arith.addf %0, %3 : vector<2x8x32xf32>
    %c0_4 = arith.constant 0 : index
    %c0_5 = arith.constant 0 : index
    %c0_6 = arith.constant 0 : index
    %5 = vector.load %arg3[%c0_4, %c0_5, %c0_6] : memref<2x1x32xf32, #tpu.memory_space<vmem>>, vector<1x1x32xf32>
    %6 = vector.shape_cast %5 : vector<1x1x32xf32> to vector<1x32xf32>
    %c0_7 = arith.constant 0 : index
    %c0_8 = arith.constant 0 : index
    %c0_9 = arith.constant 0 : index
    %7 = vector.load %arg4[%c0_7, %c0_8, %c0_9] : memref<2x1x32xf32, #tpu.memory_space<vmem>>, vector<1x1x32xf32>
    %8 = vector.shape_cast %7 : vector<1x1x32xf32> to vector<1x32xf32>
    %cst = arith.constant dense<0.000000e+00> : vector<2x8xf32>
    %9 = vector.multi_reduction <add>, %4, %cst [2] : vector<2x8x32xf32> to vector<2x8xf32>
    %10 = vector.shape_cast %9 : vector<2x8xf32> to vector<2x8x1xf32>
    %cst_10 = arith.constant 3.200000e+01 : f32
    %11 = vector.broadcast %cst_10 : f32 to vector<2x8x1xf32>
    %12 = arith.divf %10, %11 : vector<2x8x1xf32>
    %13 = arith.mulf %4, %4 : vector<2x8x32xf32>
    %cst_11 = arith.constant dense<0.000000e+00> : vector<2x8xf32>
    %14 = vector.multi_reduction <add>, %13, %cst_11 [2] : vector<2x8x32xf32> to vector<2x8xf32>
    %15 = vector.shape_cast %14 : vector<2x8xf32> to vector<2x8x1xf32>
    %cst_12 = arith.constant 3.200000e+01 : f32
    %16 = vector.broadcast %cst_12 : f32 to vector<2x8x1xf32>
    %17 = arith.divf %15, %16 : vector<2x8x1xf32>
    %18 = arith.mulf %12, %12 : vector<2x8x1xf32>
    %19 = arith.subf %17, %18 : vector<2x8x1xf32>
    %20 = vector.broadcast %12 : vector<2x8x1xf32> to vector<2x8x32xf32>
    %21 = arith.subf %4, %20 : vector<2x8x32xf32>
    %cst_13 = arith.constant 9.99999974E-6 : f32
    %22 = vector.broadcast %cst_13 : f32 to vector<2x8x1xf32>
    %23 = arith.addf %19, %22 : vector<2x8x1xf32>
    %24 = math.rsqrt %23 : vector<2x8x1xf32>
    %25 = vector.broadcast %24 : vector<2x8x1xf32> to vector<2x8x32xf32>
    %26 = arith.mulf %21, %25 : vector<2x8x32xf32>
    %27 = vector.shape_cast %6 : vector<1x32xf32> to vector<1x1x32xf32>
    %28 = vector.broadcast %27 : vector<1x1x32xf32> to vector<2x8x32xf32>
    %29 = arith.mulf %26, %28 : vector<2x8x32xf32>
    %30 = vector.shape_cast %8 : vector<1x32xf32> to vector<1x1x32xf32>
    %31 = vector.broadcast %30 : vector<1x1x32xf32> to vector<2x8x32xf32>
    %32 = arith.addf %29, %31 : vector<2x8x32xf32>
    %c0_14 = arith.constant 0 : index
    %c0_15 = arith.constant 0 : index
    %c0_16 = arith.constant 0 : index
    %c0_17 = arith.constant 0 : index
    %33 = vector.load %arg5[%c0_14, %c0_15, %c0_16, %c0_17] : memref<2x4x32x8xf32, #tpu.memory_space<vmem>>, vector<1x1x32x8xf32>
    %34 = vector.shape_cast %33 : vector<1x1x32x8xf32> to vector<32x8xf32>
    %cst_18 = arith.constant dense<0.000000e+00> : vector<2x8x8xf32>
    %35 = tpu.matmul %32, %34, %cst_18 {dimension_numbers = #tpu.dot_dimension_numbers<[2], [0], [0, 1], [1], [0, 0, 0, 1, 1, 1], [], []>} : vector<2x8x32xf32>, vector<32x8xf32>, vector<2x8x8xf32> -> vector<2x8x8xf32>
    %c0_19 = arith.constant 0 : index
    %c0_20 = arith.constant 0 : index
    %c0_21 = arith.constant 0 : index
    %c0_22 = arith.constant 0 : index
    %36 = vector.load %arg8[%c0_19, %c0_20, %c0_21, %c0_22] : memref<2x4x1x8xf32, #tpu.memory_space<vmem>>, vector<1x1x1x8xf32>
    %37 = vector.shape_cast %36 : vector<1x1x1x8xf32> to vector<1x8xf32>
    %38 = vector.shape_cast %37 : vector<1x8xf32> to vector<1x1x8xf32>
    %39 = vector.broadcast %38 : vector<1x1x8xf32> to vector<2x8x8xf32>
    %40 = arith.addf %35, %39 : vector<2x8x8xf32>
    %c0_23 = arith.constant 0 : index
    %c0_24 = arith.constant 0 : index
    %c0_25 = arith.constant 0 : index
    %c0_26 = arith.constant 0 : index
    %41 = vector.load %arg6[%c0_23, %c0_24, %c0_25, %c0_26] : memref<2x4x32x8xf32, #tpu.memory_space<vmem>>, vector<1x1x32x8xf32>
    %42 = vector.shape_cast %41 : vector<1x1x32x8xf32> to vector<32x8xf32>
    %cst_27 = arith.constant dense<0.000000e+00> : vector<2x8x8xf32>
    %43 = tpu.matmul %32, %42, %cst_27 {dimension_numbers = #tpu.dot_dimension_numbers<[2], [0], [0, 1], [1], [0, 0, 0, 1, 1, 1], [], []>} : vector<2x8x32xf32>, vector<32x8xf32>, vector<2x8x8xf32> -> vector<2x8x8xf32>
    %c0_28 = arith.constant 0 : index
    %c0_29 = arith.constant 0 : index
    %c0_30 = arith.constant 0 : index
    %c0_31 = arith.constant 0 : index
    %44 = vector.load %arg9[%c0_28, %c0_29, %c0_30, %c0_31] : memref<2x4x1x8xf32, #tpu.memory_space<vmem>>, vector<1x1x1x8xf32>
    %45 = vector.shape_cast %44 : vector<1x1x1x8xf32> to vector<1x8xf32>
    %46 = vector.shape_cast %45 : vector<1x8xf32> to vector<1x1x8xf32>
    %47 = vector.broadcast %46 : vector<1x1x8xf32> to vector<2x8x8xf32>
    %48 = arith.addf %43, %47 : vector<2x8x8xf32>
    %c0_32 = arith.constant 0 : index
    %c0_33 = arith.constant 0 : index
    %c0_34 = arith.constant 0 : index
    %c0_35 = arith.constant 0 : index
    %49 = vector.load %arg7[%c0_32, %c0_33, %c0_34, %c0_35] : memref<2x4x32x8xf32, #tpu.memory_space<vmem>>, vector<1x1x32x8xf32>
    %50 = vector.shape_cast %49 : vector<1x1x32x8xf32> to vector<32x8xf32>
    %cst_36 = arith.constant dense<0.000000e+00> : vector<2x8x8xf32>
    %51 = tpu.matmul %32, %50, %cst_36 {dimension_numbers = #tpu.dot_dimension_numbers<[2], [0], [0, 1], [1], [0, 0, 0, 1, 1, 1], [], []>} : vector<2x8x32xf32>, vector<32x8xf32>, vector<2x8x8xf32> -> vector<2x8x8xf32>
    %c0_37 = arith.constant 0 : index
    %c0_38 = arith.constant 0 : index
    %c0_39 = arith.constant 0 : index
    %c0_40 = arith.constant 0 : index
    %52 = vector.load %arg10[%c0_37, %c0_38, %c0_39, %c0_40] : memref<2x4x1x8xf32, #tpu.memory_space<vmem>>, vector<1x1x1x8xf32>
    %53 = vector.shape_cast %52 : vector<1x1x1x8xf32> to vector<1x8xf32>
    %54 = vector.shape_cast %53 : vector<1x8xf32> to vector<1x1x8xf32>
    %55 = vector.broadcast %54 : vector<1x1x8xf32> to vector<2x8x8xf32>
    %56 = arith.addf %51, %55 : vector<2x8x8xf32>
    "tpu.trace_start"() <{level = 10 : i32, message = "btk,bsk->bts"}> : () -> ()
    %cst_41 = arith.constant dense<0.000000e+00> : vector<2x8x8xf32>
    %57 = tpu.matmul %40, %48, %cst_41 {dimension_numbers = #tpu.dot_dimension_numbers<[2], [2], [1], [1], [0, 0, 0, 1, 1, 1], [0], [0]>} : vector<2x8x8xf32>, vector<2x8x8xf32>, vector<2x8x8xf32> -> vector<2x8x8xf32>
    "tpu.trace_stop"() : () -> ()
    %cst_42 = arith.constant 0.353553385 : f32
    %58 = vector.broadcast %cst_42 : f32 to vector<2x8x8xf32>
    %59 = arith.mulf %57, %58 : vector<2x8x8xf32>
    %cst_43 = arith.constant dense<0xFF800000> : vector<2x8xf32>
    %60 = vector.multi_reduction <maximumf>, %59, %cst_43 [2] : vector<2x8x8xf32> to vector<2x8xf32>
    %61 = vector.shape_cast %60 : vector<2x8xf32> to vector<2x8x1xf32>
    %62 = vector.broadcast %61 : vector<2x8x1xf32> to vector<2x8x8xf32>
    %63 = arith.subf %59, %62 : vector<2x8x8xf32>
    %64 = math.exp %63 : vector<2x8x8xf32>
    %cst_44 = arith.constant dense<0.000000e+00> : vector<2x8xf32>
    %65 = vector.multi_reduction <add>, %64, %cst_44 [2] : vector<2x8x8xf32> to vector<2x8xf32>
    %66 = vector.shape_cast %65 : vector<2x8xf32> to vector<2x8x1xf32>
    %67 = tpu.reciprocal %66 {approx = true} : vector<2x8x1xf32> -> vector<2x8x1xf32>
    %68 = vector.broadcast %67 : vector<2x8x1xf32> to vector<2x8x8xf32>
    %69 = arith.mulf %64, %68 : vector<2x8x8xf32>
    "tpu.trace_start"() <{level = 10 : i32, message = "bts,bsk->btk"}> : () -> ()
    %cst_45 = arith.constant dense<0.000000e+00> : vector<2x8x8xf32>
    %70 = tpu.matmul %69, %56, %cst_45 {dimension_numbers = #tpu.dot_dimension_numbers<[2], [1], [1], [2], [0, 0, 0, 1, 1, 2], [0], [0]>} : vector<2x8x8xf32>, vector<2x8x8xf32>, vector<2x8x8xf32> -> vector<2x8x8xf32>
    "tpu.trace_stop"() : () -> ()
    %c0_46 = arith.constant 0 : index
    %c0_47 = arith.constant 0 : index
    %c0_48 = arith.constant 0 : index
    %c0_49 = arith.constant 0 : index
    %71 = vector.load %arg11[%c0_46, %c0_47, %c0_48, %c0_49] : memref<2x4x8x32xf32, #tpu.memory_space<vmem>>, vector<1x1x8x32xf32>
    %72 = vector.shape_cast %71 : vector<1x1x8x32xf32> to vector<8x32xf32>
    %cst_50 = arith.constant dense<0.000000e+00> : vector<2x8x32xf32>
    %73 = tpu.matmul %70, %72, %cst_50 {dimension_numbers = #tpu.dot_dimension_numbers<[2], [0], [0, 1], [1], [0, 0, 0, 1, 1, 1], [], []>} : vector<2x8x8xf32>, vector<8x32xf32>, vector<2x8x32xf32> -> vector<2x8x32xf32>
    %c0_51 = arith.constant 0 : index
    %c1 = arith.constant 1 : index
    %c0_52 = arith.constant 0 : index
    %c0_53 = arith.constant 0 : index
    %74 = vector.load %arg5[%c0_51, %c1, %c0_52, %c0_53] : memref<2x4x32x8xf32, #tpu.memory_space<vmem>>, vector<1x1x32x8xf32>
    %75 = vector.shape_cast %74 : vector<1x1x32x8xf32> to vector<32x8xf32>
    %cst_54 = arith.constant dense<0.000000e+00> : vector<2x8x8xf32>
    %76 = tpu.matmul %32, %75, %cst_54 {dimension_numbers = #tpu.dot_dimension_numbers<[2], [0], [0, 1], [1], [0, 0, 0, 1, 1, 1], [], []>} : vector<2x8x32xf32>, vector<32x8xf32>, vector<2x8x8xf32> -> vector<2x8x8xf32>
    %c0_55 = arith.constant 0 : index
    %c1_56 = arith.constant 1 : index
    %c0_57 = arith.constant 0 : index
    %c0_58 = arith.constant 0 : index
    %77 = vector.load %arg8[%c0_55, %c1_56, %c0_57, %c0_58] : memref<2x4x1x8xf32, #tpu.memory_space<vmem>>, vector<1x1x1x8xf32>
    %78 = vector.shape_cast %77 : vector<1x1x1x8xf32> to vector<1x8xf32>
    %79 = vector.shape_cast %78 : vector<1x8xf32> to vector<1x1x8xf32>
    %80 = vector.broadcast %79 : vector<1x1x8xf32> to vector<2x8x8xf32>
    %81 = arith.addf %76, %80 : vector<2x8x8xf32>
    %c0_59 = arith.constant 0 : index
    %c1_60 = arith.constant 1 : index
    %c0_61 = arith.constant 0 : index
    %c0_62 = arith.constant 0 : index
    %82 = vector.load %arg6[%c0_59, %c1_60, %c0_61, %c0_62] : memref<2x4x32x8xf32, #tpu.memory_space<vmem>>, vector<1x1x32x8xf32>
    %83 = vector.shape_cast %82 : vector<1x1x32x8xf32> to vector<32x8xf32>
    %cst_63 = arith.constant dense<0.000000e+00> : vector<2x8x8xf32>
    %84 = tpu.matmul %32, %83, %cst_63 {dimension_numbers = #tpu.dot_dimension_numbers<[2], [0], [0, 1], [1], [0, 0, 0, 1, 1, 1], [], []>} : vector<2x8x32xf32>, vector<32x8xf32>, vector<2x8x8xf32> -> vector<2x8x8xf32>
    %c0_64 = arith.constant 0 : index
    %c1_65 = arith.constant 1 : index
    %c0_66 = arith.constant 0 : index
    %c0_67 = arith.constant 0 : index
    %85 = vector.load %arg9[%c0_64, %c1_65, %c0_66, %c0_67] : memref<2x4x1x8xf32, #tpu.memory_space<vmem>>, vector<1x1x1x8xf32>
    %86 = vector.shape_cast %85 : vector<1x1x1x8xf32> to vector<1x8xf32>
    %87 = vector.shape_cast %86 : vector<1x8xf32> to vector<1x1x8xf32>
    %88 = vector.broadcast %87 : vector<1x1x8xf32> to vector<2x8x8xf32>
    %89 = arith.addf %84, %88 : vector<2x8x8xf32>
    %c0_68 = arith.constant 0 : index
    %c1_69 = arith.constant 1 : index
    %c0_70 = arith.constant 0 : index
    %c0_71 = arith.constant 0 : index
    %90 = vector.load %arg7[%c0_68, %c1_69, %c0_70, %c0_71] : memref<2x4x32x8xf32, #tpu.memory_space<vmem>>, vector<1x1x32x8xf32>
    %91 = vector.shape_cast %90 : vector<1x1x32x8xf32> to vector<32x8xf32>
    %cst_72 = arith.constant dense<0.000000e+00> : vector<2x8x8xf32>
    %92 = tpu.matmul %32, %91, %cst_72 {dimension_numbers = #tpu.dot_dimension_numbers<[2], [0], [0, 1], [1], [0, 0, 0, 1, 1, 1], [], []>} : vector<2x8x32xf32>, vector<32x8xf32>, vector<2x8x8xf32> -> vector<2x8x8xf32>
    %c0_73 = arith.constant 0 : index
    %c1_74 = arith.constant 1 : index
    %c0_75 = arith.constant 0 : index
    %c0_76 = arith.constant 0 : index
    %93 = vector.load %arg10[%c0_73, %c1_74, %c0_75, %c0_76] : memref<2x4x1x8xf32, #tpu.memory_space<vmem>>, vector<1x1x1x8xf32>
    %94 = vector.shape_cast %93 : vector<1x1x1x8xf32> to vector<1x8xf32>
    %95 = vector.shape_cast %94 : vector<1x8xf32> to vector<1x1x8xf32>
    %96 = vector.broadcast %95 : vector<1x1x8xf32> to vector<2x8x8xf32>
    %97 = arith.addf %92, %96 : vector<2x8x8xf32>
    "tpu.trace_start"() <{level = 10 : i32, message = "btk,bsk->bts"}> : () -> ()
    %cst_77 = arith.constant dense<0.000000e+00> : vector<2x8x8xf32>
    %98 = tpu.matmul %81, %89, %cst_77 {dimension_numbers = #tpu.dot_dimension_numbers<[2], [2], [1], [1], [0, 0, 0, 1, 1, 1], [0], [0]>} : vector<2x8x8xf32>, vector<2x8x8xf32>, vector<2x8x8xf32> -> vector<2x8x8xf32>
    "tpu.trace_stop"() : () -> ()
    %cst_78 = arith.constant 0.353553385 : f32
    %99 = vector.broadcast %cst_78 : f32 to vector<2x8x8xf32>
    %100 = arith.mulf %98, %99 : vector<2x8x8xf32>
    %cst_79 = arith.constant dense<0xFF800000> : vector<2x8xf32>
    %101 = vector.multi_reduction <maximumf>, %100, %cst_79 [2] : vector<2x8x8xf32> to vector<2x8xf32>
    %102 = vector.shape_cast %101 : vector<2x8xf32> to vector<2x8x1xf32>
    %103 = vector.broadcast %102 : vector<2x8x1xf32> to vector<2x8x8xf32>
    %104 = arith.subf %100, %103 : vector<2x8x8xf32>
    %105 = math.exp %104 : vector<2x8x8xf32>
    %cst_80 = arith.constant dense<0.000000e+00> : vector<2x8xf32>
    %106 = vector.multi_reduction <add>, %105, %cst_80 [2] : vector<2x8x8xf32> to vector<2x8xf32>
    %107 = vector.shape_cast %106 : vector<2x8xf32> to vector<2x8x1xf32>
    %108 = tpu.reciprocal %107 {approx = true} : vector<2x8x1xf32> -> vector<2x8x1xf32>
    %109 = vector.broadcast %108 : vector<2x8x1xf32> to vector<2x8x8xf32>
    %110 = arith.mulf %105, %109 : vector<2x8x8xf32>
    "tpu.trace_start"() <{level = 10 : i32, message = "bts,bsk->btk"}> : () -> ()
    %cst_81 = arith.constant dense<0.000000e+00> : vector<2x8x8xf32>
    %111 = tpu.matmul %110, %97, %cst_81 {dimension_numbers = #tpu.dot_dimension_numbers<[2], [1], [1], [2], [0, 0, 0, 1, 1, 2], [0], [0]>} : vector<2x8x8xf32>, vector<2x8x8xf32>, vector<2x8x8xf32> -> vector<2x8x8xf32>
    "tpu.trace_stop"() : () -> ()
    %c0_82 = arith.constant 0 : index
    %c1_83 = arith.constant 1 : index
    %c0_84 = arith.constant 0 : index
    %c0_85 = arith.constant 0 : index
    %112 = vector.load %arg11[%c0_82, %c1_83, %c0_84, %c0_85] : memref<2x4x8x32xf32, #tpu.memory_space<vmem>>, vector<1x1x8x32xf32>
    %113 = vector.shape_cast %112 : vector<1x1x8x32xf32> to vector<8x32xf32>
    %cst_86 = arith.constant dense<0.000000e+00> : vector<2x8x32xf32>
    %114 = tpu.matmul %111, %113, %cst_86 {dimension_numbers = #tpu.dot_dimension_numbers<[2], [0], [0, 1], [1], [0, 0, 0, 1, 1, 1], [], []>} : vector<2x8x8xf32>, vector<8x32xf32>, vector<2x8x32xf32> -> vector<2x8x32xf32>
    %115 = arith.addf %73, %114 : vector<2x8x32xf32>
    %c0_87 = arith.constant 0 : index
    %c2 = arith.constant 2 : index
    %c0_88 = arith.constant 0 : index
    %c0_89 = arith.constant 0 : index
    %116 = vector.load %arg5[%c0_87, %c2, %c0_88, %c0_89] : memref<2x4x32x8xf32, #tpu.memory_space<vmem>>, vector<1x1x32x8xf32>
    %117 = vector.shape_cast %116 : vector<1x1x32x8xf32> to vector<32x8xf32>
    %cst_90 = arith.constant dense<0.000000e+00> : vector<2x8x8xf32>
    %118 = tpu.matmul %32, %117, %cst_90 {dimension_numbers = #tpu.dot_dimension_numbers<[2], [0], [0, 1], [1], [0, 0, 0, 1, 1, 1], [], []>} : vector<2x8x32xf32>, vector<32x8xf32>, vector<2x8x8xf32> -> vector<2x8x8xf32>
    %c0_91 = arith.constant 0 : index
    %c2_92 = arith.constant 2 : index
    %c0_93 = arith.constant 0 : index
    %c0_94 = arith.constant 0 : index
    %119 = vector.load %arg8[%c0_91, %c2_92, %c0_93, %c0_94] : memref<2x4x1x8xf32, #tpu.memory_space<vmem>>, vector<1x1x1x8xf32>
    %120 = vector.shape_cast %119 : vector<1x1x1x8xf32> to vector<1x8xf32>
    %121 = vector.shape_cast %120 : vector<1x8xf32> to vector<1x1x8xf32>
    %122 = vector.broadcast %121 : vector<1x1x8xf32> to vector<2x8x8xf32>
    %123 = arith.addf %118, %122 : vector<2x8x8xf32>
    %c0_95 = arith.constant 0 : index
    %c2_96 = arith.constant 2 : index
    %c0_97 = arith.constant 0 : index
    %c0_98 = arith.constant 0 : index
    %124 = vector.load %arg6[%c0_95, %c2_96, %c0_97, %c0_98] : memref<2x4x32x8xf32, #tpu.memory_space<vmem>>, vector<1x1x32x8xf32>
    %125 = vector.shape_cast %124 : vector<1x1x32x8xf32> to vector<32x8xf32>
    %cst_99 = arith.constant dense<0.000000e+00> : vector<2x8x8xf32>
    %126 = tpu.matmul %32, %125, %cst_99 {dimension_numbers = #tpu.dot_dimension_numbers<[2], [0], [0, 1], [1], [0, 0, 0, 1, 1, 1], [], []>} : vector<2x8x32xf32>, vector<32x8xf32>, vector<2x8x8xf32> -> vector<2x8x8xf32>
    %c0_100 = arith.constant 0 : index
    %c2_101 = arith.constant 2 : index
    %c0_102 = arith.constant 0 : index
    %c0_103 = arith.constant 0 : index
    %127 = vector.load %arg9[%c0_100, %c2_101, %c0_102, %c0_103] : memref<2x4x1x8xf32, #tpu.memory_space<vmem>>, vector<1x1x1x8xf32>
    %128 = vector.shape_cast %127 : vector<1x1x1x8xf32> to vector<1x8xf32>
    %129 = vector.shape_cast %128 : vector<1x8xf32> to vector<1x1x8xf32>
    %130 = vector.broadcast %129 : vector<1x1x8xf32> to vector<2x8x8xf32>
    %131 = arith.addf %126, %130 : vector<2x8x8xf32>
    %c0_104 = arith.constant 0 : index
    %c2_105 = arith.constant 2 : index
    %c0_106 = arith.constant 0 : index
    %c0_107 = arith.constant 0 : index
    %132 = vector.load %arg7[%c0_104, %c2_105, %c0_106, %c0_107] : memref<2x4x32x8xf32, #tpu.memory_space<vmem>>, vector<1x1x32x8xf32>
    %133 = vector.shape_cast %132 : vector<1x1x32x8xf32> to vector<32x8xf32>
    %cst_108 = arith.constant dense<0.000000e+00> : vector<2x8x8xf32>
    %134 = tpu.matmul %32, %133, %cst_108 {dimension_numbers = #tpu.dot_dimension_numbers<[2], [0], [0, 1], [1], [0, 0, 0, 1, 1, 1], [], []>} : vector<2x8x32xf32>, vector<32x8xf32>, vector<2x8x8xf32> -> vector<2x8x8xf32>
    %c0_109 = arith.constant 0 : index
    %c2_110 = arith.constant 2 : index
    %c0_111 = arith.constant 0 : index
    %c0_112 = arith.constant 0 : index
    %135 = vector.load %arg10[%c0_109, %c2_110, %c0_111, %c0_112] : memref<2x4x1x8xf32, #tpu.memory_space<vmem>>, vector<1x1x1x8xf32>
    %136 = vector.shape_cast %135 : vector<1x1x1x8xf32> to vector<1x8xf32>
    %137 = vector.shape_cast %136 : vector<1x8xf32> to vector<1x1x8xf32>
    %138 = vector.broadcast %137 : vector<1x1x8xf32> to vector<2x8x8xf32>
    %139 = arith.addf %134, %138 : vector<2x8x8xf32>
    "tpu.trace_start"() <{level = 10 : i32, message = "btk,bsk->bts"}> : () -> ()
    %cst_113 = arith.constant dense<0.000000e+00> : vector<2x8x8xf32>
    %140 = tpu.matmul %123, %131, %cst_113 {dimension_numbers = #tpu.dot_dimension_numbers<[2], [2], [1], [1], [0, 0, 0, 1, 1, 1], [0], [0]>} : vector<2x8x8xf32>, vector<2x8x8xf32>, vector<2x8x8xf32> -> vector<2x8x8xf32>
    "tpu.trace_stop"() : () -> ()
    %cst_114 = arith.constant 0.353553385 : f32
    %141 = vector.broadcast %cst_114 : f32 to vector<2x8x8xf32>
    %142 = arith.mulf %140, %141 : vector<2x8x8xf32>
    %cst_115 = arith.constant dense<0xFF800000> : vector<2x8xf32>
    %143 = vector.multi_reduction <maximumf>, %142, %cst_115 [2] : vector<2x8x8xf32> to vector<2x8xf32>
    %144 = vector.shape_cast %143 : vector<2x8xf32> to vector<2x8x1xf32>
    %145 = vector.broadcast %144 : vector<2x8x1xf32> to vector<2x8x8xf32>
    %146 = arith.subf %142, %145 : vector<2x8x8xf32>
    %147 = math.exp %146 : vector<2x8x8xf32>
    %cst_116 = arith.constant dense<0.000000e+00> : vector<2x8xf32>
    %148 = vector.multi_reduction <add>, %147, %cst_116 [2] : vector<2x8x8xf32> to vector<2x8xf32>
    %149 = vector.shape_cast %148 : vector<2x8xf32> to vector<2x8x1xf32>
    %150 = tpu.reciprocal %149 {approx = true} : vector<2x8x1xf32> -> vector<2x8x1xf32>
    %151 = vector.broadcast %150 : vector<2x8x1xf32> to vector<2x8x8xf32>
    %152 = arith.mulf %147, %151 : vector<2x8x8xf32>
    "tpu.trace_start"() <{level = 10 : i32, message = "bts,bsk->btk"}> : () -> ()
    %cst_117 = arith.constant dense<0.000000e+00> : vector<2x8x8xf32>
    %153 = tpu.matmul %152, %139, %cst_117 {dimension_numbers = #tpu.dot_dimension_numbers<[2], [1], [1], [2], [0, 0, 0, 1, 1, 2], [0], [0]>} : vector<2x8x8xf32>, vector<2x8x8xf32>, vector<2x8x8xf32> -> vector<2x8x8xf32>
    "tpu.trace_stop"() : () -> ()
    %c0_118 = arith.constant 0 : index
    %c2_119 = arith.constant 2 : index
    %c0_120 = arith.constant 0 : index
    %c0_121 = arith.constant 0 : index
    %154 = vector.load %arg11[%c0_118, %c2_119, %c0_120, %c0_121] : memref<2x4x8x32xf32, #tpu.memory_space<vmem>>, vector<1x1x8x32xf32>
    %155 = vector.shape_cast %154 : vector<1x1x8x32xf32> to vector<8x32xf32>
    %cst_122 = arith.constant dense<0.000000e+00> : vector<2x8x32xf32>
    %156 = tpu.matmul %153, %155, %cst_122 {dimension_numbers = #tpu.dot_dimension_numbers<[2], [0], [0, 1], [1], [0, 0, 0, 1, 1, 1], [], []>} : vector<2x8x8xf32>, vector<8x32xf32>, vector<2x8x32xf32> -> vector<2x8x32xf32>
    %157 = arith.addf %115, %156 : vector<2x8x32xf32>
    %c0_123 = arith.constant 0 : index
    %c3 = arith.constant 3 : index
    %c0_124 = arith.constant 0 : index
    %c0_125 = arith.constant 0 : index
    %158 = vector.load %arg5[%c0_123, %c3, %c0_124, %c0_125] : memref<2x4x32x8xf32, #tpu.memory_space<vmem>>, vector<1x1x32x8xf32>
    %159 = vector.shape_cast %158 : vector<1x1x32x8xf32> to vector<32x8xf32>
    %cst_126 = arith.constant dense<0.000000e+00> : vector<2x8x8xf32>
    %160 = tpu.matmul %32, %159, %cst_126 {dimension_numbers = #tpu.dot_dimension_numbers<[2], [0], [0, 1], [1], [0, 0, 0, 1, 1, 1], [], []>} : vector<2x8x32xf32>, vector<32x8xf32>, vector<2x8x8xf32> -> vector<2x8x8xf32>
    %c0_127 = arith.constant 0 : index
    %c3_128 = arith.constant 3 : index
    %c0_129 = arith.constant 0 : index
    %c0_130 = arith.constant 0 : index
    %161 = vector.load %arg8[%c0_127, %c3_128, %c0_129, %c0_130] : memref<2x4x1x8xf32, #tpu.memory_space<vmem>>, vector<1x1x1x8xf32>
    %162 = vector.shape_cast %161 : vector<1x1x1x8xf32> to vector<1x8xf32>
    %163 = vector.shape_cast %162 : vector<1x8xf32> to vector<1x1x8xf32>
    %164 = vector.broadcast %163 : vector<1x1x8xf32> to vector<2x8x8xf32>
    %165 = arith.addf %160, %164 : vector<2x8x8xf32>
    %c0_131 = arith.constant 0 : index
    %c3_132 = arith.constant 3 : index
    %c0_133 = arith.constant 0 : index
    %c0_134 = arith.constant 0 : index
    %166 = vector.load %arg6[%c0_131, %c3_132, %c0_133, %c0_134] : memref<2x4x32x8xf32, #tpu.memory_space<vmem>>, vector<1x1x32x8xf32>
    %167 = vector.shape_cast %166 : vector<1x1x32x8xf32> to vector<32x8xf32>
    %cst_135 = arith.constant dense<0.000000e+00> : vector<2x8x8xf32>
    %168 = tpu.matmul %32, %167, %cst_135 {dimension_numbers = #tpu.dot_dimension_numbers<[2], [0], [0, 1], [1], [0, 0, 0, 1, 1, 1], [], []>} : vector<2x8x32xf32>, vector<32x8xf32>, vector<2x8x8xf32> -> vector<2x8x8xf32>
    %c0_136 = arith.constant 0 : index
    %c3_137 = arith.constant 3 : index
    %c0_138 = arith.constant 0 : index
    %c0_139 = arith.constant 0 : index
    %169 = vector.load %arg9[%c0_136, %c3_137, %c0_138, %c0_139] : memref<2x4x1x8xf32, #tpu.memory_space<vmem>>, vector<1x1x1x8xf32>
    %170 = vector.shape_cast %169 : vector<1x1x1x8xf32> to vector<1x8xf32>
    %171 = vector.shape_cast %170 : vector<1x8xf32> to vector<1x1x8xf32>
    %172 = vector.broadcast %171 : vector<1x1x8xf32> to vector<2x8x8xf32>
    %173 = arith.addf %168, %172 : vector<2x8x8xf32>
    %c0_140 = arith.constant 0 : index
    %c3_141 = arith.constant 3 : index
    %c0_142 = arith.constant 0 : index
    %c0_143 = arith.constant 0 : index
    %174 = vector.load %arg7[%c0_140, %c3_141, %c0_142, %c0_143] : memref<2x4x32x8xf32, #tpu.memory_space<vmem>>, vector<1x1x32x8xf32>
    %175 = vector.shape_cast %174 : vector<1x1x32x8xf32> to vector<32x8xf32>
    %cst_144 = arith.constant dense<0.000000e+00> : vector<2x8x8xf32>
    %176 = tpu.matmul %32, %175, %cst_144 {dimension_numbers = #tpu.dot_dimension_numbers<[2], [0], [0, 1], [1], [0, 0, 0, 1, 1, 1], [], []>} : vector<2x8x32xf32>, vector<32x8xf32>, vector<2x8x8xf32> -> vector<2x8x8xf32>
    %c0_145 = arith.constant 0 : index
    %c3_146 = arith.constant 3 : index
    %c0_147 = arith.constant 0 : index
    %c0_148 = arith.constant 0 : index
    %177 = vector.load %arg10[%c0_145, %c3_146, %c0_147, %c0_148] : memref<2x4x1x8xf32, #tpu.memory_space<vmem>>, vector<1x1x1x8xf32>
    %178 = vector.shape_cast %177 : vector<1x1x1x8xf32> to vector<1x8xf32>
    %179 = vector.shape_cast %178 : vector<1x8xf32> to vector<1x1x8xf32>
    %180 = vector.broadcast %179 : vector<1x1x8xf32> to vector<2x8x8xf32>
    %181 = arith.addf %176, %180 : vector<2x8x8xf32>
    "tpu.trace_start"() <{level = 10 : i32, message = "btk,bsk->bts"}> : () -> ()
    %cst_149 = arith.constant dense<0.000000e+00> : vector<2x8x8xf32>
    %182 = tpu.matmul %165, %173, %cst_149 {dimension_numbers = #tpu.dot_dimension_numbers<[2], [2], [1], [1], [0, 0, 0, 1, 1, 1], [0], [0]>} : vector<2x8x8xf32>, vector<2x8x8xf32>, vector<2x8x8xf32> -> vector<2x8x8xf32>
    "tpu.trace_stop"() : () -> ()
    %cst_150 = arith.constant 0.353553385 : f32
    %183 = vector.broadcast %cst_150 : f32 to vector<2x8x8xf32>
    %184 = arith.mulf %182, %183 : vector<2x8x8xf32>
    %cst_151 = arith.constant dense<0xFF800000> : vector<2x8xf32>
    %185 = vector.multi_reduction <maximumf>, %184, %cst_151 [2] : vector<2x8x8xf32> to vector<2x8xf32>
    %186 = vector.shape_cast %185 : vector<2x8xf32> to vector<2x8x1xf32>
    %187 = vector.broadcast %186 : vector<2x8x1xf32> to vector<2x8x8xf32>
    %188 = arith.subf %184, %187 : vector<2x8x8xf32>
    %189 = math.exp %188 : vector<2x8x8xf32>
    %cst_152 = arith.constant dense<0.000000e+00> : vector<2x8xf32>
    %190 = vector.multi_reduction <add>, %189, %cst_152 [2] : vector<2x8x8xf32> to vector<2x8xf32>
    %191 = vector.shape_cast %190 : vector<2x8xf32> to vector<2x8x1xf32>
    %192 = tpu.reciprocal %191 {approx = true} : vector<2x8x1xf32> -> vector<2x8x1xf32>
    %193 = vector.broadcast %192 : vector<2x8x1xf32> to vector<2x8x8xf32>
    %194 = arith.mulf %189, %193 : vector<2x8x8xf32>
    "tpu.trace_start"() <{level = 10 : i32, message = "bts,bsk->btk"}> : () -> ()
    %cst_153 = arith.constant dense<0.000000e+00> : vector<2x8x8xf32>
    %195 = tpu.matmul %194, %181, %cst_153 {dimension_numbers = #tpu.dot_dimension_numbers<[2], [1], [1], [2], [0, 0, 0, 1, 1, 2], [0], [0]>} : vector<2x8x8xf32>, vector<2x8x8xf32>, vector<2x8x8xf32> -> vector<2x8x8xf32>
    "tpu.trace_stop"() : () -> ()
    %c0_154 = arith.constant 0 : index
    %c3_155 = arith.constant 3 : index
    %c0_156 = arith.constant 0 : index
    %c0_157 = arith.constant 0 : index
    %196 = vector.load %arg11[%c0_154, %c3_155, %c0_156, %c0_157] : memref<2x4x8x32xf32, #tpu.memory_space<vmem>>, vector<1x1x8x32xf32>
    %197 = vector.shape_cast %196 : vector<1x1x8x32xf32> to vector<8x32xf32>
    %cst_158 = arith.constant dense<0.000000e+00> : vector<2x8x32xf32>
    %198 = tpu.matmul %195, %197, %cst_158 {dimension_numbers = #tpu.dot_dimension_numbers<[2], [0], [0, 1], [1], [0, 0, 0, 1, 1, 1], [], []>} : vector<2x8x8xf32>, vector<8x32xf32>, vector<2x8x32xf32> -> vector<2x8x32xf32>
    %199 = arith.addf %157, %198 : vector<2x8x32xf32>
    %200 = arith.addf %4, %199 : vector<2x8x32xf32>
    %c0_159 = arith.constant 0 : index
    %c0_160 = arith.constant 0 : index
    %c0_161 = arith.constant 0 : index
    %201 = vector.load %arg12[%c0_159, %c0_160, %c0_161] : memref<2x1x32xf32, #tpu.memory_space<vmem>>, vector<1x1x32xf32>
    %202 = vector.shape_cast %201 : vector<1x1x32xf32> to vector<1x32xf32>
    %203 = vector.shape_cast %202 : vector<1x32xf32> to vector<1x1x32xf32>
    %204 = vector.broadcast %203 : vector<1x1x32xf32> to vector<2x8x32xf32>
    %205 = arith.addf %200, %204 : vector<2x8x32xf32>
    %c0_162 = arith.constant 0 : index
    %c0_163 = arith.constant 0 : index
    %c0_164 = arith.constant 0 : index
    %206 = vector.load %arg13[%c0_162, %c0_163, %c0_164] : memref<2x1x32xf32, #tpu.memory_space<vmem>>, vector<1x1x32xf32>
    %207 = vector.shape_cast %206 : vector<1x1x32xf32> to vector<1x32xf32>
    %c0_165 = arith.constant 0 : index
    %c0_166 = arith.constant 0 : index
    %c0_167 = arith.constant 0 : index
    %208 = vector.load %arg14[%c0_165, %c0_166, %c0_167] : memref<2x1x32xf32, #tpu.memory_space<vmem>>, vector<1x1x32xf32>
    %209 = vector.shape_cast %208 : vector<1x1x32xf32> to vector<1x32xf32>
    %cst_168 = arith.constant dense<0.000000e+00> : vector<2x8xf32>
    %210 = vector.multi_reduction <add>, %205, %cst_168 [2] : vector<2x8x32xf32> to vector<2x8xf32>
    %211 = vector.shape_cast %210 : vector<2x8xf32> to vector<2x8x1xf32>
    %cst_169 = arith.constant 3.200000e+01 : f32
    %212 = vector.broadcast %cst_169 : f32 to vector<2x8x1xf32>
    %213 = arith.divf %211, %212 : vector<2x8x1xf32>
    %214 = arith.mulf %205, %205 : vector<2x8x32xf32>
    %cst_170 = arith.constant dense<0.000000e+00> : vector<2x8xf32>
    %215 = vector.multi_reduction <add>, %214, %cst_170 [2] : vector<2x8x32xf32> to vector<2x8xf32>
    %216 = vector.shape_cast %215 : vector<2x8xf32> to vector<2x8x1xf32>
    %cst_171 = arith.constant 3.200000e+01 : f32
    %217 = vector.broadcast %cst_171 : f32 to vector<2x8x1xf32>
    %218 = arith.divf %216, %217 : vector<2x8x1xf32>
    %219 = arith.mulf %213, %213 : vector<2x8x1xf32>
    %220 = arith.subf %218, %219 : vector<2x8x1xf32>
    %221 = vector.broadcast %213 : vector<2x8x1xf32> to vector<2x8x32xf32>
    %222 = arith.subf %205, %221 : vector<2x8x32xf32>
    %cst_172 = arith.constant 9.99999974E-6 : f32
    %223 = vector.broadcast %cst_172 : f32 to vector<2x8x1xf32>
    %224 = arith.addf %220, %223 : vector<2x8x1xf32>
    %225 = math.rsqrt %224 : vector<2x8x1xf32>
    %226 = vector.broadcast %225 : vector<2x8x1xf32> to vector<2x8x32xf32>
    %227 = arith.mulf %222, %226 : vector<2x8x32xf32>
    %228 = vector.shape_cast %207 : vector<1x32xf32> to vector<1x1x32xf32>
    %229 = vector.broadcast %228 : vector<1x1x32xf32> to vector<2x8x32xf32>
    %230 = arith.mulf %227, %229 : vector<2x8x32xf32>
    %231 = vector.shape_cast %209 : vector<1x32xf32> to vector<1x1x32xf32>
    %232 = vector.broadcast %231 : vector<1x1x32xf32> to vector<2x8x32xf32>
    %233 = arith.addf %230, %232 : vector<2x8x32xf32>
    %c0_173 = arith.constant 0 : index
    %c0_174 = arith.constant 0 : index
    %c0_175 = arith.constant 0 : index
    %234 = vector.load %arg15[%c0_173, %c0_174, %c0_175] : memref<2x32x128xf32, #tpu.memory_space<vmem>>, vector<1x32x128xf32>
    %235 = vector.shape_cast %234 : vector<1x32x128xf32> to vector<32x128xf32>
    %cst_176 = arith.constant dense<0.000000e+00> : vector<2x8x128xf32>
    %236 = tpu.matmul %233, %235, %cst_176 {dimension_numbers = #tpu.dot_dimension_numbers<[2], [0], [0, 1], [1], [0, 0, 0, 1, 1, 1], [], []>} : vector<2x8x32xf32>, vector<32x128xf32>, vector<2x8x128xf32> -> vector<2x8x128xf32>
    %c0_177 = arith.constant 0 : index
    %c0_178 = arith.constant 0 : index
    %c0_179 = arith.constant 0 : index
    %237 = vector.load %arg16[%c0_177, %c0_178, %c0_179] : memref<2x1x128xf32, #tpu.memory_space<vmem>>, vector<1x1x128xf32>
    %238 = vector.shape_cast %237 : vector<1x1x128xf32> to vector<1x128xf32>
    %239 = vector.shape_cast %238 : vector<1x128xf32> to vector<1x1x128xf32>
    %240 = vector.broadcast %239 : vector<1x1x128xf32> to vector<2x8x128xf32>
    %241 = arith.addf %236, %240 : vector<2x8x128xf32>
    %cst_180 = arith.constant 5.000000e-01 : f32
    %242 = vector.broadcast %cst_180 : f32 to vector<2x8x128xf32>
    %243 = arith.mulf %242, %241 : vector<2x8x128xf32>
    %cst_181 = arith.constant 4.471500e-02 : f32
    %244 = vector.broadcast %cst_181 : f32 to vector<2x8x128xf32>
    %245 = arith.mulf %244, %241 : vector<2x8x128xf32>
    %246 = arith.mulf %245, %241 : vector<2x8x128xf32>
    %247 = arith.mulf %246, %241 : vector<2x8x128xf32>
    %248 = arith.addf %241, %247 : vector<2x8x128xf32>
    %cst_182 = arith.constant 0.797884583 : f32
    %249 = vector.broadcast %cst_182 : f32 to vector<2x8x128xf32>
    %250 = arith.mulf %249, %248 : vector<2x8x128xf32>
    %251 = math.tanh %250 : vector<2x8x128xf32>
    %cst_183 = arith.constant 1.000000e+00 : f32
    %252 = vector.broadcast %cst_183 : f32 to vector<2x8x128xf32>
    %253 = arith.addf %252, %251 : vector<2x8x128xf32>
    %254 = arith.mulf %243, %253 : vector<2x8x128xf32>
    %c0_184 = arith.constant 0 : index
    %c0_185 = arith.constant 0 : index
    %c0_186 = arith.constant 0 : index
    %255 = vector.load %arg17[%c0_184, %c0_185, %c0_186] : memref<2x128x32xf32, #tpu.memory_space<vmem>>, vector<1x128x32xf32>
    %256 = vector.shape_cast %255 : vector<1x128x32xf32> to vector<128x32xf32>
    %cst_187 = arith.constant dense<0.000000e+00> : vector<2x8x32xf32>
    %257 = tpu.matmul %254, %256, %cst_187 {dimension_numbers = #tpu.dot_dimension_numbers<[2], [0], [0, 1], [1], [0, 0, 0, 1, 1, 1], [], []>} : vector<2x8x128xf32>, vector<128x32xf32>, vector<2x8x32xf32> -> vector<2x8x32xf32>
    %258 = arith.addf %205, %257 : vector<2x8x32xf32>
    %c0_188 = arith.constant 0 : index
    %c0_189 = arith.constant 0 : index
    %c0_190 = arith.constant 0 : index
    %259 = vector.load %arg18[%c0_188, %c0_189, %c0_190] : memref<2x1x32xf32, #tpu.memory_space<vmem>>, vector<1x1x32xf32>
    %260 = vector.shape_cast %259 : vector<1x1x32xf32> to vector<1x32xf32>
    %261 = vector.shape_cast %260 : vector<1x32xf32> to vector<1x1x32xf32>
    %262 = vector.broadcast %261 : vector<1x1x32xf32> to vector<2x8x32xf32>
    %263 = arith.addf %258, %262 : vector<2x8x32xf32>
    %c1_191 = arith.constant 1 : index
    %c0_192 = arith.constant 0 : index
    %c0_193 = arith.constant 0 : index
    %264 = vector.load %arg3[%c1_191, %c0_192, %c0_193] : memref<2x1x32xf32, #tpu.memory_space<vmem>>, vector<1x1x32xf32>
    %265 = vector.shape_cast %264 : vector<1x1x32xf32> to vector<1x32xf32>
    %c1_194 = arith.constant 1 : index
    %c0_195 = arith.constant 0 : index
    %c0_196 = arith.constant 0 : index
    %266 = vector.load %arg4[%c1_194, %c0_195, %c0_196] : memref<2x1x32xf32, #tpu.memory_space<vmem>>, vector<1x1x32xf32>
    %267 = vector.shape_cast %266 : vector<1x1x32xf32> to vector<1x32xf32>
    %cst_197 = arith.constant dense<0.000000e+00> : vector<2x8xf32>
    %268 = vector.multi_reduction <add>, %263, %cst_197 [2] : vector<2x8x32xf32> to vector<2x8xf32>
    %269 = vector.shape_cast %268 : vector<2x8xf32> to vector<2x8x1xf32>
    %cst_198 = arith.constant 3.200000e+01 : f32
    %270 = vector.broadcast %cst_198 : f32 to vector<2x8x1xf32>
    %271 = arith.divf %269, %270 : vector<2x8x1xf32>
    %272 = arith.mulf %263, %263 : vector<2x8x32xf32>
    %cst_199 = arith.constant dense<0.000000e+00> : vector<2x8xf32>
    %273 = vector.multi_reduction <add>, %272, %cst_199 [2] : vector<2x8x32xf32> to vector<2x8xf32>
    %274 = vector.shape_cast %273 : vector<2x8xf32> to vector<2x8x1xf32>
    %cst_200 = arith.constant 3.200000e+01 : f32
    %275 = vector.broadcast %cst_200 : f32 to vector<2x8x1xf32>
    %276 = arith.divf %274, %275 : vector<2x8x1xf32>
    %277 = arith.mulf %271, %271 : vector<2x8x1xf32>
    %278 = arith.subf %276, %277 : vector<2x8x1xf32>
    %279 = vector.broadcast %271 : vector<2x8x1xf32> to vector<2x8x32xf32>
    %280 = arith.subf %263, %279 : vector<2x8x32xf32>
    %cst_201 = arith.constant 9.99999974E-6 : f32
    %281 = vector.broadcast %cst_201 : f32 to vector<2x8x1xf32>
    %282 = arith.addf %278, %281 : vector<2x8x1xf32>
    %283 = math.rsqrt %282 : vector<2x8x1xf32>
    %284 = vector.broadcast %283 : vector<2x8x1xf32> to vector<2x8x32xf32>
    %285 = arith.mulf %280, %284 : vector<2x8x32xf32>
    %286 = vector.shape_cast %265 : vector<1x32xf32> to vector<1x1x32xf32>
    %287 = vector.broadcast %286 : vector<1x1x32xf32> to vector<2x8x32xf32>
    %288 = arith.mulf %285, %287 : vector<2x8x32xf32>
    %289 = vector.shape_cast %267 : vector<1x32xf32> to vector<1x1x32xf32>
    %290 = vector.broadcast %289 : vector<1x1x32xf32> to vector<2x8x32xf32>
    %291 = arith.addf %288, %290 : vector<2x8x32xf32>
    %c1_202 = arith.constant 1 : index
    %c0_203 = arith.constant 0 : index
    %c0_204 = arith.constant 0 : index
    %c0_205 = arith.constant 0 : index
    %292 = vector.load %arg5[%c1_202, %c0_203, %c0_204, %c0_205] : memref<2x4x32x8xf32, #tpu.memory_space<vmem>>, vector<1x1x32x8xf32>
    %293 = vector.shape_cast %292 : vector<1x1x32x8xf32> to vector<32x8xf32>
    %cst_206 = arith.constant dense<0.000000e+00> : vector<2x8x8xf32>
    %294 = tpu.matmul %291, %293, %cst_206 {dimension_numbers = #tpu.dot_dimension_numbers<[2], [0], [0, 1], [1], [0, 0, 0, 1, 1, 1], [], []>} : vector<2x8x32xf32>, vector<32x8xf32>, vector<2x8x8xf32> -> vector<2x8x8xf32>
    %c1_207 = arith.constant 1 : index
    %c0_208 = arith.constant 0 : index
    %c0_209 = arith.constant 0 : index
    %c0_210 = arith.constant 0 : index
    %295 = vector.load %arg8[%c1_207, %c0_208, %c0_209, %c0_210] : memref<2x4x1x8xf32, #tpu.memory_space<vmem>>, vector<1x1x1x8xf32>
    %296 = vector.shape_cast %295 : vector<1x1x1x8xf32> to vector<1x8xf32>
    %297 = vector.shape_cast %296 : vector<1x8xf32> to vector<1x1x8xf32>
    %298 = vector.broadcast %297 : vector<1x1x8xf32> to vector<2x8x8xf32>
    %299 = arith.addf %294, %298 : vector<2x8x8xf32>
    %c1_211 = arith.constant 1 : index
    %c0_212 = arith.constant 0 : index
    %c0_213 = arith.constant 0 : index
    %c0_214 = arith.constant 0 : index
    %300 = vector.load %arg6[%c1_211, %c0_212, %c0_213, %c0_214] : memref<2x4x32x8xf32, #tpu.memory_space<vmem>>, vector<1x1x32x8xf32>
    %301 = vector.shape_cast %300 : vector<1x1x32x8xf32> to vector<32x8xf32>
    %cst_215 = arith.constant dense<0.000000e+00> : vector<2x8x8xf32>
    %302 = tpu.matmul %291, %301, %cst_215 {dimension_numbers = #tpu.dot_dimension_numbers<[2], [0], [0, 1], [1], [0, 0, 0, 1, 1, 1], [], []>} : vector<2x8x32xf32>, vector<32x8xf32>, vector<2x8x8xf32> -> vector<2x8x8xf32>
    %c1_216 = arith.constant 1 : index
    %c0_217 = arith.constant 0 : index
    %c0_218 = arith.constant 0 : index
    %c0_219 = arith.constant 0 : index
    %303 = vector.load %arg9[%c1_216, %c0_217, %c0_218, %c0_219] : memref<2x4x1x8xf32, #tpu.memory_space<vmem>>, vector<1x1x1x8xf32>
    %304 = vector.shape_cast %303 : vector<1x1x1x8xf32> to vector<1x8xf32>
    %305 = vector.shape_cast %304 : vector<1x8xf32> to vector<1x1x8xf32>
    %306 = vector.broadcast %305 : vector<1x1x8xf32> to vector<2x8x8xf32>
    %307 = arith.addf %302, %306 : vector<2x8x8xf32>
    %c1_220 = arith.constant 1 : index
    %c0_221 = arith.constant 0 : index
    %c0_222 = arith.constant 0 : index
    %c0_223 = arith.constant 0 : index
    %308 = vector.load %arg7[%c1_220, %c0_221, %c0_222, %c0_223] : memref<2x4x32x8xf32, #tpu.memory_space<vmem>>, vector<1x1x32x8xf32>
    %309 = vector.shape_cast %308 : vector<1x1x32x8xf32> to vector<32x8xf32>
    %cst_224 = arith.constant dense<0.000000e+00> : vector<2x8x8xf32>
    %310 = tpu.matmul %291, %309, %cst_224 {dimension_numbers = #tpu.dot_dimension_numbers<[2], [0], [0, 1], [1], [0, 0, 0, 1, 1, 1], [], []>} : vector<2x8x32xf32>, vector<32x8xf32>, vector<2x8x8xf32> -> vector<2x8x8xf32>
    %c1_225 = arith.constant 1 : index
    %c0_226 = arith.constant 0 : index
    %c0_227 = arith.constant 0 : index
    %c0_228 = arith.constant 0 : index
    %311 = vector.load %arg10[%c1_225, %c0_226, %c0_227, %c0_228] : memref<2x4x1x8xf32, #tpu.memory_space<vmem>>, vector<1x1x1x8xf32>
    %312 = vector.shape_cast %311 : vector<1x1x1x8xf32> to vector<1x8xf32>
    %313 = vector.shape_cast %312 : vector<1x8xf32> to vector<1x1x8xf32>
    %314 = vector.broadcast %313 : vector<1x1x8xf32> to vector<2x8x8xf32>
    %315 = arith.addf %310, %314 : vector<2x8x8xf32>
    "tpu.trace_start"() <{level = 10 : i32, message = "btk,bsk->bts"}> : () -> ()
    %cst_229 = arith.constant dense<0.000000e+00> : vector<2x8x8xf32>
    %316 = tpu.matmul %299, %307, %cst_229 {dimension_numbers = #tpu.dot_dimension_numbers<[2], [2], [1], [1], [0, 0, 0, 1, 1, 1], [0], [0]>} : vector<2x8x8xf32>, vector<2x8x8xf32>, vector<2x8x8xf32> -> vector<2x8x8xf32>
    "tpu.trace_stop"() : () -> ()
    %cst_230 = arith.constant 0.353553385 : f32
    %317 = vector.broadcast %cst_230 : f32 to vector<2x8x8xf32>
    %318 = arith.mulf %316, %317 : vector<2x8x8xf32>
    %cst_231 = arith.constant dense<0xFF800000> : vector<2x8xf32>
    %319 = vector.multi_reduction <maximumf>, %318, %cst_231 [2] : vector<2x8x8xf32> to vector<2x8xf32>
    %320 = vector.shape_cast %319 : vector<2x8xf32> to vector<2x8x1xf32>
    %321 = vector.broadcast %320 : vector<2x8x1xf32> to vector<2x8x8xf32>
    %322 = arith.subf %318, %321 : vector<2x8x8xf32>
    %323 = math.exp %322 : vector<2x8x8xf32>
    %cst_232 = arith.constant dense<0.000000e+00> : vector<2x8xf32>
    %324 = vector.multi_reduction <add>, %323, %cst_232 [2] : vector<2x8x8xf32> to vector<2x8xf32>
    %325 = vector.shape_cast %324 : vector<2x8xf32> to vector<2x8x1xf32>
    %326 = tpu.reciprocal %325 {approx = true} : vector<2x8x1xf32> -> vector<2x8x1xf32>
    %327 = vector.broadcast %326 : vector<2x8x1xf32> to vector<2x8x8xf32>
    %328 = arith.mulf %323, %327 : vector<2x8x8xf32>
    "tpu.trace_start"() <{level = 10 : i32, message = "bts,bsk->btk"}> : () -> ()
    %cst_233 = arith.constant dense<0.000000e+00> : vector<2x8x8xf32>
    %329 = tpu.matmul %328, %315, %cst_233 {dimension_numbers = #tpu.dot_dimension_numbers<[2], [1], [1], [2], [0, 0, 0, 1, 1, 2], [0], [0]>} : vector<2x8x8xf32>, vector<2x8x8xf32>, vector<2x8x8xf32> -> vector<2x8x8xf32>
    "tpu.trace_stop"() : () -> ()
    %c1_234 = arith.constant 1 : index
    %c0_235 = arith.constant 0 : index
    %c0_236 = arith.constant 0 : index
    %c0_237 = arith.constant 0 : index
    %330 = vector.load %arg11[%c1_234, %c0_235, %c0_236, %c0_237] : memref<2x4x8x32xf32, #tpu.memory_space<vmem>>, vector<1x1x8x32xf32>
    %331 = vector.shape_cast %330 : vector<1x1x8x32xf32> to vector<8x32xf32>
    %cst_238 = arith.constant dense<0.000000e+00> : vector<2x8x32xf32>
    %332 = tpu.matmul %329, %331, %cst_238 {dimension_numbers = #tpu.dot_dimension_numbers<[2], [0], [0, 1], [1], [0, 0, 0, 1, 1, 1], [], []>} : vector<2x8x8xf32>, vector<8x32xf32>, vector<2x8x32xf32> -> vector<2x8x32xf32>
    %c1_239 = arith.constant 1 : index
    %c1_240 = arith.constant 1 : index
    %c0_241 = arith.constant 0 : index
    %c0_242 = arith.constant 0 : index
    %333 = vector.load %arg5[%c1_239, %c1_240, %c0_241, %c0_242] : memref<2x4x32x8xf32, #tpu.memory_space<vmem>>, vector<1x1x32x8xf32>
    %334 = vector.shape_cast %333 : vector<1x1x32x8xf32> to vector<32x8xf32>
    %cst_243 = arith.constant dense<0.000000e+00> : vector<2x8x8xf32>
    %335 = tpu.matmul %291, %334, %cst_243 {dimension_numbers = #tpu.dot_dimension_numbers<[2], [0], [0, 1], [1], [0, 0, 0, 1, 1, 1], [], []>} : vector<2x8x32xf32>, vector<32x8xf32>, vector<2x8x8xf32> -> vector<2x8x8xf32>
    %c1_244 = arith.constant 1 : index
    %c1_245 = arith.constant 1 : index
    %c0_246 = arith.constant 0 : index
    %c0_247 = arith.constant 0 : index
    %336 = vector.load %arg8[%c1_244, %c1_245, %c0_246, %c0_247] : memref<2x4x1x8xf32, #tpu.memory_space<vmem>>, vector<1x1x1x8xf32>
    %337 = vector.shape_cast %336 : vector<1x1x1x8xf32> to vector<1x8xf32>
    %338 = vector.shape_cast %337 : vector<1x8xf32> to vector<1x1x8xf32>
    %339 = vector.broadcast %338 : vector<1x1x8xf32> to vector<2x8x8xf32>
    %340 = arith.addf %335, %339 : vector<2x8x8xf32>
    %c1_248 = arith.constant 1 : index
    %c1_249 = arith.constant 1 : index
    %c0_250 = arith.constant 0 : index
    %c0_251 = arith.constant 0 : index
    %341 = vector.load %arg6[%c1_248, %c1_249, %c0_250, %c0_251] : memref<2x4x32x8xf32, #tpu.memory_space<vmem>>, vector<1x1x32x8xf32>
    %342 = vector.shape_cast %341 : vector<1x1x32x8xf32> to vector<32x8xf32>
    %cst_252 = arith.constant dense<0.000000e+00> : vector<2x8x8xf32>
    %343 = tpu.matmul %291, %342, %cst_252 {dimension_numbers = #tpu.dot_dimension_numbers<[2], [0], [0, 1], [1], [0, 0, 0, 1, 1, 1], [], []>} : vector<2x8x32xf32>, vector<32x8xf32>, vector<2x8x8xf32> -> vector<2x8x8xf32>
    %c1_253 = arith.constant 1 : index
    %c1_254 = arith.constant 1 : index
    %c0_255 = arith.constant 0 : index
    %c0_256 = arith.constant 0 : index
    %344 = vector.load %arg9[%c1_253, %c1_254, %c0_255, %c0_256] : memref<2x4x1x8xf32, #tpu.memory_space<vmem>>, vector<1x1x1x8xf32>
    %345 = vector.shape_cast %344 : vector<1x1x1x8xf32> to vector<1x8xf32>
    %346 = vector.shape_cast %345 : vector<1x8xf32> to vector<1x1x8xf32>
    %347 = vector.broadcast %346 : vector<1x1x8xf32> to vector<2x8x8xf32>
    %348 = arith.addf %343, %347 : vector<2x8x8xf32>
    %c1_257 = arith.constant 1 : index
    %c1_258 = arith.constant 1 : index
    %c0_259 = arith.constant 0 : index
    %c0_260 = arith.constant 0 : index
    %349 = vector.load %arg7[%c1_257, %c1_258, %c0_259, %c0_260] : memref<2x4x32x8xf32, #tpu.memory_space<vmem>>, vector<1x1x32x8xf32>
    %350 = vector.shape_cast %349 : vector<1x1x32x8xf32> to vector<32x8xf32>
    %cst_261 = arith.constant dense<0.000000e+00> : vector<2x8x8xf32>
    %351 = tpu.matmul %291, %350, %cst_261 {dimension_numbers = #tpu.dot_dimension_numbers<[2], [0], [0, 1], [1], [0, 0, 0, 1, 1, 1], [], []>} : vector<2x8x32xf32>, vector<32x8xf32>, vector<2x8x8xf32> -> vector<2x8x8xf32>
    %c1_262 = arith.constant 1 : index
    %c1_263 = arith.constant 1 : index
    %c0_264 = arith.constant 0 : index
    %c0_265 = arith.constant 0 : index
    %352 = vector.load %arg10[%c1_262, %c1_263, %c0_264, %c0_265] : memref<2x4x1x8xf32, #tpu.memory_space<vmem>>, vector<1x1x1x8xf32>
    %353 = vector.shape_cast %352 : vector<1x1x1x8xf32> to vector<1x8xf32>
    %354 = vector.shape_cast %353 : vector<1x8xf32> to vector<1x1x8xf32>
    %355 = vector.broadcast %354 : vector<1x1x8xf32> to vector<2x8x8xf32>
    %356 = arith.addf %351, %355 : vector<2x8x8xf32>
    "tpu.trace_start"() <{level = 10 : i32, message = "btk,bsk->bts"}> : () -> ()
    %cst_266 = arith.constant dense<0.000000e+00> : vector<2x8x8xf32>
    %357 = tpu.matmul %340, %348, %cst_266 {dimension_numbers = #tpu.dot_dimension_numbers<[2], [2], [1], [1], [0, 0, 0, 1, 1, 1], [0], [0]>} : vector<2x8x8xf32>, vector<2x8x8xf32>, vector<2x8x8xf32> -> vector<2x8x8xf32>
    "tpu.trace_stop"() : () -> ()
    %cst_267 = arith.constant 0.353553385 : f32
    %358 = vector.broadcast %cst_267 : f32 to vector<2x8x8xf32>
    %359 = arith.mulf %357, %358 : vector<2x8x8xf32>
    %cst_268 = arith.constant dense<0xFF800000> : vector<2x8xf32>
    %360 = vector.multi_reduction <maximumf>, %359, %cst_268 [2] : vector<2x8x8xf32> to vector<2x8xf32>
    %361 = vector.shape_cast %360 : vector<2x8xf32> to vector<2x8x1xf32>
    %362 = vector.broadcast %361 : vector<2x8x1xf32> to vector<2x8x8xf32>
    %363 = arith.subf %359, %362 : vector<2x8x8xf32>
    %364 = math.exp %363 : vector<2x8x8xf32>
    %cst_269 = arith.constant dense<0.000000e+00> : vector<2x8xf32>
    %365 = vector.multi_reduction <add>, %364, %cst_269 [2] : vector<2x8x8xf32> to vector<2x8xf32>
    %366 = vector.shape_cast %365 : vector<2x8xf32> to vector<2x8x1xf32>
    %367 = tpu.reciprocal %366 {approx = true} : vector<2x8x1xf32> -> vector<2x8x1xf32>
    %368 = vector.broadcast %367 : vector<2x8x1xf32> to vector<2x8x8xf32>
    %369 = arith.mulf %364, %368 : vector<2x8x8xf32>
    "tpu.trace_start"() <{level = 10 : i32, message = "bts,bsk->btk"}> : () -> ()
    %cst_270 = arith.constant dense<0.000000e+00> : vector<2x8x8xf32>
    %370 = tpu.matmul %369, %356, %cst_270 {dimension_numbers = #tpu.dot_dimension_numbers<[2], [1], [1], [2], [0, 0, 0, 1, 1, 2], [0], [0]>} : vector<2x8x8xf32>, vector<2x8x8xf32>, vector<2x8x8xf32> -> vector<2x8x8xf32>
    "tpu.trace_stop"() : () -> ()
    %c1_271 = arith.constant 1 : index
    %c1_272 = arith.constant 1 : index
    %c0_273 = arith.constant 0 : index
    %c0_274 = arith.constant 0 : index
    %371 = vector.load %arg11[%c1_271, %c1_272, %c0_273, %c0_274] : memref<2x4x8x32xf32, #tpu.memory_space<vmem>>, vector<1x1x8x32xf32>
    %372 = vector.shape_cast %371 : vector<1x1x8x32xf32> to vector<8x32xf32>
    %cst_275 = arith.constant dense<0.000000e+00> : vector<2x8x32xf32>
    %373 = tpu.matmul %370, %372, %cst_275 {dimension_numbers = #tpu.dot_dimension_numbers<[2], [0], [0, 1], [1], [0, 0, 0, 1, 1, 1], [], []>} : vector<2x8x8xf32>, vector<8x32xf32>, vector<2x8x32xf32> -> vector<2x8x32xf32>
    %374 = arith.addf %332, %373 : vector<2x8x32xf32>
    %c1_276 = arith.constant 1 : index
    %c2_277 = arith.constant 2 : index
    %c0_278 = arith.constant 0 : index
    %c0_279 = arith.constant 0 : index
    %375 = vector.load %arg5[%c1_276, %c2_277, %c0_278, %c0_279] : memref<2x4x32x8xf32, #tpu.memory_space<vmem>>, vector<1x1x32x8xf32>
    %376 = vector.shape_cast %375 : vector<1x1x32x8xf32> to vector<32x8xf32>
    %cst_280 = arith.constant dense<0.000000e+00> : vector<2x8x8xf32>
    %377 = tpu.matmul %291, %376, %cst_280 {dimension_numbers = #tpu.dot_dimension_numbers<[2], [0], [0, 1], [1], [0, 0, 0, 1, 1, 1], [], []>} : vector<2x8x32xf32>, vector<32x8xf32>, vector<2x8x8xf32> -> vector<2x8x8xf32>
    %c1_281 = arith.constant 1 : index
    %c2_282 = arith.constant 2 : index
    %c0_283 = arith.constant 0 : index
    %c0_284 = arith.constant 0 : index
    %378 = vector.load %arg8[%c1_281, %c2_282, %c0_283, %c0_284] : memref<2x4x1x8xf32, #tpu.memory_space<vmem>>, vector<1x1x1x8xf32>
    %379 = vector.shape_cast %378 : vector<1x1x1x8xf32> to vector<1x8xf32>
    %380 = vector.shape_cast %379 : vector<1x8xf32> to vector<1x1x8xf32>
    %381 = vector.broadcast %380 : vector<1x1x8xf32> to vector<2x8x8xf32>
    %382 = arith.addf %377, %381 : vector<2x8x8xf32>
    %c1_285 = arith.constant 1 : index
    %c2_286 = arith.constant 2 : index
    %c0_287 = arith.constant 0 : index
    %c0_288 = arith.constant 0 : index
    %383 = vector.load %arg6[%c1_285, %c2_286, %c0_287, %c0_288] : memref<2x4x32x8xf32, #tpu.memory_space<vmem>>, vector<1x1x32x8xf32>
    %384 = vector.shape_cast %383 : vector<1x1x32x8xf32> to vector<32x8xf32>
    %cst_289 = arith.constant dense<0.000000e+00> : vector<2x8x8xf32>
    %385 = tpu.matmul %291, %384, %cst_289 {dimension_numbers = #tpu.dot_dimension_numbers<[2], [0], [0, 1], [1], [0, 0, 0, 1, 1, 1], [], []>} : vector<2x8x32xf32>, vector<32x8xf32>, vector<2x8x8xf32> -> vector<2x8x8xf32>
    %c1_290 = arith.constant 1 : index
    %c2_291 = arith.constant 2 : index
    %c0_292 = arith.constant 0 : index
    %c0_293 = arith.constant 0 : index
    %386 = vector.load %arg9[%c1_290, %c2_291, %c0_292, %c0_293] : memref<2x4x1x8xf32, #tpu.memory_space<vmem>>, vector<1x1x1x8xf32>
    %387 = vector.shape_cast %386 : vector<1x1x1x8xf32> to vector<1x8xf32>
    %388 = vector.shape_cast %387 : vector<1x8xf32> to vector<1x1x8xf32>
    %389 = vector.broadcast %388 : vector<1x1x8xf32> to vector<2x8x8xf32>
    %390 = arith.addf %385, %389 : vector<2x8x8xf32>
    %c1_294 = arith.constant 1 : index
    %c2_295 = arith.constant 2 : index
    %c0_296 = arith.constant 0 : index
    %c0_297 = arith.constant 0 : index
    %391 = vector.load %arg7[%c1_294, %c2_295, %c0_296, %c0_297] : memref<2x4x32x8xf32, #tpu.memory_space<vmem>>, vector<1x1x32x8xf32>
    %392 = vector.shape_cast %391 : vector<1x1x32x8xf32> to vector<32x8xf32>
    %cst_298 = arith.constant dense<0.000000e+00> : vector<2x8x8xf32>
    %393 = tpu.matmul %291, %392, %cst_298 {dimension_numbers = #tpu.dot_dimension_numbers<[2], [0], [0, 1], [1], [0, 0, 0, 1, 1, 1], [], []>} : vector<2x8x32xf32>, vector<32x8xf32>, vector<2x8x8xf32> -> vector<2x8x8xf32>
    %c1_299 = arith.constant 1 : index
    %c2_300 = arith.constant 2 : index
    %c0_301 = arith.constant 0 : index
    %c0_302 = arith.constant 0 : index
    %394 = vector.load %arg10[%c1_299, %c2_300, %c0_301, %c0_302] : memref<2x4x1x8xf32, #tpu.memory_space<vmem>>, vector<1x1x1x8xf32>
    %395 = vector.shape_cast %394 : vector<1x1x1x8xf32> to vector<1x8xf32>
    %396 = vector.shape_cast %395 : vector<1x8xf32> to vector<1x1x8xf32>
    %397 = vector.broadcast %396 : vector<1x1x8xf32> to vector<2x8x8xf32>
    %398 = arith.addf %393, %397 : vector<2x8x8xf32>
    "tpu.trace_start"() <{level = 10 : i32, message = "btk,bsk->bts"}> : () -> ()
    %cst_303 = arith.constant dense<0.000000e+00> : vector<2x8x8xf32>
    %399 = tpu.matmul %382, %390, %cst_303 {dimension_numbers = #tpu.dot_dimension_numbers<[2], [2], [1], [1], [0, 0, 0, 1, 1, 1], [0], [0]>} : vector<2x8x8xf32>, vector<2x8x8xf32>, vector<2x8x8xf32> -> vector<2x8x8xf32>
    "tpu.trace_stop"() : () -> ()
    %cst_304 = arith.constant 0.353553385 : f32
    %400 = vector.broadcast %cst_304 : f32 to vector<2x8x8xf32>
    %401 = arith.mulf %399, %400 : vector<2x8x8xf32>
    %cst_305 = arith.constant dense<0xFF800000> : vector<2x8xf32>
    %402 = vector.multi_reduction <maximumf>, %401, %cst_305 [2] : vector<2x8x8xf32> to vector<2x8xf32>
    %403 = vector.shape_cast %402 : vector<2x8xf32> to vector<2x8x1xf32>
    %404 = vector.broadcast %403 : vector<2x8x1xf32> to vector<2x8x8xf32>
    %405 = arith.subf %401, %404 : vector<2x8x8xf32>
    %406 = math.exp %405 : vector<2x8x8xf32>
    %cst_306 = arith.constant dense<0.000000e+00> : vector<2x8xf32>
    %407 = vector.multi_reduction <add>, %406, %cst_306 [2] : vector<2x8x8xf32> to vector<2x8xf32>
    %408 = vector.shape_cast %407 : vector<2x8xf32> to vector<2x8x1xf32>
    %409 = tpu.reciprocal %408 {approx = true} : vector<2x8x1xf32> -> vector<2x8x1xf32>
    %410 = vector.broadcast %409 : vector<2x8x1xf32> to vector<2x8x8xf32>
    %411 = arith.mulf %406, %410 : vector<2x8x8xf32>
    "tpu.trace_start"() <{level = 10 : i32, message = "bts,bsk->btk"}> : () -> ()
    %cst_307 = arith.constant dense<0.000000e+00> : vector<2x8x8xf32>
    %412 = tpu.matmul %411, %398, %cst_307 {dimension_numbers = #tpu.dot_dimension_numbers<[2], [1], [1], [2], [0, 0, 0, 1, 1, 2], [0], [0]>} : vector<2x8x8xf32>, vector<2x8x8xf32>, vector<2x8x8xf32> -> vector<2x8x8xf32>
    "tpu.trace_stop"() : () -> ()
    %c1_308 = arith.constant 1 : index
    %c2_309 = arith.constant 2 : index
    %c0_310 = arith.constant 0 : index
    %c0_311 = arith.constant 0 : index
    %413 = vector.load %arg11[%c1_308, %c2_309, %c0_310, %c0_311] : memref<2x4x8x32xf32, #tpu.memory_space<vmem>>, vector<1x1x8x32xf32>
    %414 = vector.shape_cast %413 : vector<1x1x8x32xf32> to vector<8x32xf32>
    %cst_312 = arith.constant dense<0.000000e+00> : vector<2x8x32xf32>
    %415 = tpu.matmul %412, %414, %cst_312 {dimension_numbers = #tpu.dot_dimension_numbers<[2], [0], [0, 1], [1], [0, 0, 0, 1, 1, 1], [], []>} : vector<2x8x8xf32>, vector<8x32xf32>, vector<2x8x32xf32> -> vector<2x8x32xf32>
    %416 = arith.addf %374, %415 : vector<2x8x32xf32>
    %c1_313 = arith.constant 1 : index
    %c3_314 = arith.constant 3 : index
    %c0_315 = arith.constant 0 : index
    %c0_316 = arith.constant 0 : index
    %417 = vector.load %arg5[%c1_313, %c3_314, %c0_315, %c0_316] : memref<2x4x32x8xf32, #tpu.memory_space<vmem>>, vector<1x1x32x8xf32>
    %418 = vector.shape_cast %417 : vector<1x1x32x8xf32> to vector<32x8xf32>
    %cst_317 = arith.constant dense<0.000000e+00> : vector<2x8x8xf32>
    %419 = tpu.matmul %291, %418, %cst_317 {dimension_numbers = #tpu.dot_dimension_numbers<[2], [0], [0, 1], [1], [0, 0, 0, 1, 1, 1], [], []>} : vector<2x8x32xf32>, vector<32x8xf32>, vector<2x8x8xf32> -> vector<2x8x8xf32>
    %c1_318 = arith.constant 1 : index
    %c3_319 = arith.constant 3 : index
    %c0_320 = arith.constant 0 : index
    %c0_321 = arith.constant 0 : index
    %420 = vector.load %arg8[%c1_318, %c3_319, %c0_320, %c0_321] : memref<2x4x1x8xf32, #tpu.memory_space<vmem>>, vector<1x1x1x8xf32>
    %421 = vector.shape_cast %420 : vector<1x1x1x8xf32> to vector<1x8xf32>
    %422 = vector.shape_cast %421 : vector<1x8xf32> to vector<1x1x8xf32>
    %423 = vector.broadcast %422 : vector<1x1x8xf32> to vector<2x8x8xf32>
    %424 = arith.addf %419, %423 : vector<2x8x8xf32>
    %c1_322 = arith.constant 1 : index
    %c3_323 = arith.constant 3 : index
    %c0_324 = arith.constant 0 : index
    %c0_325 = arith.constant 0 : index
    %425 = vector.load %arg6[%c1_322, %c3_323, %c0_324, %c0_325] : memref<2x4x32x8xf32, #tpu.memory_space<vmem>>, vector<1x1x32x8xf32>
    %426 = vector.shape_cast %425 : vector<1x1x32x8xf32> to vector<32x8xf32>
    %cst_326 = arith.constant dense<0.000000e+00> : vector<2x8x8xf32>
    %427 = tpu.matmul %291, %426, %cst_326 {dimension_numbers = #tpu.dot_dimension_numbers<[2], [0], [0, 1], [1], [0, 0, 0, 1, 1, 1], [], []>} : vector<2x8x32xf32>, vector<32x8xf32>, vector<2x8x8xf32> -> vector<2x8x8xf32>
    %c1_327 = arith.constant 1 : index
    %c3_328 = arith.constant 3 : index
    %c0_329 = arith.constant 0 : index
    %c0_330 = arith.constant 0 : index
    %428 = vector.load %arg9[%c1_327, %c3_328, %c0_329, %c0_330] : memref<2x4x1x8xf32, #tpu.memory_space<vmem>>, vector<1x1x1x8xf32>
    %429 = vector.shape_cast %428 : vector<1x1x1x8xf32> to vector<1x8xf32>
    %430 = vector.shape_cast %429 : vector<1x8xf32> to vector<1x1x8xf32>
    %431 = vector.broadcast %430 : vector<1x1x8xf32> to vector<2x8x8xf32>
    %432 = arith.addf %427, %431 : vector<2x8x8xf32>
    %c1_331 = arith.constant 1 : index
    %c3_332 = arith.constant 3 : index
    %c0_333 = arith.constant 0 : index
    %c0_334 = arith.constant 0 : index
    %433 = vector.load %arg7[%c1_331, %c3_332, %c0_333, %c0_334] : memref<2x4x32x8xf32, #tpu.memory_space<vmem>>, vector<1x1x32x8xf32>
    %434 = vector.shape_cast %433 : vector<1x1x32x8xf32> to vector<32x8xf32>
    %cst_335 = arith.constant dense<0.000000e+00> : vector<2x8x8xf32>
    %435 = tpu.matmul %291, %434, %cst_335 {dimension_numbers = #tpu.dot_dimension_numbers<[2], [0], [0, 1], [1], [0, 0, 0, 1, 1, 1], [], []>} : vector<2x8x32xf32>, vector<32x8xf32>, vector<2x8x8xf32> -> vector<2x8x8xf32>
    %c1_336 = arith.constant 1 : index
    %c3_337 = arith.constant 3 : index
    %c0_338 = arith.constant 0 : index
    %c0_339 = arith.constant 0 : index
    %436 = vector.load %arg10[%c1_336, %c3_337, %c0_338, %c0_339] : memref<2x4x1x8xf32, #tpu.memory_space<vmem>>, vector<1x1x1x8xf32>
    %437 = vector.shape_cast %436 : vector<1x1x1x8xf32> to vector<1x8xf32>
    %438 = vector.shape_cast %437 : vector<1x8xf32> to vector<1x1x8xf32>
    %439 = vector.broadcast %438 : vector<1x1x8xf32> to vector<2x8x8xf32>
    %440 = arith.addf %435, %439 : vector<2x8x8xf32>
    "tpu.trace_start"() <{level = 10 : i32, message = "btk,bsk->bts"}> : () -> ()
    %cst_340 = arith.constant dense<0.000000e+00> : vector<2x8x8xf32>
    %441 = tpu.matmul %424, %432, %cst_340 {dimension_numbers = #tpu.dot_dimension_numbers<[2], [2], [1], [1], [0, 0, 0, 1, 1, 1], [0], [0]>} : vector<2x8x8xf32>, vector<2x8x8xf32>, vector<2x8x8xf32> -> vector<2x8x8xf32>
    "tpu.trace_stop"() : () -> ()
    %cst_341 = arith.constant 0.353553385 : f32
    %442 = vector.broadcast %cst_341 : f32 to vector<2x8x8xf32>
    %443 = arith.mulf %441, %442 : vector<2x8x8xf32>
    %cst_342 = arith.constant dense<0xFF800000> : vector<2x8xf32>
    %444 = vector.multi_reduction <maximumf>, %443, %cst_342 [2] : vector<2x8x8xf32> to vector<2x8xf32>
    %445 = vector.shape_cast %444 : vector<2x8xf32> to vector<2x8x1xf32>
    %446 = vector.broadcast %445 : vector<2x8x1xf32> to vector<2x8x8xf32>
    %447 = arith.subf %443, %446 : vector<2x8x8xf32>
    %448 = math.exp %447 : vector<2x8x8xf32>
    %cst_343 = arith.constant dense<0.000000e+00> : vector<2x8xf32>
    %449 = vector.multi_reduction <add>, %448, %cst_343 [2] : vector<2x8x8xf32> to vector<2x8xf32>
    %450 = vector.shape_cast %449 : vector<2x8xf32> to vector<2x8x1xf32>
    %451 = tpu.reciprocal %450 {approx = true} : vector<2x8x1xf32> -> vector<2x8x1xf32>
    %452 = vector.broadcast %451 : vector<2x8x1xf32> to vector<2x8x8xf32>
    %453 = arith.mulf %448, %452 : vector<2x8x8xf32>
    "tpu.trace_start"() <{level = 10 : i32, message = "bts,bsk->btk"}> : () -> ()
    %cst_344 = arith.constant dense<0.000000e+00> : vector<2x8x8xf32>
    %454 = tpu.matmul %453, %440, %cst_344 {dimension_numbers = #tpu.dot_dimension_numbers<[2], [1], [1], [2], [0, 0, 0, 1, 1, 2], [0], [0]>} : vector<2x8x8xf32>, vector<2x8x8xf32>, vector<2x8x8xf32> -> vector<2x8x8xf32>
    "tpu.trace_stop"() : () -> ()
    %c1_345 = arith.constant 1 : index
    %c3_346 = arith.constant 3 : index
    %c0_347 = arith.constant 0 : index
    %c0_348 = arith.constant 0 : index
    %455 = vector.load %arg11[%c1_345, %c3_346, %c0_347, %c0_348] : memref<2x4x8x32xf32, #tpu.memory_space<vmem>>, vector<1x1x8x32xf32>
    %456 = vector.shape_cast %455 : vector<1x1x8x32xf32> to vector<8x32xf32>
    %cst_349 = arith.constant dense<0.000000e+00> : vector<2x8x32xf32>
    %457 = tpu.matmul %454, %456, %cst_349 {dimension_numbers = #tpu.dot_dimension_numbers<[2], [0], [0, 1], [1], [0, 0, 0, 1, 1, 1], [], []>} : vector<2x8x8xf32>, vector<8x32xf32>, vector<2x8x32xf32> -> vector<2x8x32xf32>
    %458 = arith.addf %416, %457 : vector<2x8x32xf32>
    %459 = arith.addf %263, %458 : vector<2x8x32xf32>
    %c1_350 = arith.constant 1 : index
    %c0_351 = arith.constant 0 : index
    %c0_352 = arith.constant 0 : index
    %460 = vector.load %arg12[%c1_350, %c0_351, %c0_352] : memref<2x1x32xf32, #tpu.memory_space<vmem>>, vector<1x1x32xf32>
    %461 = vector.shape_cast %460 : vector<1x1x32xf32> to vector<1x32xf32>
    %462 = vector.shape_cast %461 : vector<1x32xf32> to vector<1x1x32xf32>
    %463 = vector.broadcast %462 : vector<1x1x32xf32> to vector<2x8x32xf32>
    %464 = arith.addf %459, %463 : vector<2x8x32xf32>
    %c1_353 = arith.constant 1 : index
    %c0_354 = arith.constant 0 : index
    %c0_355 = arith.constant 0 : index
    %465 = vector.load %arg13[%c1_353, %c0_354, %c0_355] : memref<2x1x32xf32, #tpu.memory_space<vmem>>, vector<1x1x32xf32>
    %466 = vector.shape_cast %465 : vector<1x1x32xf32> to vector<1x32xf32>
    %c1_356 = arith.constant 1 : index
    %c0_357 = arith.constant 0 : index
    %c0_358 = arith.constant 0 : index
    %467 = vector.load %arg14[%c1_356, %c0_357, %c0_358] : memref<2x1x32xf32, #tpu.memory_space<vmem>>, vector<1x1x32xf32>
    %468 = vector.shape_cast %467 : vector<1x1x32xf32> to vector<1x32xf32>
    %cst_359 = arith.constant dense<0.000000e+00> : vector<2x8xf32>
    %469 = vector.multi_reduction <add>, %464, %cst_359 [2] : vector<2x8x32xf32> to vector<2x8xf32>
    %470 = vector.shape_cast %469 : vector<2x8xf32> to vector<2x8x1xf32>
    %cst_360 = arith.constant 3.200000e+01 : f32
    %471 = vector.broadcast %cst_360 : f32 to vector<2x8x1xf32>
    %472 = arith.divf %470, %471 : vector<2x8x1xf32>
    %473 = arith.mulf %464, %464 : vector<2x8x32xf32>
    %cst_361 = arith.constant dense<0.000000e+00> : vector<2x8xf32>
    %474 = vector.multi_reduction <add>, %473, %cst_361 [2] : vector<2x8x32xf32> to vector<2x8xf32>
    %475 = vector.shape_cast %474 : vector<2x8xf32> to vector<2x8x1xf32>
    %cst_362 = arith.constant 3.200000e+01 : f32
    %476 = vector.broadcast %cst_362 : f32 to vector<2x8x1xf32>
    %477 = arith.divf %475, %476 : vector<2x8x1xf32>
    %478 = arith.mulf %472, %472 : vector<2x8x1xf32>
    %479 = arith.subf %477, %478 : vector<2x8x1xf32>
    %480 = vector.broadcast %472 : vector<2x8x1xf32> to vector<2x8x32xf32>
    %481 = arith.subf %464, %480 : vector<2x8x32xf32>
    %cst_363 = arith.constant 9.99999974E-6 : f32
    %482 = vector.broadcast %cst_363 : f32 to vector<2x8x1xf32>
    %483 = arith.addf %479, %482 : vector<2x8x1xf32>
    %484 = math.rsqrt %483 : vector<2x8x1xf32>
    %485 = vector.broadcast %484 : vector<2x8x1xf32> to vector<2x8x32xf32>
    %486 = arith.mulf %481, %485 : vector<2x8x32xf32>
    %487 = vector.shape_cast %466 : vector<1x32xf32> to vector<1x1x32xf32>
    %488 = vector.broadcast %487 : vector<1x1x32xf32> to vector<2x8x32xf32>
    %489 = arith.mulf %486, %488 : vector<2x8x32xf32>
    %490 = vector.shape_cast %468 : vector<1x32xf32> to vector<1x1x32xf32>
    %491 = vector.broadcast %490 : vector<1x1x32xf32> to vector<2x8x32xf32>
    %492 = arith.addf %489, %491 : vector<2x8x32xf32>
    %c1_364 = arith.constant 1 : index
    %c0_365 = arith.constant 0 : index
    %c0_366 = arith.constant 0 : index
    %493 = vector.load %arg15[%c1_364, %c0_365, %c0_366] : memref<2x32x128xf32, #tpu.memory_space<vmem>>, vector<1x32x128xf32>
    %494 = vector.shape_cast %493 : vector<1x32x128xf32> to vector<32x128xf32>
    %cst_367 = arith.constant dense<0.000000e+00> : vector<2x8x128xf32>
    %495 = tpu.matmul %492, %494, %cst_367 {dimension_numbers = #tpu.dot_dimension_numbers<[2], [0], [0, 1], [1], [0, 0, 0, 1, 1, 1], [], []>} : vector<2x8x32xf32>, vector<32x128xf32>, vector<2x8x128xf32> -> vector<2x8x128xf32>
    %c1_368 = arith.constant 1 : index
    %c0_369 = arith.constant 0 : index
    %c0_370 = arith.constant 0 : index
    %496 = vector.load %arg16[%c1_368, %c0_369, %c0_370] : memref<2x1x128xf32, #tpu.memory_space<vmem>>, vector<1x1x128xf32>
    %497 = vector.shape_cast %496 : vector<1x1x128xf32> to vector<1x128xf32>
    %498 = vector.shape_cast %497 : vector<1x128xf32> to vector<1x1x128xf32>
    %499 = vector.broadcast %498 : vector<1x1x128xf32> to vector<2x8x128xf32>
    %500 = arith.addf %495, %499 : vector<2x8x128xf32>
    %cst_371 = arith.constant 5.000000e-01 : f32
    %501 = vector.broadcast %cst_371 : f32 to vector<2x8x128xf32>
    %502 = arith.mulf %501, %500 : vector<2x8x128xf32>
    %cst_372 = arith.constant 4.471500e-02 : f32
    %503 = vector.broadcast %cst_372 : f32 to vector<2x8x128xf32>
    %504 = arith.mulf %503, %500 : vector<2x8x128xf32>
    %505 = arith.mulf %504, %500 : vector<2x8x128xf32>
    %506 = arith.mulf %505, %500 : vector<2x8x128xf32>
    %507 = arith.addf %500, %506 : vector<2x8x128xf32>
    %cst_373 = arith.constant 0.797884583 : f32
    %508 = vector.broadcast %cst_373 : f32 to vector<2x8x128xf32>
    %509 = arith.mulf %508, %507 : vector<2x8x128xf32>
    %510 = math.tanh %509 : vector<2x8x128xf32>
    %cst_374 = arith.constant 1.000000e+00 : f32
    %511 = vector.broadcast %cst_374 : f32 to vector<2x8x128xf32>
    %512 = arith.addf %511, %510 : vector<2x8x128xf32>
    %513 = arith.mulf %502, %512 : vector<2x8x128xf32>
    %c1_375 = arith.constant 1 : index
    %c0_376 = arith.constant 0 : index
    %c0_377 = arith.constant 0 : index
    %514 = vector.load %arg17[%c1_375, %c0_376, %c0_377] : memref<2x128x32xf32, #tpu.memory_space<vmem>>, vector<1x128x32xf32>
    %515 = vector.shape_cast %514 : vector<1x128x32xf32> to vector<128x32xf32>
    %cst_378 = arith.constant dense<0.000000e+00> : vector<2x8x32xf32>
    %516 = tpu.matmul %513, %515, %cst_378 {dimension_numbers = #tpu.dot_dimension_numbers<[2], [0], [0, 1], [1], [0, 0, 0, 1, 1, 1], [], []>} : vector<2x8x128xf32>, vector<128x32xf32>, vector<2x8x32xf32> -> vector<2x8x32xf32>
    %517 = arith.addf %464, %516 : vector<2x8x32xf32>
    %c1_379 = arith.constant 1 : index
    %c0_380 = arith.constant 0 : index
    %c0_381 = arith.constant 0 : index
    %518 = vector.load %arg18[%c1_379, %c0_380, %c0_381] : memref<2x1x32xf32, #tpu.memory_space<vmem>>, vector<1x1x32xf32>
    %519 = vector.shape_cast %518 : vector<1x1x32xf32> to vector<1x32xf32>
    %520 = vector.shape_cast %519 : vector<1x32xf32> to vector<1x1x32xf32>
    %521 = vector.broadcast %520 : vector<1x1x32xf32> to vector<2x8x32xf32>
    %522 = arith.addf %517, %521 : vector<2x8x32xf32>
    %c0_382 = arith.constant 0 : index
    %c0_383 = arith.constant 0 : index
    %523 = vector.load %arg19[%c0_382, %c0_383] : memref<1x32xf32, #tpu.memory_space<vmem>>, vector<1x32xf32>
    %c0_384 = arith.constant 0 : index
    %c0_385 = arith.constant 0 : index
    %524 = vector.load %arg20[%c0_384, %c0_385] : memref<1x32xf32, #tpu.memory_space<vmem>>, vector<1x32xf32>
    %cst_386 = arith.constant dense<0.000000e+00> : vector<2x8xf32>
    %525 = vector.multi_reduction <add>, %522, %cst_386 [2] : vector<2x8x32xf32> to vector<2x8xf32>
    %526 = vector.shape_cast %525 : vector<2x8xf32> to vector<2x8x1xf32>
    %cst_387 = arith.constant 3.200000e+01 : f32
    %527 = vector.broadcast %cst_387 : f32 to vector<2x8x1xf32>
    %528 = arith.divf %526, %527 : vector<2x8x1xf32>
    %529 = arith.mulf %522, %522 : vector<2x8x32xf32>
    %cst_388 = arith.constant dense<0.000000e+00> : vector<2x8xf32>
    %530 = vector.multi_reduction <add>, %529, %cst_388 [2] : vector<2x8x32xf32> to vector<2x8xf32>
    %531 = vector.shape_cast %530 : vector<2x8xf32> to vector<2x8x1xf32>
    %cst_389 = arith.constant 3.200000e+01 : f32
    %532 = vector.broadcast %cst_389 : f32 to vector<2x8x1xf32>
    %533 = arith.divf %531, %532 : vector<2x8x1xf32>
    %534 = arith.mulf %528, %528 : vector<2x8x1xf32>
    %535 = arith.subf %533, %534 : vector<2x8x1xf32>
    %536 = vector.broadcast %528 : vector<2x8x1xf32> to vector<2x8x32xf32>
    %537 = arith.subf %522, %536 : vector<2x8x32xf32>
    %cst_390 = arith.constant 9.99999974E-6 : f32
    %538 = vector.broadcast %cst_390 : f32 to vector<2x8x1xf32>
    %539 = arith.addf %535, %538 : vector<2x8x1xf32>
    %540 = math.rsqrt %539 : vector<2x8x1xf32>
    %541 = vector.broadcast %540 : vector<2x8x1xf32> to vector<2x8x32xf32>
    %542 = arith.mulf %537, %541 : vector<2x8x32xf32>
    %543 = vector.shape_cast %523 : vector<1x32xf32> to vector<1x1x32xf32>
    %544 = vector.broadcast %543 : vector<1x1x32xf32> to vector<2x8x32xf32>
    %545 = arith.mulf %542, %544 : vector<2x8x32xf32>
    %546 = vector.shape_cast %524 : vector<1x32xf32> to vector<1x1x32xf32>
    %547 = vector.broadcast %546 : vector<1x1x32xf32> to vector<2x8x32xf32>
    %548 = arith.addf %545, %547 : vector<2x8x32xf32>
    %c0_391 = arith.constant 0 : index
    %c0_392 = arith.constant 0 : index
    %549 = vector.load %arg21[%c0_391, %c0_392] : memref<1x32xf32, #tpu.memory_space<vmem>>, vector<1x32xf32>
    %550 = vector.shape_cast %549 : vector<1x32xf32> to vector<1x1x32xf32>
    %551 = vector.broadcast %550 : vector<1x1x32xf32> to vector<2x8x32xf32>
    %552 = arith.mulf %548, %551 : vector<2x8x32xf32>
    %cst_393 = arith.constant dense<0.000000e+00> : vector<2x8xf32>
    %553 = vector.multi_reduction <add>, %552, %cst_393 [2] : vector<2x8x32xf32> to vector<2x8xf32>
    %554 = vector.shape_cast %553 : vector<2x8xf32> to vector<2x8x1xf32>
    %c0_394 = arith.constant 0 : index
    %c0_395 = arith.constant 0 : index
    %555 = vector.load %arg22[%c0_394, %c0_395] : memref<1x1xf32, #tpu.memory_space<vmem>>, vector<1x1xf32>
    %556 = vector.shape_cast %555 : vector<1x1xf32> to vector<1x1x1xf32>
    %557 = vector.broadcast %556 : vector<1x1x1xf32> to vector<2x8x1xf32>
    %558 = arith.addf %554, %557 : vector<2x8x1xf32>
    %cst_396 = arith.constant dense<0xFF800000> : vector<2x1xf32>
    %559 = vector.multi_reduction <maximumf>, %558, %cst_396 [1] : vector<2x8x1xf32> to vector<2x1xf32>
    %560 = vector.shape_cast %559 : vector<2x1xf32> to vector<2x1x1xf32>
    %561 = vector.broadcast %560 : vector<2x1x1xf32> to vector<2x8x1xf32>
    %562 = arith.subf %558, %561 : vector<2x8x1xf32>
    %563 = math.exp %562 : vector<2x8x1xf32>
    %cst_397 = arith.constant dense<0.000000e+00> : vector<2x1xf32>
    %564 = vector.multi_reduction <add>, %563, %cst_397 [1] : vector<2x8x1xf32> to vector<2x1xf32>
    %565 = vector.shape_cast %564 : vector<2x1xf32> to vector<2x1x1xf32>
    %566 = tpu.reciprocal %565 {approx = true} : vector<2x1x1xf32> -> vector<2x1x1xf32>
    %567 = vector.broadcast %566 : vector<2x1x1xf32> to vector<2x8x1xf32>
    %568 = arith.mulf %563, %567 : vector<2x8x1xf32>
    %569 = vector.broadcast %568 : vector<2x8x1xf32> to vector<2x8x32xf32>
    %570 = arith.mulf %569, %548 : vector<2x8x32xf32>
    %cst_398 = arith.constant dense<0.000000e+00> : vector<2x32xf32>
    %571 = vector.multi_reduction <add>, %570, %cst_398 [1] : vector<2x8x32xf32> to vector<2x32xf32>
    %572 = vector.shape_cast %571 : vector<2x32xf32> to vector<2x1x32xf32>
    %c0_399 = arith.constant 0 : index
    %c0_400 = arith.constant 0 : index
    %573 = vector.load %arg23[%c0_399, %c0_400] : memref<32x128xf32, #tpu.memory_space<vmem>>, vector<32x128xf32>
    %cst_401 = arith.constant dense<0.000000e+00> : vector<2x1x128xf32>
    %574 = tpu.matmul %572, %573, %cst_401 {dimension_numbers = #tpu.dot_dimension_numbers<[2], [0], [0, 1], [1], [0, 0, 0, 1, 1, 1], [], []>} : vector<2x1x32xf32>, vector<32x128xf32>, vector<2x1x128xf32> -> vector<2x1x128xf32>
    %c0_402 = arith.constant 0 : index
    %c0_403 = arith.constant 0 : index
    %575 = vector.load %arg24[%c0_402, %c0_403] : memref<1x128xf32, #tpu.memory_space<vmem>>, vector<1x128xf32>
    %576 = vector.shape_cast %575 : vector<1x128xf32> to vector<1x1x128xf32>
    %577 = vector.broadcast %576 : vector<1x1x128xf32> to vector<2x1x128xf32>
    %578 = arith.addf %574, %577 : vector<2x1x128xf32>
    %c0_404 = arith.constant 0 : index
    %c0_405 = arith.constant 0 : index
    %c0_406 = arith.constant 0 : index
    %579 = vector.load %arg25[%c0_404, %c0_405, %c0_406] : memref<2x1x128xf32, #tpu.memory_space<vmem>>, vector<2x1x128xf32>
    tpu.vector_store %arg25[%c0_404, %c0_405, %c0_406], %578 {strides = array<i32>} : memref<2x1x128xf32, #tpu.memory_space<vmem>>, vector<2x1x128xf32>,
    return
  }
  func.func @transform_0(%arg0: i32) -> (i32, i32, i32) {
    %c0_i32 = arith.constant 0 : i32
    %c0_i32_0 = arith.constant 0 : i32
    %c0_i32_1 = arith.constant 0 : i32
    return %arg0, %c0_i32, %c0_i32_0 : i32, i32, i32
  }
  func.func @transform_1(%arg0: i32) -> (i32, i32) {
    %c0_i32 = arith.constant 0 : i32
    %c0_i32_0 = arith.constant 0 : i32
    %c0_i32_1 = arith.constant 0 : i32
    return %c0_i32, %c0_i32_0 : i32, i32
  }
  func.func @transform_2(%arg0: i32) -> (i32, i32, i32) {
    %c0_i32 = arith.constant 0 : i32
    %c0_i32_0 = arith.constant 0 : i32
    %c0_i32_1 = arith.constant 0 : i32
    %c0_i32_2 = arith.constant 0 : i32
    return %c0_i32, %c0_i32_0, %c0_i32_1 : i32, i32, i32
  }
  func.func @transform_3(%arg0: i32) -> (i32, i32, i32) {
    %c0_i32 = arith.constant 0 : i32
    %c0_i32_0 = arith.constant 0 : i32
    %c0_i32_1 = arith.constant 0 : i32
    %c0_i32_2 = arith.constant 0 : i32
    return %c0_i32, %c0_i32_0, %c0_i32_1 : i32, i32, i32
  }
  func.func @transform_4(%arg0: i32) -> (i32, i32, i32, i32) {
    %c0_i32 = arith.constant 0 : i32
    %c0_i32_0 = arith.constant 0 : i32
    %c0_i32_1 = arith.constant 0 : i32
    %c0_i32_2 = arith.constant 0 : i32
    %c0_i32_3 = arith.constant 0 : i32
    return %c0_i32, %c0_i32_0, %c0_i32_1, %c0_i32_2 : i32, i32, i32, i32
  }
  func.func @transform_5(%arg0: i32) -> (i32, i32, i32, i32) {
    %c0_i32 = arith.constant 0 : i32
    %c0_i32_0 = arith.constant 0 : i32
    %c0_i32_1 = arith.constant 0 : i32
    %c0_i32_2 = arith.constant 0 : i32
    %c0_i32_3 = arith.constant 0 : i32
    return %c0_i32, %c0_i32_0, %c0_i32_1, %c0_i32_2 : i32, i32, i32, i32
  }
  func.func @transform_6(%arg0: i32) -> (i32, i32, i32, i32) {
    %c0_i32 = arith.constant 0 : i32
    %c0_i32_0 = arith.constant 0 : i32
    %c0_i32_1 = arith.constant 0 : i32
    %c0_i32_2 = arith.constant 0 : i32
    %c0_i32_3 = arith.constant 0 : i32
    return %c0_i32, %c0_i32_0, %c0_i32_1, %c0_i32_2 : i32, i32, i32, i32
  }
  func.func @transform_7(%arg0: i32) -> (i32, i32, i32, i32) {
    %c0_i32 = arith.constant 0 : i32
    %c0_i32_0 = arith.constant 0 : i32
    %c0_i32_1 = arith.constant 0 : i32
    %c0_i32_2 = arith.constant 0 : i32
    %c0_i32_3 = arith.constant 0 : i32
    return %c0_i32, %c0_i32_0, %c0_i32_1, %c0_i32_2 : i32, i32, i32, i32
  }
  func.func @transform_8(%arg0: i32) -> (i32, i32, i32, i32) {
    %c0_i32 = arith.constant 0 : i32
    %c0_i32_0 = arith.constant 0 : i32
    %c0_i32_1 = arith.constant 0 : i32
    %c0_i32_2 = arith.constant 0 : i32
    %c0_i32_3 = arith.constant 0 : i32
    return %c0_i32, %c0_i32_0, %c0_i32_1, %c0_i32_2 : i32, i32, i32, i32
  }
  func.func @transform_9(%arg0: i32) -> (i32, i32, i32, i32) {
    %c0_i32 = arith.constant 0 : i32
    %c0_i32_0 = arith.constant 0 : i32
    %c0_i32_1 = arith.constant 0 : i32
    %c0_i32_2 = arith.constant 0 : i32
    %c0_i32_3 = arith.constant 0 : i32
    return %c0_i32, %c0_i32_0, %c0_i32_1, %c0_i32_2 : i32, i32, i32, i32
  }
  func.func @transform_10(%arg0: i32) -> (i32, i32, i32, i32) {
    %c0_i32 = arith.constant 0 : i32
    %c0_i32_0 = arith.constant 0 : i32
    %c0_i32_1 = arith.constant 0 : i32
    %c0_i32_2 = arith.constant 0 : i32
    %c0_i32_3 = arith.constant 0 : i32
    return %c0_i32, %c0_i32_0, %c0_i32_1, %c0_i32_2 : i32, i32, i32, i32
  }
  func.func @transform_11(%arg0: i32) -> (i32, i32, i32) {
    %c0_i32 = arith.constant 0 : i32
    %c0_i32_0 = arith.constant 0 : i32
    %c0_i32_1 = arith.constant 0 : i32
    %c0_i32_2 = arith.constant 0 : i32
    return %c0_i32, %c0_i32_0, %c0_i32_1 : i32, i32, i32
  }
  func.func @transform_12(%arg0: i32) -> (i32, i32, i32) {
    %c0_i32 = arith.constant 0 : i32
    %c0_i32_0 = arith.constant 0 : i32
    %c0_i32_1 = arith.constant 0 : i32
    %c0_i32_2 = arith.constant 0 : i32
    return %c0_i32, %c0_i32_0, %c0_i32_1 : i32, i32, i32
  }
  func.func @transform_13(%arg0: i32) -> (i32, i32, i32) {
    %c0_i32 = arith.constant 0 : i32
    %c0_i32_0 = arith.constant 0 : i32
    %c0_i32_1 = arith.constant 0 : i32
    %c0_i32_2 = arith.constant 0 : i32
    return %c0_i32, %c0_i32_0, %c0_i32_1 : i32, i32, i32
  }
  func.func @transform_14(%arg0: i32) -> (i32, i32, i32) {
    %c0_i32 = arith.constant 0 : i32
    %c0_i32_0 = arith.constant 0 : i32
    %c0_i32_1 = arith.constant 0 : i32
    %c0_i32_2 = arith.constant 0 : i32
    return %c0_i32, %c0_i32_0, %c0_i32_1 : i32, i32, i32
  }
  func.func @transform_15(%arg0: i32) -> (i32, i32, i32) {
    %c0_i32 = arith.constant 0 : i32
    %c0_i32_0 = arith.constant 0 : i32
    %c0_i32_1 = arith.constant 0 : i32
    %c0_i32_2 = arith.constant 0 : i32
    return %c0_i32, %c0_i32_0, %c0_i32_1 : i32, i32, i32
  }
  func.func @transform_16(%arg0: i32) -> (i32, i32, i32) {
    %c0_i32 = arith.constant 0 : i32
    %c0_i32_0 = arith.constant 0 : i32
    %c0_i32_1 = arith.constant 0 : i32
    %c0_i32_2 = arith.constant 0 : i32
    return %c0_i32, %c0_i32_0, %c0_i32_1 : i32, i32, i32
  }
  func.func @transform_17(%arg0: i32) -> (i32, i32, i32) {
    %c0_i32 = arith.constant 0 : i32
    %c0_i32_0 = arith.constant 0 : i32
    %c0_i32_1 = arith.constant 0 : i32
    %c0_i32_2 = arith.constant 0 : i32
    return %c0_i32, %c0_i32_0, %c0_i32_1 : i32, i32, i32
  }
  func.func @transform_18(%arg0: i32) -> (i32, i32) {
    %c0_i32 = arith.constant 0 : i32
    %c0_i32_0 = arith.constant 0 : i32
    %c0_i32_1 = arith.constant 0 : i32
    return %c0_i32, %c0_i32_0 : i32, i32
  }
  func.func @transform_19(%arg0: i32) -> (i32, i32) {
    %c0_i32 = arith.constant 0 : i32
    %c0_i32_0 = arith.constant 0 : i32
    %c0_i32_1 = arith.constant 0 : i32
    return %c0_i32, %c0_i32_0 : i32, i32
  }
  func.func @transform_20(%arg0: i32) -> (i32, i32) {
    %c0_i32 = arith.constant 0 : i32
    %c0_i32_0 = arith.constant 0 : i32
    %c0_i32_1 = arith.constant 0 : i32
    return %c0_i32, %c0_i32_0 : i32, i32
  }
  func.func @transform_21(%arg0: i32) -> (i32, i32) {
    %c0_i32 = arith.constant 0 : i32
    %c0_i32_0 = arith.constant 0 : i32
    %c0_i32_1 = arith.constant 0 : i32
    return %c0_i32, %c0_i32_0 : i32, i32
  }
  func.func @transform_22(%arg0: i32) -> (i32, i32) {
    %c0_i32 = arith.constant 0 : i32
    %c0_i32_0 = arith.constant 0 : i32
    %c0_i32_1 = arith.constant 0 : i32
    return %c0_i32, %c0_i32_0 : i32, i32
  }
  func.func @transform_23(%arg0: i32) -> (i32, i32) {
    %c0_i32 = arith.constant 0 : i32
    %c0_i32_0 = arith.constant 0 : i32
    %c0_i32_1 = arith.constant 0 : i32
    return %c0_i32, %c0_i32_0 : i32, i32
  }
  func.func @transform_24(%arg0: i32) -> (i32, i32, i32) {
    %c0_i32 = arith.constant 0 : i32
    %c0_i32_0 = arith.constant 0 : i32
    %c0_i32_1 = arith.constant 0 : i32
    return %arg0, %c0_i32, %c0_i32_0 : i32, i32, i32
  }
}

</mosaic_0001>

<bundles_post_ra>
// kernel: tpu_custom_call.1
= control target key start
LH: loop header
LB: loop body
LE: loop exit
PB: predicated region body
PF: predicated region fallthrough
CT: control target
= control target key end

     0   :  { %s8833_s0 = inlined_call_operand.vmem [shape: f32[2,8,32], index: 0, kind: input, shape index: {}]   ;;  %s8834_s1 = inlined_call_operand.vmem [shape: f32[1,32], index: 1, kind: input, shape index: {}]   ;;  %s8835_s2 = inlined_call_operand.vmem [shape: f32[2,1,32], index: 2, kind: input, shape index: {}]   ;;  %s8836_s3 = inlined_call_operand.vmem [shape: f32[2,1,32], index: 3, kind: input, shape index: {}]   ;;  %s8837_s4 = inlined_call_operand.vmem [shape: f32[2,4,32,8], index: 4, kind: input, shape index: {}]   ;;  %s8838_s5 = inlined_call_operand.vmem [shape: f32[2,4,32,8], index: 5, kind: input, shape index: {}]   ;;  %s8839_s6 = inlined_call_operand.vmem [shape: f32[2,4,32,8], index: 6, kind: input, shape index: {}]   ;;  %s8840_s7 = inlined_call_operand.vmem [shape: f32[2,4,1,8], index: 7, kind: input, shape index: {}]   ;;  %s8841_s8 = inlined_call_operand.vmem [shape: f32[2,4,1,8], index: 8, kind: input, shape index: {}]   ;;  %s8842_s9 = inlined_call_operand.vmem [shape: f32[2,4,1,8], index: 9, kind: input, shape index: {}]   ;;  %s8843_s10 = inlined_call_operand.vmem [shape: f32[2,4,8,32], index: 10, kind: input, shape index: {}]   ;;  %s8844_s11 = inlined_call_operand.vmem [shape: f32[2,1,32], index: 11, kind: input, shape index: {}]   ;;  %s8845_s12 = inlined_call_operand.vmem [shape: f32[2,1,32], index: 12, kind: input, shape index: {}]   ;;  %s8846_s13 = inlined_call_operand.vmem [shape: f32[2,1,32], index: 13, kind: input, shape index: {}]   ;;  %s8847_s14 = inlined_call_operand.vmem [shape: f32[2,32,128], index: 14, kind: input, shape index: {}]   ;;  %s8848_s15 = inlined_call_operand.vmem [shape: f32[2,1,128], index: 15, kind: input, shape index: {}]   ;;  %s8849_s16 = inlined_call_operand.vmem [shape: f32[2,128,32], index: 16, kind: input, shape index: {}]   ;;  %s8850_s17 = inlined_call_operand.vmem [shape: f32[2,1,32], index: 17, kind: input, shape index: {}]   ;;  %s8851_s18 = inlined_call_operand.vmem [shape: f32[1,32], index: 18, kind: input, shape index: {}]   ;;  %s8852_s19 = inlined_call_operand.vmem [shape: f32[1,32], index: 19, kind: input, shape index: {}]   ;;  %s8853_s20 = inlined_call_operand.vmem [shape: f32[1,32], index: 20, kind: input, shape index: {}]   ;;  %s8854_s21 = inlined_call_operand.<no memory space> [shape: f32[1,1], index: 21, kind: input, shape index: {}]   ;;  %s8855_s22 = inlined_call_operand.vmem [shape: f32[32,128], index: 22, kind: input, shape index: {}]   ;;  %s8856_s23 = inlined_call_operand.vmem [shape: f32[1,128], index: 23, kind: input, shape index: {}]   ;;  %s8857_s24 = inlined_call_operand.hbm [shape: f32[2,1,128], index: 24, kind: output, shape index: {}]  }
   0x1   :  { %8866 = sst [smem:[#allocation6_spill]] %s8833_s0  ;;  %v29_v0 = vstv %s8854_s21 }
   0x2   :  { %8867 = sst [smem:[#allocation7_spill]] %s8834_s1  ;;  %30 = vst [vmem:[#allocation2] sm:$0x1] %v29_v0 }
   0x3   :  { %8868 = sst [smem:[#allocation8_spill]] %s8835_s2 }
   0x4   :  { %8869 = sst [smem:[#allocation9_spill]] %s8836_s3 }
   0x5   :  { %8870 = sst [smem:[#allocation10_spill]] %s8837_s4 }
   0x6   :  { %8871 = sst [smem:[#allocation11_spill]] %s8838_s5 }
   0x7   :  { %8872 = sst [smem:[#allocation12_spill]] %s8839_s6 }
   0x8   :  { %8873 = sst [smem:[#allocation13_spill]] %s8840_s7 }
   0x9   :  { %8874 = sst [smem:[#allocation14_spill]] %s8841_s8 }
   0xa   :  { %s8875_s6 = sld [smem:[#allocation6_spill]]  ;;  %vm93_vm0 = vcmask 261120  }
   0xb   :  { %s8876_s0 = sld [smem:[#allocation7_spill]] }
  0x10   :  { %v80_v1 = vld [vmem:[%s8875_s6] sm:$0xff]  ;;  %v81_v3 = vld [vmem:[%s8875_s6 + $0x8] sm:$0xff] }
  0x11   :  { %v6384_v2 = vld [vmem:[%s8876_s0] ss:$0 sm:$0xff] }
  0x12   :  { %v7813_v4 = vadd.f32 %v6384_v2, %v80_v1  ;;  %v7815_v5 = vadd.f32 %v6384_v2, %v81_v3 }
  0x13   :  { %31 = vsyncpa [#allocation4], 0  ;;  %s8877_s25 = sld [smem:[#allocation10_spill]]  ;;  %v7669_v50 = vmov 0.0   ;;  %vm7670_vm1 = vmmov 0   ;;  %vm405_vm2 = vcmask 64512  }
  0x14   :  { %v94_v6 = vsel %vm93_vm0, %v7813_v4, 0.0  ;;  %v103_v7 = vmul.f32 %v7813_v4, %v7813_v4  ;;  %v104_v8 = vmul.f32 %v7815_v5, %v7815_v5  ;;  %v97_v10 = vsel %vm93_vm0, %v7815_v5, 0.0  ;;  %s8878_s2 = sld [smem:[#allocation11_spill]]  ;;  %7003 = vmatprep.subr.mxu1 %v7669_v50  ;;  %7005 = vmatprep.mubr.msk.f32.mxu1 %vm7670_vm1, %v7669_v50  ;;  %v6393_v61 = vld [vmem:[%s8842_s9] ss:$0 sm:$0xff] }
  0x15   :  { %95 = vadd.xlane.f32.xlu0 %v94_v6  ;;  %s8879_s7 = sld [smem:[#allocation8_spill]]  ;;  %vm6178_vm3 = vcmask 7168   ;;  %vm6250_vm4 = vcmask 1041409  }
  0x16   :  { %v105_v9 = vsel %vm93_vm0, %v103_v7, 0.0  ;;  %v108_v11 = vsel %vm93_vm0, %v104_v8, 0.0  ;;  %s8880_s3 = sld [smem:[#allocation9_spill]] }
  0x17   :  { %106 = vadd.xlane.f32.xlu1 %v105_v9  ;;  %s8881_s29 = sld [smem:[#allocation12_spill]] }
  0x18   :  { %s8882_s27 = sld [smem:[#allocation14_spill]] }
  0x19   :  { %98 = vadd.xlane.f32.xlu0 %v97_v10  ;;  %v144_v12 = vld [vmem:[%s8877_s25 + $0x18] sm:$0xff]  ;;  %v143_v13 = vld [vmem:[%s8877_s25 + $0x10] sm:$0xff]  ;;  %v142_v14 = vld [vmem:[%s8877_s25 + $0x8] sm:$0xff]  ;;  %s8883_s0 = sld [smem:[#allocation13_spill]] }
  0x1a   :  { %6970 = vmatprep.subr.mxu0 %v144_v12  ;;  %v141_v15 = vld [vmem:[%s8877_s25] sm:$0xff]  ;;  %v236_v16 = vld [vmem:[%s8878_s2 + $0x18] sm:$0xff]  ;;  %v235_v43 = vld [vmem:[%s8878_s2 + $0x10] sm:$0xff] }
  0x1b   :  { %109 = vadd.xlane.f32.xlu1 %v108_v11  ;;  %6971 = vmatpush3.msra.mxu0 %v144_v12  ;;  %v6385_v33 = vld [vmem:[%s8879_s7] ss:$0 sm:$0xff]  ;;  %v234_v44 = vld [vmem:[%s8878_s2 + $0x8] sm:$0xff] }
  0x1c   :  { %6972 = vmatprep.subr.mxu0 %v143_v13  ;;  %v6386_v35 = vld [vmem:[%s8880_s3] ss:$0 sm:$0xff] }
  0x1d   :  { %6973 = vmatpush3.msra.mxu0 %v143_v13  ;;  %v233_v45 = vld [vmem:[%s8878_s2] sm:$0xff]  ;;  %v322_v46 = vld [vmem:[%s8881_s29 + $0x18] sm:$0xff]  ;;  %v321_v47 = vld [vmem:[%s8881_s29 + $0x10] sm:$0xff] }
  0x1e   :  { %6974 = vmatprep.subr.mxu0 %v142_v14  ;;  %v320_v48 = vld [vmem:[%s8881_s29 + $0x8] sm:$0xff]  ;;  %v319_v49 = vld [vmem:[%s8881_s29] sm:$0xff] }
  0x1f   :  { %6975 = vmatpush3.msra.mxu0 %v142_v14  ;;  %v6390_v54 = vld [vmem:[%s8882_s27] ss:$0 sm:$0xff] }
  0x20   :  { %6976 = vmatprep.subr.mxu0 %v141_v15  ;;  %v6387_v57 = vld [vmem:[%s8883_s0] ss:$0 sm:$0xff] }
  0x21   :  { %6977 = vmatpush3.msra.mxu0 %v141_v15 }
  0x22   :  { %6981 = vmatprep.subr.mxu0 %v236_v16 }
  0x9e   :  { %v96_v17 = vpop.xlane.xlu0 %95 }
  0x9f   :  { %v101_v18 = vmul.f32 0.03125, %v96_v17 }
  0xa0   :  { %v107_v19 = vpop.xlane.xlu1 %106 }
  0xa1   :  { %v113_v20 = vmul.f32 %v101_v18, %v101_v18  ;;  %v111_v21 = vmul.f32 0.03125, %v107_v19  ;;  %v117_v31 = vsub.f32 %v7813_v4, %v101_v18 }
  0xa2   :  { %v99_v22 = vpop.xlane.xlu0 %98 }
  0xa3   :  { %v115_v23 = vsub.f32 %v111_v21, %v113_v20  ;;  %v102_v24 = vmul.f32 0.03125, %v99_v22  ;;  %v6405_v22 = vld [vmem:[%s8877_s25 + $0x38] sm:$0xff] }
  0xa4   :  { %v110_v25 = vpop.xlane.xlu1 %109 }
  0xa5   :  { %v119_v26 = vadd.f32 1e-05, %v115_v23  ;;  %v114_v27 = vmul.f32 %v102_v24, %v102_v24  ;;  %v112_v28 = vmul.f32 0.03125, %v110_v25  ;;  %v118_v37 = vsub.f32 %v7815_v5, %v102_v24  ;;  %v6413_v23 = vld [vmem:[%s8878_s2 + $0x38] sm:$0xff] }
  0xa7   :  { %7547 = vrsqrt.f32 %v119_v26  ;;  %v116_v29 = vsub.f32 %v112_v28, %v114_v27  ;;  %v6404_v28 = vld [vmem:[%s8877_s25 + $0x30] sm:$0xff] }
  0xa9   :  { %v120_v30 = vadd.f32 1e-05, %v116_v29 }
  0xab   :  { %7549 = vrsqrt.f32 %v120_v30  ;;  %v6403_v30 = vld [vmem:[%s8877_s25 + $0x28] sm:$0xff] }
  0xb4   :  { %v7548_v32 = vpop.eup %7547 }
  0xb5   :  { %v123_v34 = vmul.f32 %v7548_v32, %v117_v31  ;;  %v6402_v32 = vld [vmem:[%s8877_s25 + $0x20] sm:$0xff] }
  0xb7   :  { %v131_v36 = vmul.f32 %v6385_v33, %v123_v34  ;;  %v6411_v34 = vld [vmem:[%s8878_s2 + $0x28] sm:$0xff] }
  0xb8   :  { %v7550_v38 = vpop.eup %7549 }
  0xb9   :  { %v7850_v39 = vadd.f32 %v6386_v35, %v131_v36  ;;  %v124_v40 = vmul.f32 %v7550_v38, %v118_v37  ;;  %v6410_v36 = vld [vmem:[%s8878_s2 + $0x20] sm:$0xff]  ;;  %v6420_v37 = vld [vmem:[%s8881_s29 + $0x30] sm:$0xff]  ;;  %v6419_v38 = vld [vmem:[%s8881_s29 + $0x28] sm:$0xff] }
  0xbb   :  { %v132_v41 = vmul.f32 %v6385_v33, %v124_v40  ;;  %6978 = vmatprep.mubr.msk.f32.mxu0 %vm93_vm0, %v7850_v39  ;;  %v6412_v33 = vld [vmem:[%s8878_s2 + $0x30] sm:$0xff]  ;;  %v6418_v40 = vld [vmem:[%s8881_s29 + $0x20] sm:$0xff] }
  0xbd   :  { %v7854_v42 = vadd.f32 %v6386_v35, %v132_v41  ;;  %v6421_v35 = vld [vmem:[%s8881_s29 + $0x38] sm:$0xff] }
  0xbf   :  { %6979 = vmatmul.mubr.msk.f32.vlgmr.msra.gmra.mxu0 %vm93_vm0, %v7854_v42 }
  0xc0   :  { %6982 = vmatpush3.msra.mxu0 %v236_v16  ;;  %6989 = vmatprep.mubr.msk.f32.mxu0 %vm93_vm0, %v7850_v39 }
  0xc1   :  { %6983 = vmatprep.subr.mxu0 %v235_v43 }
  0xc2   :  { %6984 = vmatpush3.msra.mxu0 %v235_v43 }
  0xc3   :  { %6985 = vmatprep.subr.mxu0 %v234_v44 }
  0xc4   :  { %6986 = vmatpush3.msra.mxu0 %v234_v44 }
  0xc5   :  { %6987 = vmatprep.subr.mxu0 %v233_v45 }
  0xc6   :  { %6988 = vmatpush3.msra.mxu0 %v233_v45 }
  0xc7   :  { %6990 = vmatmul.mubr.msk.f32.vlgmr.msra.gmra.mxu0 %vm93_vm0, %v7854_v42  ;;  %6992 = vmatprep.subr.mxu0 %v322_v46 }
  0xc8   :  { %6993 = vmatpush3.msra.mxu0 %v322_v46  ;;  %7000 = vmatprep.mubr.msk.f32.mxu0 %vm93_vm0, %v7850_v39 }
  0xc9   :  { %6994 = vmatprep.subr.mxu0 %v321_v47 }
  0xca   :  { %6995 = vmatpush3.msra.mxu0 %v321_v47 }
  0xcb   :  { %6996 = vmatprep.subr.mxu0 %v320_v48 }
  0xcc   :  { %6997 = vmatpush3.msra.mxu0 %v320_v48  ;;  %v6415_v48 = vld [vmem:[%s8882_s27 + $0x1] ss:$0 sm:$0xff] }
  0xcd   :  { %6998 = vmatprep.subr.mxu0 %v319_v49 }
  0xce   :  { %6999 = vmatpush3.msra.mxu0 %v319_v49 }
  0xcf   :  { %7001 = vmatmul.mubr.msk.f32.vlgmr.msra.gmra.mxu0 %vm93_vm0, %v7854_v42  ;;  %7013 = vmatprep.subr.mxu0 %v7669_v50 }
  0xd0   :  { %7015 = vmatprep.mubr.msk.f32.mxu0 %vm7670_vm1, %v7669_v50 }
 0x17f   :  { %v6980_v51 = vpop.f32.mrf.mxu0 }
 0x180   :  { %v230_v62 = vadd.f32 %v6980_v51, %v6387_v57 }
 0x181   :  { %v224_v52 = vpop.f32.mrf.mxu0 }
 0x182   :  { %v225_v58 = vadd.f32 %v6387_v57, %v224_v52  ;;  %v6423_v57 = vld [vmem:[%s8842_s9 + $0x1] ss:$0 sm:$0xff] }
 0x187   :  { %v6991_v53 = vpop.f32.mrf.mxu0 }
 0x188   :  { %v316_v59 = vadd.f32 %v6991_v53, %v6390_v54  ;;  %v6407_v53 = vld [vmem:[%s8883_s0 + $0x1] ss:$0 sm:$0xff] }
 0x189   :  { %v310_v55 = vpop.f32.mrf.mxu0 }
 0x18a   :  { %v311_v56 = vadd.f32 %v6390_v54, %v310_v55 }
 0x18c   :  { %7004 = vmatpush3.xpose.msk.msra.mxu1 %vm405_vm2, %v311_v56 }
 0x18d   :  { %7008 = vmatprep.subr.mxu1 %v7669_v50 }
 0x18f   :  { %v7002_v60 = vpop.f32.mrf.mxu0  ;;  %7006 = vmatmul.mubr.msk.f32.vlgmr.msra.gmra.mxu1 %vm405_vm2, %v225_v58 }
 0x190   :  { %7009 = vmatpush3.xpose.msk.msra.mxu1 %vm405_vm2, %v316_v59  ;;  %7010 = vmatprep.mubr.msk.f32.mxu1 %vm7670_vm1, %v7669_v50  ;;  %v402_v0 = vadd.f32 %v7002_v60, %v6393_v61 }
 0x191   :  { %v396_v63 = vpop.f32.mrf.mxu0  ;;  %7018 = vmatprep.subr.mxu1 %v7669_v50 }
 0x192   :  { %v397_v1 = vadd.f32 %v6393_v61, %v396_v63 }
 0x193   :  { %7011 = vmatmul.mubr.msk.f32.vlgmr.msra.gmra.mxu1 %vm405_vm2, %v230_v62 }
 0x194   :  { %7014 = vmatpush3.msra.mxu0 %v397_v1  ;;  %7019 = vmatpush3.msra.mxu1 %v402_v0 }
 0x195   :  { %7020 = vmatprep.mubr.msk.f32.mxu1 %vm7670_vm1, %v7669_v50  ;;  %7023 = vmatprep.subr.mxu0 %v6405_v22 }
 0x196   :  { %7034 = vmatprep.subr.mxu1 %v6413_v23 }
 0x24f   :  { %v478_v2 = vpop.f32.mrf.mxu1 }
 0x250   :  { %v558_v3 = vmul.f32 0.35355338, %v478_v2 }
 0x251   :  { %v7007_v6 = vpop.f32.mrf.mxu1 }
 0x252   :  { %v560_v7 = vsel %vm405_vm2, %v558_v3, -inf }
 0x253   :  { %561 = vmax.xlane.f32.xlu1 %v560_v7  ;;  %v554_v8 = vpop.f32.mrf.mxu1 }
 0x254   :  { %v559_v9 = vmul.f32 0.35355338, %v554_v8 }
 0x255   :  { %v7012_v10 = vpop.f32.mrf.mxu1 }
 0x256   :  { %v563_v11 = vsel %vm405_vm2, %v559_v9, -inf }
 0x257   :  { %564 = vmax.xlane.f32.xlu0 %v563_v11 }
 0x2dc   :  { %v562_v12 = vpop.xlane.xlu1 %561 }
 0x2dd   :  { %v566_v13 = vsub.f32 %v558_v3, %v562_v12 }
 0x2df   :  { %v568_v14 = vmul.f32 1.442695, %v566_v13 }
 0x2e0   :  { %v565_v15 = vpop.xlane.xlu0 %564 }
 0x2e1   :  { %7551 = vpow2.f32 %v568_v14  ;;  %v567_v16 = vsub.f32 %v559_v9, %v565_v15 }
 0x2e3   :  { %v570_v17 = vmul.f32 1.442695, %v567_v16 }
 0x2e5   :  { %7553 = vpow2.f32 %v570_v17 }
 0x2ee   :  { %v7552_v18 = vpop.eup %7551 }
 0x2ef   :  { %v572_v19 = vsel %vm405_vm2, %v7552_v18, 0.0 }
 0x2f0   :  { %573 = vadd.xlane.f32.xlu1 %v572_v19 }
 0x2f2   :  { %v7554_v20 = vpop.eup %7553 }
 0x2f3   :  { %v575_v21 = vsel %vm405_vm2, %v7554_v20, 0.0 }
 0x2f4   :  { %576 = vadd.xlane.f32.xlu0 %v575_v21 }
 0x379   :  { %v574_v24 = vpop.xlane.xlu1 %573 }
 0x37a   :  { %7555 = vrcp.f32 %v574_v24 }
 0x37d   :  { %v577_v25 = vpop.xlane.xlu0 %576 }
 0x37e   :  { %7557 = vrcp.f32 %v577_v25  ;;  %v6448_v25 = vld [vmem:[%s8878_s2 + $0x58] sm:$0xff] }
 0x387   :  { %v7556_v26 = vpop.eup %7555 }
 0x388   :  { %v580_v27 = vmul.f32 %v7556_v26, %v7552_v18  ;;  %v728_v18 = vld [vmem:[%s8843_s10] sm:$0xff]  ;;  %v6447_v26 = vld [vmem:[%s8878_s2 + $0x50] sm:$0xff] }
 0x38a   :  { %7016 = vmatmul.mubr.msk.f32.vlgmr.msra.gmra.mxu0 %vm405_vm2, %v580_v27  ;;  %v6446_v27 = vld [vmem:[%s8878_s2 + $0x48] sm:$0xff] }
 0x38b   :  { %v7558_v29 = vpop.eup %7557  ;;  %7024 = vmatpush3.msra.mxu0 %v6405_v22  ;;  %7031 = vmatprep.mubr.msk.f32.mxu0 %vm93_vm0, %v7850_v39 }
 0x38c   :  { %7025 = vmatprep.subr.mxu0 %v6404_v28  ;;  %v581_v31 = vmul.f32 %v7558_v29, %v7554_v20  ;;  %v6432_v29 = vld [vmem:[%s8843_s10 + $0x8] sm:$0xff] }
 0x38d   :  { %7026 = vmatpush3.msra.mxu0 %v6404_v28  ;;  %v6445_v28 = vld [vmem:[%s8878_s2 + $0x40] sm:$0xff] }
 0x38e   :  { %7027 = vmatprep.subr.mxu0 %v6403_v30  ;;  %7021 = vmatmul.mubr.msk.f32.vlgmr.msra.gmra.mxu1 %vm405_vm2, %v581_v31 }
 0x38f   :  { %7028 = vmatpush3.msra.mxu0 %v6403_v30  ;;  %7035 = vmatpush3.msra.mxu1 %v6413_v23  ;;  %v6440_v30 = vld [vmem:[%s8877_s25 + $0x58] sm:$0xff] }
 0x390   :  { %7029 = vmatprep.subr.mxu0 %v6402_v32  ;;  %7036 = vmatprep.subr.mxu1 %v6412_v33 }
 0x391   :  { %7042 = vmatprep.mubr.msk.f32.mxu1 %vm93_vm0, %v7850_v39  ;;  %7030 = vmatpush3.msra.mxu0 %v6402_v32 }
 0x392   :  { %7037 = vmatpush3.msra.mxu1 %v6412_v33  ;;  %7032 = vmatmul.mubr.msk.f32.vlgmr.msra.gmra.mxu0 %vm93_vm0, %v7854_v42 }
 0x393   :  { %7038 = vmatprep.subr.mxu1 %v6411_v34  ;;  %7045 = vmatprep.subr.mxu0 %v6421_v35 }
 0x394   :  { %7039 = vmatpush3.msra.mxu1 %v6411_v34  ;;  %7046 = vmatpush3.msra.mxu0 %v6421_v35  ;;  %v6439_v34 = vld [vmem:[%s8877_s25 + $0x50] sm:$0xff] }
 0x395   :  { %7053 = vmatprep.mubr.msk.f32.mxu0 %vm93_vm0, %v7850_v39  ;;  %7040 = vmatprep.subr.mxu1 %v6410_v36 }
 0x396   :  { %7047 = vmatprep.subr.mxu0 %v6420_v37  ;;  %7041 = vmatpush3.msra.mxu1 %v6410_v36  ;;  %v6438_v36 = vld [vmem:[%s8877_s25 + $0x48] sm:$0xff] }
 0x397   :  { %7048 = vmatpush3.msra.mxu0 %v6420_v37  ;;  %7043 = vmatmul.mubr.msk.f32.vlgmr.msra.gmra.mxu1 %vm93_vm0, %v7854_v42  ;;  %v6437_v37 = vld [vmem:[%s8877_s25 + $0x40] sm:$0xff] }
 0x398   :  { %7049 = vmatprep.subr.mxu0 %v6419_v38  ;;  %7056 = vmatprep.subr.mxu1 %v7669_v50 }
 0x399   :  { %7050 = vmatpush3.msra.mxu0 %v6419_v38  ;;  %7058 = vmatprep.mubr.msk.f32.mxu1 %vm7670_vm1, %v7669_v50 }
 0x39a   :  { %7051 = vmatprep.subr.mxu0 %v6418_v40 }
 0x39b   :  { %7052 = vmatpush3.msra.mxu0 %v6418_v40  ;;  %v6456_v40 = vld [vmem:[%s8881_s29 + $0x58] sm:$0xff] }
 0x39c   :  { %7054 = vmatmul.mubr.msk.f32.vlgmr.msra.gmra.mxu0 %vm93_vm0, %v7854_v42  ;;  %7066 = vmatprep.subr.mxu0 %v7669_v50 }
 0x39d   :  { %7068 = vmatprep.mubr.msk.f32.mxu0 %vm7670_vm1, %v7669_v50 }
 0x44a   :  { %v7972_v41 = vpop.f32.mrf.mxu0 }
 0x44c   :  { %v7017_v43 = vpop.f32.mrf.mxu0 }
 0x44e   :  { %v7974_v44 = vpop.f32.mrf.mxu1 }
 0x450   :  { %v7022_v45 = vpop.f32.mrf.mxu1 }
 0x451   :  { %v6454_v45 = vld [vmem:[%s8881_s29 + $0x48] sm:$0xff] }
 0x452   :  { %v7033_v46 = vpop.f32.mrf.mxu0 }
 0x453   :  { %v814_v60 = vadd.f32 %v7033_v46, %v6407_v53 }
 0x454   :  { %v808_v51 = vpop.f32.mrf.mxu0 }
 0x455   :  { %v809_v55 = vadd.f32 %v6407_v53, %v808_v51 }
 0x457   :  { %v7044_v47 = vpop.f32.mrf.mxu1 }
 0x458   :  { %v902_v56 = vadd.f32 %v7044_v47, %v6415_v48  ;;  %v6453_v47 = vld [vmem:[%s8881_s29 + $0x40] sm:$0xff] }
 0x459   :  { %v896_v49 = vpop.f32.mrf.mxu1 }
 0x45a   :  { %v897_v52 = vadd.f32 %v6415_v48, %v896_v49 }
 0x45c   :  { %v7055_v54 = vpop.f32.mrf.mxu0  ;;  %7057 = vmatpush3.xpose.msk.msra.mxu1 %vm405_vm2, %v897_v52 }
 0x45d   :  { %7061 = vmatprep.subr.mxu1 %v7669_v50  ;;  %v990_v61 = vadd.f32 %v7055_v54, %v6423_v57 }
 0x45e   :  { %v984_v58 = vpop.f32.mrf.mxu0 }
 0x45f   :  { %v985_v59 = vadd.f32 %v6423_v57, %v984_v58  ;;  %7059 = vmatmul.mubr.msk.f32.vlgmr.msra.gmra.mxu1 %vm405_vm2, %v809_v55  ;;  %v6442_v55 = vld [vmem:[%s8883_s0 + $0x2] ss:$0 sm:$0xff] }
 0x460   :  { %7062 = vmatpush3.xpose.msk.msra.mxu1 %vm405_vm2, %v902_v56  ;;  %7063 = vmatprep.mubr.msk.f32.mxu1 %vm7670_vm1, %v7669_v50  ;;  %v6458_v58 = vld [vmem:[%s8842_s9 + $0x2] ss:$0 sm:$0xff] }
 0x461   :  { %7067 = vmatpush3.msra.mxu0 %v985_v59  ;;  %7071 = vmatprep.subr.mxu1 %v7669_v50 }
 0x462   :  { %7076 = vmatprep.subr.mxu0 %v6432_v29 }
 0x463   :  { %7064 = vmatmul.mubr.msk.f32.vlgmr.msra.gmra.mxu1 %vm405_vm2, %v814_v60 }
 0x464   :  { %7072 = vmatpush3.msra.mxu1 %v990_v61  ;;  %7073 = vmatprep.mubr.msk.f32.mxu1 %vm7670_vm1, %v7669_v50 }
 0x465   :  { %7081 = vmatprep.subr.mxu1 %v728_v18 }
 0x51f   :  { %v1065_v62 = vpop.f32.mrf.mxu1 }
 0x520   :  { %v1145_v63 = vmul.f32 0.35355338, %v1065_v62 }
 0x521   :  { %v7060_v0 = vpop.f32.mrf.mxu1 }
 0x522   :  { %v1147_v1 = vsel %vm405_vm2, %v1145_v63, -inf }
 0x523   :  { %1148 = vmax.xlane.f32.xlu0 %v1147_v1  ;;  %v1141_v2 = vpop.f32.mrf.mxu1 }
 0x524   :  { %v1146_v3 = vmul.f32 0.35355338, %v1141_v2 }
 0x525   :  { %v7065_v6 = vpop.f32.mrf.mxu1 }
 0x526   :  { %v1150_v7 = vsel %vm405_vm2, %v1146_v3, -inf }
 0x527   :  { %1151 = vmax.xlane.f32.xlu1 %v1150_v7 }
 0x5ac   :  { %v1149_v8 = vpop.xlane.xlu0 %1148 }
 0x5ad   :  { %v1153_v9 = vsub.f32 %v1145_v63, %v1149_v8 }
 0x5af   :  { %v1155_v10 = vmul.f32 1.442695, %v1153_v9 }
 0x5b0   :  { %v1152_v11 = vpop.xlane.xlu1 %1151 }
 0x5b1   :  { %7559 = vpow2.f32 %v1155_v10  ;;  %v1154_v12 = vsub.f32 %v1146_v3, %v1152_v11 }
 0x5b3   :  { %v1157_v13 = vmul.f32 1.442695, %v1154_v12 }
 0x5b5   :  { %7561 = vpow2.f32 %v1157_v13 }
 0x5be   :  { %v7560_v14 = vpop.eup %7559 }
 0x5bf   :  { %v1159_v15 = vsel %vm405_vm2, %v7560_v14, 0.0 }
 0x5c0   :  { %1160 = vadd.xlane.f32.xlu0 %v1159_v15 }
 0x5c2   :  { %v7562_v16 = vpop.eup %7561 }
 0x5c3   :  { %v1162_v17 = vsel %vm405_vm2, %v7562_v16, 0.0 }
 0x5c4   :  { %1163 = vadd.xlane.f32.xlu1 %v1162_v17 }
 0x649   :  { %v1161_v19 = vpop.xlane.xlu0 %1160 }
 0x64a   :  { %7563 = vrcp.f32 %v1161_v19 }
 0x64d   :  { %v1164_v20 = vpop.xlane.xlu1 %1163 }
 0x64e   :  { %7565 = vrcp.f32 %v1164_v20  ;;  %v6473_v20 = vld [vmem:[%s8877_s25 + $0x78] sm:$0xff] }
 0x657   :  { %v7564_v21 = vpop.eup %7563 }
 0x658   :  { %v1167_v22 = vmul.f32 %v7564_v21, %v7560_v14 }
 0x65a   :  { %7069 = vmatmul.mubr.msk.f32.vlgmr.msra.gmra.mxu0 %vm405_vm2, %v1167_v22 }
 0x65b   :  { %v7566_v23 = vpop.eup %7565  ;;  %7077 = vmatpush3.msra.mxu0 %v6432_v29  ;;  %v6470_v29 = vld [vmem:[%s8877_s25 + $0x60] sm:$0xff] }
 0x65c   :  { %v1168_v24 = vmul.f32 %v7566_v23, %v7562_v16  ;;  %7086 = vmatprep.subr.mxu0 %v6440_v30 }
 0x65e   :  { %7074 = vmatmul.mubr.msk.f32.vlgmr.msra.gmra.mxu1 %vm405_vm2, %v1168_v24 }
 0x65f   :  { %7083 = vmatprep.mubr.msk.f32.mxu1 %vm405_vm2, %v7972_v41  ;;  %7082 = vmatpush3.msra.mxu1 %v728_v18  ;;  %v6455_v41 = vld [vmem:[%s8881_s29 + $0x50] sm:$0xff] }
 0x660   :  { %7097 = vmatprep.subr.mxu1 %v6448_v25 }
 0x662   :  { %7084 = vmatmul.mubr.msk.f32.vlgmr.msra.gmra.mxu1 %vm405_vm2, %v7974_v44  ;;  %v6450_v44 = vld [vmem:[%s8882_s27 + $0x2] ss:$0 sm:$0xff] }
 0x663   :  { %7098 = vmatpush3.msra.mxu1 %v6448_v25  ;;  %7105 = vmatprep.mubr.msk.f32.mxu1 %vm93_vm0, %v7850_v39 }
 0x664   :  { %7099 = vmatprep.subr.mxu1 %v6447_v26 }
 0x665   :  { %7100 = vmatpush3.msra.mxu1 %v6447_v26 }
 0x666   :  { %7101 = vmatprep.subr.mxu1 %v6446_v27 }
 0x667   :  { %7102 = vmatpush3.msra.mxu1 %v6446_v27  ;;  %v6472_v27 = vld [vmem:[%s8877_s25 + $0x70] sm:$0xff] }
 0x668   :  { %7103 = vmatprep.subr.mxu1 %v6445_v28 }
 0x669   :  { %7104 = vmatpush3.msra.mxu1 %v6445_v28  ;;  %v6471_v28 = vld [vmem:[%s8877_s25 + $0x68] sm:$0xff] }
 0x66a   :  { %7106 = vmatmul.mubr.msk.f32.vlgmr.msra.gmra.mxu1 %vm93_vm0, %v7854_v42  ;;  %7119 = vmatprep.subr.mxu1 %v7669_v50 }
 0x66b   :  { %7121 = vmatprep.mubr.msk.f32.mxu1 %vm7670_vm1, %v7669_v50 }
 0x71a   :  { %v1238_v31 = vpop.f32.mrf.mxu0 }
 0x71b   :  { %7078 = vmatprep.mubr.msk.f32.mxu0 %vm405_vm2, %v1238_v31  ;;  %v6488_v31 = vld [vmem:[%s8881_s29 + $0x70] sm:$0xff] }
 0x71c   :  { %v7070_v32 = vpop.f32.mrf.mxu0 }
 0x71d   :  { %v6487_v32 = vld [vmem:[%s8881_s29 + $0x68] sm:$0xff] }
 0x71e   :  { %v1311_v33 = vpop.f32.mrf.mxu1 }
 0x71f   :  { %7079 = vmatmul.mubr.msk.f32.vlgmr.msra.gmra.mxu0 %vm405_vm2, %v1311_v33  ;;  %v6486_v33 = vld [vmem:[%s8881_s29 + $0x60] sm:$0xff] }
 0x720   :  { %7087 = vmatpush3.msra.mxu0 %v6440_v30  ;;  %v7075_v35 = vpop.f32.mrf.mxu1  ;;  %7094 = vmatprep.mubr.msk.f32.mxu0 %vm93_vm0, %v7850_v39  ;;  %v6489_v30 = vld [vmem:[%s8881_s29 + $0x78] sm:$0xff] }
 0x721   :  { %7088 = vmatprep.subr.mxu0 %v6439_v34  ;;  %v6481_v35 = vld [vmem:[%s8878_s2 + $0x78] sm:$0xff] }
 0x722   :  { %7089 = vmatpush3.msra.mxu0 %v6439_v34  ;;  %v8046_v38 = vpop.f32.mrf.mxu1  ;;  %v6467_v34 = vld [vmem:[%s8843_s10 + $0x10] sm:$0xff] }
 0x723   :  { %7090 = vmatprep.subr.mxu0 %v6438_v36 }
 0x724   :  { %7091 = vmatpush3.msra.mxu0 %v6438_v36  ;;  %v8056_v43 = vpop.f32.mrf.mxu1 }
 0x725   :  { %7092 = vmatprep.subr.mxu0 %v6437_v37 }
 0x726   :  { %7093 = vmatpush3.msra.mxu0 %v6437_v37 }
 0x727   :  { %7095 = vmatmul.mubr.msk.f32.vlgmr.msra.gmra.mxu0 %vm93_vm0, %v7854_v42  ;;  %7108 = vmatprep.subr.mxu0 %v6456_v40 }
 0x728   :  { %7109 = vmatpush3.msra.mxu0 %v6456_v40  ;;  %7116 = vmatprep.mubr.msk.f32.mxu0 %vm93_vm0, %v7850_v39 }
 0x729   :  { %7110 = vmatprep.subr.mxu0 %v6455_v41 }
 0x72a   :  { %v7107_v46 = vpop.f32.mrf.mxu1  ;;  %7111 = vmatpush3.msra.mxu0 %v6455_v41  ;;  %v6480_v41 = vld [vmem:[%s8878_s2 + $0x70] sm:$0xff] }
 0x72b   :  { %v1652_v48 = vadd.f32 %v7107_v46, %v6450_v44  ;;  %7112 = vmatprep.subr.mxu0 %v6454_v45  ;;  %v6478_v46 = vld [vmem:[%s8878_s2 + $0x60] sm:$0xff] }
 0x72c   :  { %v1646_v49 = vpop.f32.mrf.mxu1  ;;  %7113 = vmatpush3.msra.mxu0 %v6454_v45  ;;  %v6479_v45 = vld [vmem:[%s8878_s2 + $0x68] sm:$0xff] }
 0x72d   :  { %v1647_v51 = vadd.f32 %v6450_v44, %v1646_v49  ;;  %7114 = vmatprep.subr.mxu0 %v6453_v47 }
 0x72e   :  { %7115 = vmatpush3.msra.mxu0 %v6453_v47 }
 0x72f   :  { %7117 = vmatmul.mubr.msk.f32.vlgmr.msra.gmra.mxu0 %vm93_vm0, %v7854_v42  ;;  %7120 = vmatpush3.xpose.msk.msra.mxu1 %vm405_vm2, %v1647_v51 }
 0x730   :  { %7124 = vmatprep.subr.mxu1 %v7669_v50  ;;  %7129 = vmatprep.subr.mxu0 %v7669_v50 }
 0x731   :  { %7131 = vmatprep.mubr.msk.f32.mxu0 %vm7670_vm1, %v7669_v50 }
 0x7df   :  { %v8076_v52 = vpop.f32.mrf.mxu0 }
 0x7e1   :  { %v8078_v53 = vpop.f32.mrf.mxu0 }
 0x7e7   :  { %v7096_v54 = vpop.f32.mrf.mxu0 }
 0x7e8   :  { %v1564_v59 = vadd.f32 %v7096_v54, %v6442_v55 }
 0x7e9   :  { %v1558_v56 = vpop.f32.mrf.mxu0 }
 0x7ea   :  { %v1559_v57 = vadd.f32 %v6442_v55, %v1558_v56  ;;  %v1476_v56 = vadd.f32 %v8046_v38, %v8076_v52  ;;  %v6475_v38 = vld [vmem:[%s8883_s0 + $0x3] ss:$0 sm:$0xff] }
 0x7ec   :  { %7122 = vmatmul.mubr.msk.f32.vlgmr.msra.gmra.mxu1 %vm405_vm2, %v1559_v57  ;;  %v1471_v57 = vadd.f32 %v8056_v43, %v8078_v53 }
 0x7ed   :  { %7125 = vmatpush3.xpose.msk.msra.mxu1 %vm405_vm2, %v1652_v48  ;;  %7126 = vmatprep.mubr.msk.f32.mxu1 %vm7670_vm1, %v7669_v50  ;;  %v6491_v48 = vld [vmem:[%s8842_s9 + $0x3] ss:$0 sm:$0xff] }
 0x7ee   :  { %7134 = vmatprep.subr.mxu1 %v7669_v50 }
 0x7ef   :  { %v7118_v60 = vpop.f32.mrf.mxu0 }
 0x7f0   :  { %v1740_v61 = vadd.f32 %v7118_v60, %v6458_v58  ;;  %7127 = vmatmul.mubr.msk.f32.vlgmr.msra.gmra.mxu1 %vm405_vm2, %v1564_v59 }
 0x7f1   :  { %v1734_v62 = vpop.f32.mrf.mxu0  ;;  %7136 = vmatprep.mubr.msk.f32.mxu1 %vm7670_vm1, %v7669_v50 }
 0x7f2   :  { %v1735_v63 = vadd.f32 %v6458_v58, %v1734_v62  ;;  %7135 = vmatpush3.msra.mxu1 %v1740_v61  ;;  %v6483_v62 = vld [vmem:[%s8882_s27 + $0x3] ss:$0 sm:$0xff] }
 0x7f3   :  { %7144 = vmatprep.subr.mxu1 %v6473_v20 }
 0x7f4   :  { %7130 = vmatpush3.msra.mxu0 %v1735_v63 }
 0x7f5   :  { %7139 = vmatprep.subr.mxu0 %v6467_v34 }
 0x8ac   :  { %v1815_v0 = vpop.f32.mrf.mxu1 }
 0x8ad   :  { %v1895_v1 = vmul.f32 0.35355338, %v1815_v0 }
 0x8ae   :  { %v7123_v2 = vpop.f32.mrf.mxu1 }
 0x8af   :  { %v1897_v3 = vsel %vm405_vm2, %v1895_v1, -inf }
 0x8b0   :  { %1898 = vmax.xlane.f32.xlu0 %v1897_v3  ;;  %v1891_v6 = vpop.f32.mrf.mxu1 }
 0x8b1   :  { %v1896_v7 = vmul.f32 0.35355338, %v1891_v6 }
 0x8b2   :  { %v7128_v8 = vpop.f32.mrf.mxu1 }
 0x8b3   :  { %v1900_v9 = vsel %vm405_vm2, %v1896_v7, -inf }
 0x8b4   :  { %1901 = vmax.xlane.f32.xlu1 %v1900_v9 }
 0x939   :  { %v1899_v10 = vpop.xlane.xlu0 %1898 }
 0x93a   :  { %v1903_v11 = vsub.f32 %v1895_v1, %v1899_v10 }
 0x93c   :  { %v1905_v12 = vmul.f32 1.442695, %v1903_v11 }
 0x93d   :  { %v1902_v13 = vpop.xlane.xlu1 %1901 }
 0x93e   :  { %7567 = vpow2.f32 %v1905_v12  ;;  %v1904_v14 = vsub.f32 %v1896_v7, %v1902_v13 }
 0x940   :  { %v1907_v15 = vmul.f32 1.442695, %v1904_v14 }
 0x942   :  { %7569 = vpow2.f32 %v1907_v15 }
 0x94b   :  { %v7568_v16 = vpop.eup %7567 }
 0x94c   :  { %v1909_v17 = vsel %vm405_vm2, %v7568_v16, 0.0 }
 0x94d   :  { %1910 = vadd.xlane.f32.xlu0 %v1909_v17 }
 0x94f   :  { %v7570_v18 = vpop.eup %7569 }
 0x950   :  { %v1912_v19 = vsel %vm405_vm2, %v7570_v18, 0.0 }
 0x951   :  { %1913 = vadd.xlane.f32.xlu1 %v1912_v19 }
 0x9d6   :  { %v1911_v21 = vpop.xlane.xlu0 %1910 }
 0x9d7   :  { %7571 = vrcp.f32 %v1911_v21 }
 0x9da   :  { %v1914_v22 = vpop.xlane.xlu1 %1913 }
 0x9db   :  { %7573 = vrcp.f32 %v1914_v22 }
 0x9e4   :  { %v7572_v23 = vpop.eup %7571 }
 0x9e5   :  { %v1917_v24 = vmul.f32 %v7572_v23, %v7568_v16 }
 0x9e7   :  { %7132 = vmatmul.mubr.msk.f32.vlgmr.msra.gmra.mxu0 %vm405_vm2, %v1917_v24 }
 0x9e8   :  { %v7574_v25 = vpop.eup %7573  ;;  %7140 = vmatpush3.msra.mxu0 %v6467_v34  ;;  %v6503_v34 = vld [vmem:[%s8844_s11] ss:$0 sm:$0xff] }
 0x9e9   :  { %v1918_v26 = vmul.f32 %v7574_v25, %v7570_v18  ;;  %7155 = vmatprep.subr.mxu0 %v6481_v35 }
 0x9eb   :  { %7137 = vmatmul.mubr.msk.f32.vlgmr.msra.gmra.mxu1 %vm405_vm2, %v1918_v26 }
 0x9ec   :  { %7145 = vmatpush3.msra.mxu1 %v6473_v20  ;;  %7152 = vmatprep.mubr.msk.f32.mxu1 %vm93_vm0, %v7850_v39 }
 0x9ed   :  { %7146 = vmatprep.subr.mxu1 %v6472_v27 }
 0x9ee   :  { %7147 = vmatpush3.msra.mxu1 %v6472_v27  ;;  %v6500_v27 = vld [vmem:[%s8843_s10 + $0x18] sm:$0xff] }
 0x9ef   :  { %7148 = vmatprep.subr.mxu1 %v6471_v28 }
 0x9f0   :  { %7149 = vmatpush3.msra.mxu1 %v6471_v28 }
 0x9f1   :  { %7150 = vmatprep.subr.mxu1 %v6470_v29 }
 0x9f2   :  { %7151 = vmatpush3.msra.mxu1 %v6470_v29 }
 0x9f3   :  { %7153 = vmatmul.mubr.msk.f32.vlgmr.msra.gmra.mxu1 %vm93_vm0, %v7854_v42  ;;  %7166 = vmatprep.subr.mxu1 %v6489_v30 }
 0x9f4   :  { %7167 = vmatpush3.msra.mxu1 %v6489_v30  ;;  %7174 = vmatprep.mubr.msk.f32.mxu1 %vm93_vm0, %v7850_v39 }
 0x9f5   :  { %7168 = vmatprep.subr.mxu1 %v6488_v31 }
 0x9f6   :  { %7169 = vmatpush3.msra.mxu1 %v6488_v31 }
 0x9f7   :  { %7170 = vmatprep.subr.mxu1 %v6487_v32 }
 0x9f8   :  { %7171 = vmatpush3.msra.mxu1 %v6487_v32 }
 0x9f9   :  { %7172 = vmatprep.subr.mxu1 %v6486_v33 }
 0x9fa   :  { %7173 = vmatpush3.msra.mxu1 %v6486_v33 }
 0x9fb   :  { %7175 = vmatmul.mubr.msk.f32.vlgmr.msra.gmra.mxu1 %vm93_vm0, %v7854_v42  ;;  %7187 = vmatprep.subr.mxu1 %v7669_v50 }
 0x9fc   :  { %7189 = vmatprep.mubr.msk.f32.mxu1 %vm7670_vm1, %v7669_v50 }
 0xaa7   :  { %v1988_v36 = vpop.f32.mrf.mxu0 }
 0xaa8   :  { %7141 = vmatprep.mubr.msk.f32.mxu0 %vm405_vm2, %v1988_v36 }
 0xaa9   :  { %v7133_v37 = vpop.f32.mrf.mxu0 }
 0xaab   :  { %v2061_v40 = vpop.f32.mrf.mxu1 }
 0xaac   :  { %7142 = vmatmul.mubr.msk.f32.vlgmr.msra.gmra.mxu0 %vm405_vm2, %v2061_v40 }
 0xaad   :  { %7156 = vmatpush3.msra.mxu0 %v6481_v35  ;;  %v7138_v44 = vpop.f32.mrf.mxu1  ;;  %7163 = vmatprep.mubr.msk.f32.mxu0 %vm93_vm0, %v7850_v39 }
 0xaae   :  { %7157 = vmatprep.subr.mxu0 %v6480_v41 }
 0xaaf   :  { %7158 = vmatpush3.msra.mxu0 %v6480_v41 }
 0xab0   :  { %7159 = vmatprep.subr.mxu0 %v6479_v45 }
 0xab1   :  { %7160 = vmatpush3.msra.mxu0 %v6479_v45 }
 0xab2   :  { %7161 = vmatprep.subr.mxu0 %v6478_v46 }
 0xab3   :  { %7162 = vmatpush3.msra.mxu0 %v6478_v46  ;;  %v7154_v39 = vpop.f32.mrf.mxu1 }
 0xab4   :  { %7164 = vmatmul.mubr.msk.f32.vlgmr.msra.gmra.mxu0 %vm93_vm0, %v7854_v42  ;;  %7177 = vmatprep.subr.mxu0 %v7669_v50  ;;  %v2235_v53 = vadd.f32 %v7154_v39, %v6475_v38 }
 0xab5   :  { %7179 = vmatprep.mubr.msk.f32.mxu0 %vm7670_vm1, %v7669_v50  ;;  %v2229_v47 = vpop.f32.mrf.mxu1 }
 0xab6   :  { %v2230_v52 = vadd.f32 %v6475_v38, %v2229_v47 }
 0xabb   :  { %v7176_v49 = vpop.f32.mrf.mxu1 }
 0xabc   :  { %v2411_v51 = vadd.f32 %v7176_v49, %v6491_v48  ;;  %v2882_v49 = vld [vmem:[%s8847_s14 + $0x10] sm:$0xff] }
 0xabd   :  { %v2405_v54 = vpop.f32.mrf.mxu1 }
 0xabe   :  { %v2406_v55 = vadd.f32 %v6491_v48, %v2405_v54  ;;  %v2883_v48 = vld [vmem:[%s8847_s14 + $0x18] sm:$0xff]  ;;  %v2880_v54 = vld [vmem:[%s8847_s14] sm:$0xff] }
 0xac0   :  { %7188 = vmatpush3.msra.mxu1 %v2406_v55 }
 0xac1   :  { %7197 = vmatprep.subr.mxu1 %v6500_v27 }
 0xb6c   :  { %v7143_v42 = vpop.f32.mrf.mxu0 }
 0xb6d   :  { %v8166_v58 = vadd.f32 %v7143_v42, %v1476_v56 }
 0xb6e   :  { %v2139_v59 = vpop.f32.mrf.mxu0 }
 0xb6f   :  { %v8168_v60 = vadd.f32 %v2139_v59, %v1471_v57 }
 0xb74   :  { %v7165_v61 = vpop.f32.mrf.mxu0 }
 0xb75   :  { %v2323_v43 = vadd.f32 %v7165_v61, %v6483_v62 }
 0xb76   :  { %v2317_v63 = vpop.f32.mrf.mxu0 }
 0xb77   :  { %v2318_v0 = vadd.f32 %v6483_v62, %v2317_v63 }
 0xb79   :  { %7178 = vmatpush3.xpose.msk.msra.mxu0 %vm405_vm2, %v2318_v0 }
 0xb7a   :  { %7182 = vmatprep.subr.mxu0 %v7669_v50 }
 0xb7c   :  { %7180 = vmatmul.mubr.msk.f32.vlgmr.msra.gmra.mxu0 %vm405_vm2, %v2230_v52 }
 0xb7d   :  { %7183 = vmatpush3.xpose.msk.msra.mxu0 %vm405_vm2, %v2323_v43  ;;  %7184 = vmatprep.mubr.msk.f32.mxu0 %vm7670_vm1, %v7669_v50 }
 0xb7e   :  { %7192 = vmatprep.subr.mxu0 %v7669_v50 }
 0xb80   :  { %7185 = vmatmul.mubr.msk.f32.vlgmr.msra.gmra.mxu0 %vm405_vm2, %v2235_v53 }
 0xb81   :  { %7193 = vmatpush3.msra.mxu0 %v2411_v51  ;;  %7194 = vmatprep.mubr.msk.f32.mxu0 %vm7670_vm1, %v7669_v50  ;;  %v2881_v51 = vld [vmem:[%s8847_s14 + $0x8] sm:$0xff] }
 0xb82   :  { %7202 = vmatprep.subr.mxu0 %v2883_v48 }
 0xc3c   :  { %v2486_v1 = vpop.f32.mrf.mxu0 }
 0xc3d   :  { %v2566_v2 = vmul.f32 0.35355338, %v2486_v1 }
 0xc3e   :  { %v7181_v3 = vpop.f32.mrf.mxu0 }
 0xc3f   :  { %v2568_v6 = vsel %vm405_vm2, %v2566_v2, -inf  ;;  %v6504_v3 = vld [vmem:[%s8845_s12] ss:$0 sm:$0xff] }
 0xc40   :  { %2569 = vmax.xlane.f32.xlu0 %v2568_v6  ;;  %v2562_v7 = vpop.f32.mrf.mxu0 }
 0xc41   :  { %v2567_v8 = vmul.f32 0.35355338, %v2562_v7 }
 0xc42   :  { %v7186_v9 = vpop.f32.mrf.mxu0 }
 0xc43   :  { %v2571_v10 = vsel %vm405_vm2, %v2567_v8, -inf }
 0xc44   :  { %2572 = vmax.xlane.f32.xlu1 %v2571_v10  ;;  %v6505_v10 = vld [vmem:[%s8846_s13] ss:$0 sm:$0xff] }
 0xcc9   :  { %v2570_v11 = vpop.xlane.xlu0 %2569 }
 0xcca   :  { %v2574_v12 = vsub.f32 %v2566_v2, %v2570_v11 }
 0xccc   :  { %v2576_v13 = vmul.f32 1.442695, %v2574_v12 }
 0xccd   :  { %v2573_v14 = vpop.xlane.xlu1 %2572 }
 0xcce   :  { %7575 = vpow2.f32 %v2576_v13  ;;  %v2575_v15 = vsub.f32 %v2567_v8, %v2573_v14  ;;  %v3005_v14 = vld [vmem:[%s8849_s16 + $0x78] sm:$0xff] }
 0xcd0   :  { %v2578_v16 = vmul.f32 1.442695, %v2575_v15  ;;  %v3004_v15 = vld [vmem:[%s8849_s16 + $0x70] sm:$0xff] }
 0xcd2   :  { %7577 = vpow2.f32 %v2578_v16  ;;  %v3003_v16 = vld [vmem:[%s8849_s16 + $0x68] sm:$0xff] }
 0xcdb   :  { %v7576_v17 = vpop.eup %7575 }
 0xcdc   :  { %v2580_v18 = vsel %vm405_vm2, %v7576_v17, 0.0 }
 0xcdd   :  { %2581 = vadd.xlane.f32.xlu0 %v2580_v18  ;;  %v3001_v18 = vld [vmem:[%s8849_s16 + $0x58] sm:$0xff] }
 0xcdf   :  { %v7578_v19 = vpop.eup %7577 }
 0xce0   :  { %v2583_v20 = vsel %vm405_vm2, %v7578_v19, 0.0 }
 0xce1   :  { %2584 = vadd.xlane.f32.xlu1 %v2583_v20  ;;  %v2999_v20 = vld [vmem:[%s8849_s16 + $0x48] sm:$0xff] }
 0xd66   :  { %v2582_v21 = vpop.xlane.xlu0 %2581 }
 0xd67   :  { %7579 = vrcp.f32 %v2582_v21  ;;  %v2998_v21 = vld [vmem:[%s8849_s16 + $0x40] sm:$0xff] }
 0xd6a   :  { %v2585_v22 = vpop.xlane.xlu1 %2584 }
 0xd6b   :  { %7581 = vrcp.f32 %v2585_v22  ;;  %v2997_v22 = vld [vmem:[%s8849_s16 + $0x38] sm:$0xff] }
 0xd74   :  { %v7580_v23 = vpop.eup %7579 }
 0xd75   :  { %v2588_v24 = vmul.f32 %v7580_v23, %v7576_v17  ;;  %v3002_v17 = vld [vmem:[%s8849_s16 + $0x60] sm:$0xff]  ;;  %v2996_v23 = vld [vmem:[%s8849_s16 + $0x30] sm:$0xff] }
 0xd77   :  { %7190 = vmatmul.mubr.msk.f32.vlgmr.msra.gmra.mxu1 %vm405_vm2, %v2588_v24  ;;  %v2995_v24 = vld [vmem:[%s8849_s16 + $0x28] sm:$0xff] }
 0xd78   :  { %v7582_v25 = vpop.eup %7581  ;;  %7198 = vmatpush3.msra.mxu1 %v6500_v27  ;;  %v2992_v27 = vld [vmem:[%s8849_s16 + $0x10] sm:$0xff] }
 0xd79   :  { %v2589_v26 = vmul.f32 %v7582_v25, %v7578_v19  ;;  %7213 = vmatprep.subr.mxu1 %v3005_v14  ;;  %v3000_v19 = vld [vmem:[%s8849_s16 + $0x50] sm:$0xff]  ;;  %v2994_v25 = vld [vmem:[%s8849_s16 + $0x20] sm:$0xff] }
 0xd7b   :  { %7195 = vmatmul.mubr.msk.f32.vlgmr.msra.gmra.mxu0 %vm405_vm2, %v2589_v26  ;;  %v2993_v26 = vld [vmem:[%s8849_s16 + $0x18] sm:$0xff] }
 0xd7c   :  { %7203 = vmatpush3.msra.mxu0 %v2883_v48 }
 0xd7d   :  { %7204 = vmatprep.subr.mxu0 %v2882_v49 }
 0xd7e   :  { %7205 = vmatpush3.msra.mxu0 %v2882_v49 }
 0xd7f   :  { %7206 = vmatprep.subr.mxu0 %v2881_v51 }
 0xd80   :  { %7207 = vmatpush3.msra.mxu0 %v2881_v51 }
 0xd81   :  { %7208 = vmatprep.subr.mxu0 %v2880_v54 }
 0xd82   :  { %7209 = vmatpush3.msra.mxu0 %v2880_v54 }
 0xe37   :  { %v2659_v28 = vpop.f32.mrf.mxu1 }
 0xe38   :  { %7199 = vmatprep.mubr.msk.f32.mxu1 %vm405_vm2, %v2659_v28  ;;  %v2991_v28 = vld [vmem:[%s8849_s16 + $0x8] sm:$0xff] }
 0xe39   :  { %v7191_v29 = vpop.f32.mrf.mxu1 }
 0xe3a   :  { %v2990_v29 = vld [vmem:[%s8849_s16] sm:$0xff] }
 0xe3b   :  { %v2732_v30 = vpop.f32.mrf.mxu0 }
 0xe3c   :  { %7200 = vmatmul.mubr.msk.f32.vlgmr.msra.gmra.mxu1 %vm405_vm2, %v2732_v30  ;;  %v6506_v30 = vld [vmem:[%s8848_s15] ss:$0 sm:$0xff] }
 0xe3d   :  { %v7196_v31 = vpop.f32.mrf.mxu0  ;;  %7214 = vmatpush3.msra.mxu1 %v3005_v14 }
 0xe3e   :  { %7215 = vmatprep.subr.mxu1 %v3004_v15 }
 0xe3f   :  { %7216 = vmatpush3.msra.mxu1 %v3004_v15 }
 0xe40   :  { %7217 = vmatprep.subr.mxu1 %v3003_v16 }
 0xe41   :  { %7218 = vmatpush3.msra.mxu1 %v3003_v16 }
 0xe42   :  { %7219 = vmatprep.subr.mxu1 %v3002_v17 }
 0xe43   :  { %7220 = vmatpush3.msra.mxu1 %v3002_v17 }
 0xe44   :  { %7221 = vmatprep.subr.mxu1 %v3001_v18 }
 0xe45   :  { %7222 = vmatpush3.msra.mxu1 %v3001_v18 }
 0xe46   :  { %7223 = vmatprep.subr.mxu1 %v3000_v19 }
 0xe47   :  { %7224 = vmatpush3.msra.mxu1 %v3000_v19 }
 0xe48   :  { %7225 = vmatprep.subr.mxu1 %v2999_v20 }
 0xe49   :  { %7226 = vmatpush3.msra.mxu1 %v2999_v20 }
 0xe4a   :  { %7227 = vmatprep.subr.mxu1 %v2998_v21 }
 0xe4b   :  { %7228 = vmatpush3.msra.mxu1 %v2998_v21 }
 0xe4c   :  { %7229 = vmatprep.subr.mxu1 %v2997_v22 }
 0xe4d   :  { %7230 = vmatpush3.msra.mxu1 %v2997_v22 }
 0xe4e   :  { %7231 = vmatprep.subr.mxu1 %v2996_v23 }
 0xe4f   :  { %7232 = vmatpush3.msra.mxu1 %v2996_v23 }
 0xe50   :  { %7233 = vmatprep.subr.mxu1 %v2995_v24 }
 0xe51   :  { %7234 = vmatpush3.msra.mxu1 %v2995_v24 }
 0xe52   :  { %7235 = vmatprep.subr.mxu1 %v2994_v25 }
 0xe53   :  { %7236 = vmatpush3.msra.mxu1 %v2994_v25  ;;  %v6512_v25 = vld [vmem:[%s8879_s7 + $0x1] ss:$0 sm:$0xff] }
 0xe54   :  { %7237 = vmatprep.subr.mxu1 %v2993_v26 }
 0xe55   :  { %7238 = vmatpush3.msra.mxu1 %v2993_v26 }
 0xe56   :  { %7239 = vmatprep.subr.mxu1 %v2992_v27 }
 0xe57   :  { %7240 = vmatpush3.msra.mxu1 %v2992_v27 }
 0xe58   :  { %7241 = vmatprep.subr.mxu1 %v2991_v28 }
 0xe59   :  { %7242 = vmatpush3.msra.mxu1 %v2991_v28 }
 0xe5a   :  { %7243 = vmatprep.subr.mxu1 %v2990_v29 }
 0xe5b   :  { %7244 = vmatpush3.msra.mxu1 %v2990_v29 }
 0xe5c   :  { %7286 = vmatprep.subr.mxu1 %v7669_v50 }
 0xefc   :  { %v7201_v32 = vpop.f32.mrf.mxu1 }
 0xefd   :  { %v2820_v33 = vadd.f32 %v7201_v32, %v8166_v58 }
 0xefe   :  { %v2810_v35 = vpop.f32.mrf.mxu1 }
 0xeff   :  { %v2822_v36 = vadd.f32 %v2820_v33, %v7815_v5  ;;  %v2819_v37 = vadd.f32 %v2810_v35, %v8168_v60 }
 0xf01   :  { %v8203_v40 = vadd.f32 %v6503_v34, %v2822_v36  ;;  %v2821_v41 = vadd.f32 %v2819_v37, %v7813_v4 }
 0xf03   :  { %v8206_v44 = vadd.f32 %v6503_v34, %v2821_v41  ;;  %v2837_v45 = vsel %vm93_vm0, %v8203_v40, 0.0  ;;  %v2843_v46 = vmul.f32 %v8203_v40, %v8203_v40 }
 0xf04   :  { %2838 = vadd.xlane.f32.xlu1 %v2837_v45 }
 0xf05   :  { %v2834_v39 = vsel %vm93_vm0, %v8206_v44, 0.0  ;;  %v2842_v5 = vmul.f32 %v8206_v44, %v8206_v44  ;;  %v2847_v47 = vsel %vm93_vm0, %v2843_v46, 0.0 }
 0xf06   :  { %2835 = vadd.xlane.f32.xlu0 %v2834_v39 }
 0xf07   :  { %v2844_v4 = vsel %vm93_vm0, %v2842_v5, 0.0 }
 0xf08   :  { %2848 = vadd.xlane.f32.xlu1 %v2847_v47 }
 0xf0a   :  { %2845 = vadd.xlane.f32.xlu0 %v2844_v4 }
 0xf8d   :  { %v2839_v55 = vpop.xlane.xlu1 %2838 }
 0xf8e   :  { %v2841_v56 = vmul.f32 0.03125, %v2839_v55 }
 0xf8f   :  { %v2836_v42 = vpop.xlane.xlu0 %2835 }
 0xf90   :  { %v2840_v57 = vmul.f32 0.03125, %v2836_v42  ;;  %v2853_v59 = vmul.f32 %v2841_v56, %v2841_v56  ;;  %v2857_v53 = vsub.f32 %v8203_v40, %v2841_v56 }
 0xf91   :  { %v2849_v58 = vpop.xlane.xlu1 %2848 }
 0xf92   :  { %v2851_v60 = vmul.f32 0.03125, %v2849_v58  ;;  %v2852_v62 = vmul.f32 %v2840_v57, %v2840_v57  ;;  %v2856_v2 = vsub.f32 %v8206_v44, %v2840_v57 }
 0xf93   :  { %v2846_v61 = vpop.xlane.xlu0 %2845 }
 0xf94   :  { %v2855_v63 = vsub.f32 %v2851_v60, %v2853_v59  ;;  %v2850_v0 = vmul.f32 0.03125, %v2846_v61  ;;  %v6509_v59 = vld [vmem:[%s8850_s17] ss:$0 sm:$0xff] }
 0xf96   :  { %v2859_v38 = vadd.f32 1e-05, %v2855_v63  ;;  %v2854_v52 = vsub.f32 %v2850_v0, %v2852_v62 }
 0xf98   :  { %7583 = vrsqrt.f32 %v2859_v38  ;;  %v2858_v43 = vadd.f32 1e-05, %v2854_v52 }
 0xf9a   :  { %7585 = vrsqrt.f32 %v2858_v43 }
 0xfa5   :  { %v7584_v1 = vpop.eup %7583 }
 0xfa6   :  { %v2863_v6 = vmul.f32 %v7584_v1, %v2857_v53  ;;  %v6517_v1 = vld [vmem:[%s8877_s25 + $0x98] sm:$0xff] }
 0xfa7   :  { %v7586_v7 = vpop.eup %7585  ;;  %7248 = vmatprep.subr.mxu0 %v6517_v1 }
 0xfa8   :  { %v2862_v8 = vmul.f32 %v7586_v7, %v2856_v2  ;;  %v2871_v9 = vmul.f32 %v6504_v3, %v2863_v6  ;;  %v6516_v2 = vld [vmem:[%s8877_s25 + $0x90] sm:$0xff]  ;;  %v6514_v6 = vld [vmem:[%s8877_s25 + $0x80] sm:$0xff]  ;;  %v6525_v7 = vld [vmem:[%s8878_s2 + $0x98] sm:$0xff] }
 0xfaa   :  { %v2870_v11 = vmul.f32 %v6504_v3, %v2862_v8  ;;  %v2879_v13 = vadd.f32 %v6505_v10, %v2871_v9  ;;  %v6515_v3 = vld [vmem:[%s8877_s25 + $0x88] sm:$0xff] }
 0xfac   :  { %v2878_v12 = vadd.f32 %v6505_v10, %v2870_v11 }
 0xfae   :  { %7210 = vmatprep.mubr.msk.f32.mxu0 %vm93_vm0, %v2878_v12 }
 0xfaf   :  { %7211 = vmatmul.mubr.msk.f32.vlgmr.msra.gmra.mxu0 %vm93_vm0, %v2879_v13 }
 0xfb0   :  { %7249 = vmatpush3.msra.mxu0 %v6517_v1 }
 0xfb1   :  { %7250 = vmatprep.subr.mxu0 %v6516_v2 }
 0xfb2   :  { %7251 = vmatpush3.msra.mxu0 %v6516_v2 }
 0xfb3   :  { %7252 = vmatprep.subr.mxu0 %v6515_v3 }
 0xfb4   :  { %7253 = vmatpush3.msra.mxu0 %v6515_v3 }
 0xfb5   :  { %7254 = vmatprep.subr.mxu0 %v6514_v6 }
 0xfb6   :  { %7255 = vmatpush3.msra.mxu0 %v6514_v6 }
 0xfb7   :  { %7259 = vmatprep.subr.mxu0 %v6525_v7 }
0x106f   :  { %v7212_v31 = vpop.f32.mrf.mxu0 }
0x1070   :  { %v2969_v32 = vadd.f32 %v7212_v31, %v6506_v30 }
0x1071   :  { %v2963_v33 = vpop.f32.mrf.mxu0 }
0x1072   :  { %v2975_v34 = vmul.f32 0.044715, %v2969_v32  ;;  %v2964_v35 = vadd.f32 %v6506_v30, %v2963_v33  ;;  %v2973_v56 = vmul.f32 0.5, %v2969_v32  ;;  %v6513_v30 = vld [vmem:[%s8880_s3 + $0x1] ss:$0 sm:$0xff] }
0x1074   :  { %v2977_v36 = vmul.f32 %v2975_v34, %v2969_v32  ;;  %v2974_v37 = vmul.f32 0.044715, %v2964_v35  ;;  %v2972_v54 = vmul.f32 0.5, %v2964_v35  ;;  %v6524_v34 = vld [vmem:[%s8878_s2 + $0x90] sm:$0xff] }
0x1076   :  { %v2979_v41 = vmul.f32 %v2977_v36, %v2969_v32  ;;  %v2976_v45 = vmul.f32 %v2974_v37, %v2964_v35  ;;  %v6522_v36 = vld [vmem:[%s8878_s2 + $0x80] sm:$0xff]  ;;  %v6533_v37 = vld [vmem:[%s8881_s29 + $0x98] sm:$0xff] }
0x1078   :  { %v2981_v46 = vadd.f32 %v2979_v41, %v2969_v32  ;;  %v2978_v39 = vmul.f32 %v2976_v45, %v2964_v35  ;;  %v6532_v41 = vld [vmem:[%s8881_s29 + $0x90] sm:$0xff]  ;;  %v6531_v45 = vld [vmem:[%s8881_s29 + $0x88] sm:$0xff] }
0x107a   :  { %v2980_v5 = vadd.f32 %v2978_v39, %v2964_v35  ;;  %v2983_v47 = vmul.f32 0.7978846, %v2981_v46  ;;  %v6523_v35 = vld [vmem:[%s8878_s2 + $0x88] sm:$0xff]  ;;  %v6530_v46 = vld [vmem:[%s8881_s29 + $0x80] sm:$0xff] }
0x107c   :  { %v2982_v4 = vmul.f32 0.7978846, %v2980_v5  ;;  %7587 = vtanh.f32 %v2983_v47  ;;  %v6527_v47 = vld [vmem:[%s8882_s27 + $0x4] ss:$0 sm:$0xff] }
0x107e   :  { %7589 = vtanh.f32 %v2982_v4 }
0x1089   :  { %v7588_v48 = vpop.eup %7587 }
0x108a   :  { %v2987_v51 = vadd.f32 1.0, %v7588_v48  ;;  %v6519_v48 = vld [vmem:[%s8883_s0 + $0x4] ss:$0 sm:$0xff] }
0x108b   :  { %v7590_v49 = vpop.eup %7589 }
0x108c   :  { %v2986_v55 = vadd.f32 1.0, %v7590_v49  ;;  %v2989_v57 = vmul.f32 %v2987_v51, %v2973_v56 }
0x108e   :  { %v2988_v42 = vmul.f32 %v2986_v55, %v2972_v54 }
0x1090   :  { %7245 = vmatprep.mubr.f32.mxu1 %v2988_v42  ;;  %v6535_v42 = vld [vmem:[%s8842_s9 + $0x4] ss:$0 sm:$0xff] }
0x1091   :  { %7246 = vmatmul.mubr.f32.vlgmr.msra.gmra.mxu1 %v2989_v57 }
0x1092   :  { %7288 = vmatprep.mubr.msk.f32.mxu1 %vm7670_vm1, %v7669_v50 }
0x1151   :  { %v7247_v58 = vpop.f32.mrf.mxu1 }
0x1152   :  { %v3082_v60 = vadd.f32 %v7247_v58, %v8203_v40 }
0x1153   :  { %v3072_v61 = vpop.f32.mrf.mxu1 }
0x1154   :  { %v8298_v62 = vadd.f32 %v6509_v59, %v3082_v60  ;;  %v3081_v63 = vadd.f32 %v3072_v61, %v8206_v44 }
0x1156   :  { %v8301_v0 = vadd.f32 %v6509_v59, %v3081_v63  ;;  %v3099_v38 = vsel %vm93_vm0, %v8298_v62, 0.0  ;;  %v3105_v52 = vmul.f32 %v8298_v62, %v8298_v62 }
0x1157   :  { %3100 = vadd.xlane.f32.xlu1 %v3099_v38 }
0x1158   :  { %v3096_v43 = vsel %vm93_vm0, %v8301_v0, 0.0  ;;  %v3104_v40 = vmul.f32 %v8301_v0, %v8301_v0  ;;  %v3109_v53 = vsel %vm93_vm0, %v3105_v52, 0.0 }
0x1159   :  { %3097 = vadd.xlane.f32.xlu0 %v3096_v43 }
0x115a   :  { %v3106_v44 = vsel %vm93_vm0, %v3104_v40, 0.0 }
0x115b   :  { %3110 = vadd.xlane.f32.xlu1 %v3109_v53 }
0x115d   :  { %3107 = vadd.xlane.f32.xlu0 %v3106_v44 }
0x11e0   :  { %v3101_v8 = vpop.xlane.xlu1 %3100 }
0x11e1   :  { %v3103_v9 = vmul.f32 0.03125, %v3101_v8 }
0x11e2   :  { %v3098_v10 = vpop.xlane.xlu0 %3097 }
0x11e3   :  { %v3102_v11 = vmul.f32 0.03125, %v3098_v10  ;;  %v3115_v13 = vmul.f32 %v3103_v9, %v3103_v9  ;;  %v3119_v22 = vsub.f32 %v8298_v62, %v3103_v9 }
0x11e4   :  { %v3111_v12 = vpop.xlane.xlu1 %3110 }
0x11e5   :  { %v3113_v14 = vmul.f32 0.03125, %v3111_v12  ;;  %v3114_v16 = vmul.f32 %v3102_v11, %v3102_v11  ;;  %v3118_v24 = vsub.f32 %v8301_v0, %v3102_v11 }
0x11e6   :  { %v3108_v15 = vpop.xlane.xlu0 %3107 }
0x11e7   :  { %v3117_v17 = vsub.f32 %v3113_v14, %v3115_v13  ;;  %v3112_v18 = vmul.f32 0.03125, %v3108_v15  ;;  %v6556_v13 = vld [vmem:[%s8878_s2 + $0xb8] sm:$0xff] }
0x11e8   :  { %v6548_v14 = vld [vmem:[%s8877_s25 + $0xb8] sm:$0xff] }
0x11e9   :  { %v3121_v19 = vadd.f32 1e-05, %v3117_v17  ;;  %v3116_v20 = vsub.f32 %v3112_v18, %v3114_v16 }
0x11eb   :  { %7591 = vrsqrt.f32 %v3121_v19  ;;  %v3120_v21 = vadd.f32 1e-05, %v3116_v20  ;;  %v6555_v20 = vld [vmem:[%s8878_s2 + $0xb0] sm:$0xff] }
0x11ed   :  { %7593 = vrsqrt.f32 %v3120_v21 }
0x11f8   :  { %v7592_v23 = vpop.eup %7591 }
0x11f9   :  { %v3125_v26 = vmul.f32 %v7592_v23, %v3119_v22  ;;  %v6547_v22 = vld [vmem:[%s8877_s25 + $0xb0] sm:$0xff]  ;;  %v6554_v23 = vld [vmem:[%s8878_s2 + $0xa8] sm:$0xff] }
0x11fa   :  { %v7594_v27 = vpop.eup %7593 }
0x11fb   :  { %v3124_v28 = vmul.f32 %v7594_v27, %v3118_v24  ;;  %v3133_v29 = vmul.f32 %v6512_v25, %v3125_v26  ;;  %v6546_v24 = vld [vmem:[%s8877_s25 + $0xa8] sm:$0xff]  ;;  %v6545_v26 = vld [vmem:[%s8877_s25 + $0xa0] sm:$0xff]  ;;  %v6564_v27 = vld [vmem:[%s8881_s29 + $0xb8] sm:$0xff] }
0x11fd   :  { %v3132_v31 = vmul.f32 %v6512_v25, %v3124_v28  ;;  %v8338_v33 = vadd.f32 %v6513_v30, %v3133_v29  ;;  %v6553_v25 = vld [vmem:[%s8878_s2 + $0xa0] sm:$0xff]  ;;  %v6563_v28 = vld [vmem:[%s8881_s29 + $0xb0] sm:$0xff]  ;;  %v6562_v29 = vld [vmem:[%s8881_s29 + $0xa8] sm:$0xff] }
0x11ff   :  { %v8336_v32 = vadd.f32 %v6513_v30, %v3132_v31  ;;  %v6561_v30 = vld [vmem:[%s8881_s29 + $0xa0] sm:$0xff] }
0x1201   :  { %7256 = vmatprep.mubr.msk.f32.mxu0 %vm93_vm0, %v8336_v32 }
0x1202   :  { %7257 = vmatmul.mubr.msk.f32.vlgmr.msra.gmra.mxu0 %vm93_vm0, %v8338_v33 }
0x1203   :  { %7260 = vmatpush3.msra.mxu0 %v6525_v7  ;;  %7267 = vmatprep.mubr.msk.f32.mxu0 %vm93_vm0, %v8336_v32 }
0x1204   :  { %7261 = vmatprep.subr.mxu0 %v6524_v34 }
0x1205   :  { %7262 = vmatpush3.msra.mxu0 %v6524_v34 }
0x1206   :  { %7263 = vmatprep.subr.mxu0 %v6523_v35 }
0x1207   :  { %7264 = vmatpush3.msra.mxu0 %v6523_v35 }
0x1208   :  { %7265 = vmatprep.subr.mxu0 %v6522_v36 }
0x1209   :  { %7266 = vmatpush3.msra.mxu0 %v6522_v36 }
0x120a   :  { %7268 = vmatmul.mubr.msk.f32.vlgmr.msra.gmra.mxu0 %vm93_vm0, %v8338_v33  ;;  %7270 = vmatprep.subr.mxu0 %v6533_v37 }
0x120b   :  { %7271 = vmatpush3.msra.mxu0 %v6533_v37  ;;  %7278 = vmatprep.mubr.msk.f32.mxu0 %vm93_vm0, %v8336_v32 }
0x120c   :  { %7272 = vmatprep.subr.mxu0 %v6532_v41 }
0x120d   :  { %7273 = vmatpush3.msra.mxu0 %v6532_v41 }
0x120e   :  { %7274 = vmatprep.subr.mxu0 %v6531_v45 }
0x120f   :  { %7275 = vmatpush3.msra.mxu0 %v6531_v45  ;;  %v6558_v45 = vld [vmem:[%s8882_s27 + $0x5] ss:$0 sm:$0xff] }
0x1210   :  { %7276 = vmatprep.subr.mxu0 %v6530_v46 }
0x1211   :  { %7277 = vmatpush3.msra.mxu0 %v6530_v46 }
0x1212   :  { %7279 = vmatmul.mubr.msk.f32.vlgmr.msra.gmra.mxu0 %vm93_vm0, %v8338_v33  ;;  %7281 = vmatprep.subr.mxu0 %v7669_v50 }
0x1213   :  { %7283 = vmatprep.mubr.msk.f32.mxu0 %vm7670_vm1, %v7669_v50 }
0x12c2   :  { %v7258_v39 = vpop.f32.mrf.mxu0 }
0x12c3   :  { %v3233_v55 = vadd.f32 %v7258_v39, %v6519_v48  ;;  %v6550_v39 = vld [vmem:[%s8883_s0 + $0x5] ss:$0 sm:$0xff] }
0x12c4   :  { %v3227_v5 = vpop.f32.mrf.mxu0 }
0x12c5   :  { %v3228_v56 = vadd.f32 %v6519_v48, %v3227_v5 }
0x12ca   :  { %v7269_v4 = vpop.f32.mrf.mxu0 }
0x12cb   :  { %v3321_v49 = vadd.f32 %v7269_v4, %v6527_v47 }
0x12cc   :  { %v3315_v51 = vpop.f32.mrf.mxu0 }
0x12cd   :  { %v3316_v54 = vadd.f32 %v6527_v47, %v3315_v51  ;;  %7287 = vmatpush3.xpose.msk.msra.mxu1 %vm405_vm2, %v3321_v49  ;;  %v6566_v49 = vld [vmem:[%s8842_s9 + $0x5] ss:$0 sm:$0xff] }
0x12ce   :  { %7296 = vmatprep.subr.mxu1 %v7669_v50 }
0x12cf   :  { %7282 = vmatpush3.xpose.msk.msra.mxu0 %vm405_vm2, %v3316_v54 }
0x12d0   :  { %7289 = vmatmul.mubr.msk.f32.vlgmr.msra.gmra.mxu1 %vm405_vm2, %v3233_v55  ;;  %7291 = vmatprep.subr.mxu0 %v7669_v50 }
0x12d1   :  { %7298 = vmatprep.mubr.msk.f32.mxu1 %vm7670_vm1, %v7669_v50 }
0x12d2   :  { %v7280_v57 = vpop.f32.mrf.mxu0  ;;  %7284 = vmatmul.mubr.msk.f32.vlgmr.msra.gmra.mxu0 %vm405_vm2, %v3228_v56 }
0x12d3   :  { %v3409_v58 = vadd.f32 %v7280_v57, %v6535_v42  ;;  %7293 = vmatprep.mubr.msk.f32.mxu0 %vm7670_vm1, %v7669_v50 }
0x12d4   :  { %v3403_v59 = vpop.f32.mrf.mxu0 }
0x12d5   :  { %v3404_v60 = vadd.f32 %v6535_v42, %v3403_v59  ;;  %7297 = vmatpush3.msra.mxu1 %v3409_v58 }
0x12d6   :  { %7312 = vmatprep.subr.mxu1 %v6556_v13 }
0x12d7   :  { %7292 = vmatpush3.msra.mxu0 %v3404_v60 }
0x12d8   :  { %7301 = vmatprep.subr.mxu0 %v6548_v14 }
0x1390   :  { %v3560_v61 = vpop.f32.mrf.mxu1 }
0x1391   :  { %v3565_v63 = vmul.f32 0.35355338, %v3560_v61 }
0x1392   :  { %v3484_v38 = vpop.f32.mrf.mxu0  ;;  %v7290_v52 = vpop.f32.mrf.mxu1 }
0x1393   :  { %v3564_v43 = vmul.f32 0.35355338, %v3484_v38  ;;  %v3569_v40 = vsel %vm405_vm2, %v3565_v63, -inf }
0x1394   :  { %3570 = vmax.xlane.f32.xlu0 %v3569_v40  ;;  %v7285_v53 = vpop.f32.mrf.mxu0 }
0x1395   :  { %v3566_v44 = vsel %vm405_vm2, %v3564_v43, -inf }
0x1396   :  { %3567 = vmax.xlane.f32.xlu1 %v3566_v44 }
0x141d   :  { %v3571_v1 = vpop.xlane.xlu0 %3570 }
0x141e   :  { %v3573_v2 = vsub.f32 %v3565_v63, %v3571_v1 }
0x141f   :  { %v3568_v3 = vpop.xlane.xlu1 %3567 }
0x1420   :  { %v3576_v6 = vmul.f32 1.442695, %v3573_v2  ;;  %v3572_v7 = vsub.f32 %v3564_v43, %v3568_v3 }
0x1422   :  { %7595 = vpow2.f32 %v3576_v6  ;;  %v3574_v8 = vmul.f32 1.442695, %v3572_v7 }
0x1424   :  { %7597 = vpow2.f32 %v3574_v8 }
0x142f   :  { %v7596_v9 = vpop.eup %7595 }
0x1430   :  { %v3581_v10 = vsel %vm405_vm2, %v7596_v9, 0.0 }
0x1431   :  { %v7598_v11 = vpop.eup %7597  ;;  %3582 = vadd.xlane.f32.xlu0 %v3581_v10 }
0x1432   :  { %v3578_v12 = vsel %vm405_vm2, %v7598_v11, 0.0 }
0x1433   :  { %3579 = vadd.xlane.f32.xlu1 %v3578_v12 }
0x14ba   :  { %v3583_v15 = vpop.xlane.xlu0 %3582 }
0x14bb   :  { %7599 = vrcp.f32 %v3583_v15 }
0x14bc   :  { %v3580_v16 = vpop.xlane.xlu1 %3579 }
0x14bd   :  { %7601 = vrcp.f32 %v3580_v16  ;;  %v6591_v16 = vld [vmem:[%s8878_s2 + $0xd8] sm:$0xff] }
0x14c8   :  { %v7600_v17 = vpop.eup %7599 }
0x14c9   :  { %v3587_v18 = vmul.f32 %v7600_v17, %v7596_v9  ;;  %v6544_v9 = vld [vmem:[%s8843_s10 + $0x20] sm:$0xff]  ;;  %v6590_v17 = vld [vmem:[%s8878_s2 + $0xd0] sm:$0xff] }
0x14ca   :  { %v7602_v19 = vpop.eup %7601 }
0x14cb   :  { %7299 = vmatmul.mubr.msk.f32.vlgmr.msra.gmra.mxu1 %vm405_vm2, %v3587_v18  ;;  %v3586_v21 = vmul.f32 %v7602_v19, %v7598_v11  ;;  %v6589_v18 = vld [vmem:[%s8878_s2 + $0xc8] sm:$0xff]  ;;  %v6588_v19 = vld [vmem:[%s8878_s2 + $0xc0] sm:$0xff] }
0x14cc   :  { %7313 = vmatpush3.msra.mxu1 %v6556_v13  ;;  %7320 = vmatprep.mubr.msk.f32.mxu1 %vm93_vm0, %v8336_v32 }
0x14cd   :  { %7314 = vmatprep.subr.mxu1 %v6555_v20  ;;  %7294 = vmatmul.mubr.msk.f32.vlgmr.msra.gmra.mxu0 %vm405_vm2, %v3586_v21  ;;  %v6583_v21 = vld [vmem:[%s8877_s25 + $0xd8] sm:$0xff] }
0x14ce   :  { %7302 = vmatpush3.msra.mxu0 %v6548_v14  ;;  %7315 = vmatpush3.msra.mxu1 %v6555_v20  ;;  %v6575_v20 = vld [vmem:[%s8843_s10 + $0x28] sm:$0xff] }
0x14cf   :  { %7303 = vmatprep.subr.mxu0 %v6547_v22  ;;  %7309 = vmatprep.mubr.msk.f32.mxu0 %vm93_vm0, %v8336_v32 }
0x14d0   :  { %7316 = vmatprep.subr.mxu1 %v6554_v23  ;;  %7304 = vmatpush3.msra.mxu0 %v6547_v22 }
0x14d1   :  { %7317 = vmatpush3.msra.mxu1 %v6554_v23  ;;  %7305 = vmatprep.subr.mxu0 %v6546_v24 }
0x14d2   :  { %7318 = vmatprep.subr.mxu1 %v6553_v25  ;;  %7306 = vmatpush3.msra.mxu0 %v6546_v24 }
0x14d3   :  { %7319 = vmatpush3.msra.mxu1 %v6553_v25  ;;  %7307 = vmatprep.subr.mxu0 %v6545_v26  ;;  %v6582_v25 = vld [vmem:[%s8877_s25 + $0xd0] sm:$0xff] }
0x14d4   :  { %7321 = vmatmul.mubr.msk.f32.vlgmr.msra.gmra.mxu1 %vm93_vm0, %v8338_v33  ;;  %7308 = vmatpush3.msra.mxu0 %v6545_v26 }
0x14d5   :  { %7310 = vmatmul.mubr.msk.f32.vlgmr.msra.gmra.mxu0 %vm93_vm0, %v8338_v33  ;;  %7323 = vmatprep.subr.mxu0 %v6564_v27 }
0x14d6   :  { %7324 = vmatpush3.msra.mxu0 %v6564_v27  ;;  %7331 = vmatprep.mubr.msk.f32.mxu0 %vm93_vm0, %v8336_v32  ;;  %v6581_v27 = vld [vmem:[%s8877_s25 + $0xc8] sm:$0xff] }
0x14d7   :  { %7325 = vmatprep.subr.mxu0 %v6563_v28  ;;  %7334 = vmatprep.subr.mxu1 %v7669_v50 }
0x14d8   :  { %7326 = vmatpush3.msra.mxu0 %v6563_v28  ;;  %7336 = vmatprep.mubr.msk.f32.mxu1 %vm7670_vm1, %v7669_v50  ;;  %v6580_v28 = vld [vmem:[%s8877_s25 + $0xc0] sm:$0xff] }
0x14d9   :  { %7327 = vmatprep.subr.mxu0 %v6562_v29 }
0x14da   :  { %7328 = vmatpush3.msra.mxu0 %v6562_v29 }
0x14db   :  { %7329 = vmatprep.subr.mxu0 %v6561_v30 }
0x14dc   :  { %7330 = vmatpush3.msra.mxu0 %v6561_v30  ;;  %v6599_v30 = vld [vmem:[%s8881_s29 + $0xd8] sm:$0xff] }
0x14dd   :  { %7332 = vmatmul.mubr.msk.f32.vlgmr.msra.gmra.mxu0 %vm93_vm0, %v8338_v33  ;;  %7344 = vmatprep.subr.mxu0 %v7669_v50 }
0x14de   :  { %7346 = vmatprep.mubr.msk.f32.mxu0 %vm7670_vm1, %v7669_v50 }
0x158b   :  { %v8455_v31 = vpop.f32.mrf.mxu1 }
0x158d   :  { %v8457_v34 = vpop.f32.mrf.mxu0  ;;  %v7300_v35 = vpop.f32.mrf.mxu1 }
0x158e   :  { %v6593_v35 = vld [vmem:[%s8882_s27 + $0x6] ss:$0 sm:$0xff] }
0x158f   :  { %v7295_v36 = vpop.f32.mrf.mxu0 }
0x1590   :  { %v6597_v36 = vld [vmem:[%s8881_s29 + $0xc8] sm:$0xff] }
0x1594   :  { %v7322_v37 = vpop.f32.mrf.mxu1 }
0x1595   :  { %v7311_v41 = vpop.f32.mrf.mxu0  ;;  %v3909_v48 = vadd.f32 %v7322_v37, %v6558_v45 }
0x1596   :  { %v3903_v46 = vpop.f32.mrf.mxu1  ;;  %v3821_v54 = vadd.f32 %v7311_v41, %v6550_v39  ;;  %v6596_v41 = vld [vmem:[%s8881_s29 + $0xc0] sm:$0xff] }
0x1597   :  { %v3904_v5 = vadd.f32 %v6558_v45, %v3903_v46  ;;  %v3815_v47 = vpop.f32.mrf.mxu0 }
0x1598   :  { %v3816_v4 = vadd.f32 %v6550_v39, %v3815_v47 }
0x1599   :  { %7335 = vmatpush3.xpose.msk.msra.mxu1 %vm405_vm2, %v3904_v5 }
0x159a   :  { %7339 = vmatprep.subr.mxu1 %v7669_v50 }
0x159c   :  { %7337 = vmatmul.mubr.msk.f32.vlgmr.msra.gmra.mxu1 %vm405_vm2, %v3816_v4 }
0x159d   :  { %7340 = vmatpush3.xpose.msk.msra.mxu1 %vm405_vm2, %v3909_v48  ;;  %v7333_v51 = vpop.f32.mrf.mxu0  ;;  %7341 = vmatprep.mubr.msk.f32.mxu1 %vm7670_vm1, %v7669_v50  ;;  %v6585_v48 = vld [vmem:[%s8883_s0 + $0x6] ss:$0 sm:$0xff] }
0x159e   :  { %v3997_v55 = vadd.f32 %v7333_v51, %v6566_v49  ;;  %7349 = vmatprep.subr.mxu1 %v7669_v50 }
0x159f   :  { %v3991_v56 = vpop.f32.mrf.mxu0 }
0x15a0   :  { %v3992_v42 = vadd.f32 %v6566_v49, %v3991_v56  ;;  %7342 = vmatmul.mubr.msk.f32.vlgmr.msra.gmra.mxu1 %vm405_vm2, %v3821_v54  ;;  %v6601_v54 = vld [vmem:[%s8842_s9 + $0x6] ss:$0 sm:$0xff] }
0x15a1   :  { %7350 = vmatpush3.msra.mxu1 %v3997_v55  ;;  %7351 = vmatprep.mubr.msk.f32.mxu1 %vm7670_vm1, %v7669_v50 }
0x15a2   :  { %7345 = vmatpush3.msra.mxu0 %v3992_v42  ;;  %7359 = vmatprep.subr.mxu1 %v6544_v9 }
0x15a3   :  { %7354 = vmatprep.subr.mxu0 %v6575_v20 }
0x165c   :  { %v4072_v57 = vpop.f32.mrf.mxu1 }
0x165d   :  { %v4152_v58 = vmul.f32 0.35355338, %v4072_v57 }
0x165e   :  { %v7338_v59 = vpop.f32.mrf.mxu1 }
0x165f   :  { %v4154_v60 = vsel %vm405_vm2, %v4152_v58, -inf }
0x1660   :  { %4155 = vmax.xlane.f32.xlu0 %v4154_v60  ;;  %v4148_v61 = vpop.f32.mrf.mxu1 }
0x1661   :  { %v4153_v63 = vmul.f32 0.35355338, %v4148_v61 }
0x1662   :  { %v7343_v38 = vpop.f32.mrf.mxu1 }
0x1663   :  { %v4157_v52 = vsel %vm405_vm2, %v4153_v63, -inf }
0x1664   :  { %4158 = vmax.xlane.f32.xlu1 %v4157_v52 }
0x16e9   :  { %v4156_v43 = vpop.xlane.xlu0 %4155 }
0x16ea   :  { %v4160_v40 = vsub.f32 %v4152_v58, %v4156_v43 }
0x16ec   :  { %v4162_v53 = vmul.f32 1.442695, %v4160_v40 }
0x16ed   :  { %v4159_v44 = vpop.xlane.xlu1 %4158 }
0x16ee   :  { %7603 = vpow2.f32 %v4162_v53  ;;  %v4161_v1 = vsub.f32 %v4153_v63, %v4159_v44 }
0x16f0   :  { %v4164_v2 = vmul.f32 1.442695, %v4161_v1 }
0x16f2   :  { %7605 = vpow2.f32 %v4164_v2 }
0x16fb   :  { %v7604_v3 = vpop.eup %7603 }
0x16fc   :  { %v4166_v6 = vsel %vm405_vm2, %v7604_v3, 0.0 }
0x16fd   :  { %4167 = vadd.xlane.f32.xlu0 %v4166_v6 }
0x16ff   :  { %v7606_v7 = vpop.eup %7605 }
0x1700   :  { %v4169_v8 = vsel %vm405_vm2, %v7606_v7, 0.0 }
0x1701   :  { %4170 = vadd.xlane.f32.xlu1 %v4169_v8 }
0x1786   :  { %v4168_v10 = vpop.xlane.xlu0 %4167 }
0x1787   :  { %7607 = vrcp.f32 %v4168_v10 }
0x178a   :  { %v4171_v11 = vpop.xlane.xlu1 %4170 }
0x178b   :  { %7609 = vrcp.f32 %v4171_v11  ;;  %v6616_v11 = vld [vmem:[%s8877_s25 + $0xf8] sm:$0xff] }
0x1794   :  { %v7608_v12 = vpop.eup %7607 }
0x1795   :  { %v4174_v13 = vmul.f32 %v7608_v12, %v7604_v3 }
0x1797   :  { %7347 = vmatmul.mubr.msk.f32.vlgmr.msra.gmra.mxu0 %vm405_vm2, %v4174_v13 }
0x1798   :  { %v7610_v14 = vpop.eup %7609  ;;  %7355 = vmatpush3.msra.mxu0 %v6575_v20  ;;  %v6613_v20 = vld [vmem:[%s8877_s25 + $0xe0] sm:$0xff] }
0x1799   :  { %v4175_v15 = vmul.f32 %v7610_v14, %v7606_v7  ;;  %7364 = vmatprep.subr.mxu0 %v6583_v21 }
0x179b   :  { %7352 = vmatmul.mubr.msk.f32.vlgmr.msra.gmra.mxu1 %vm405_vm2, %v4175_v15 }
0x179c   :  { %7361 = vmatprep.mubr.msk.f32.mxu1 %vm405_vm2, %v8457_v34  ;;  %7360 = vmatpush3.msra.mxu1 %v6544_v9 }
0x179d   :  { %7375 = vmatprep.subr.mxu1 %v6591_v16 }
0x179f   :  { %7362 = vmatmul.mubr.msk.f32.vlgmr.msra.gmra.mxu1 %vm405_vm2, %v8455_v31  ;;  %v6598_v31 = vld [vmem:[%s8881_s29 + $0xd0] sm:$0xff] }
0x17a0   :  { %7376 = vmatpush3.msra.mxu1 %v6591_v16  ;;  %7383 = vmatprep.mubr.msk.f32.mxu1 %vm93_vm0, %v8336_v32 }
0x17a1   :  { %7377 = vmatprep.subr.mxu1 %v6590_v17 }
0x17a2   :  { %7378 = vmatpush3.msra.mxu1 %v6590_v17 }
0x17a3   :  { %7379 = vmatprep.subr.mxu1 %v6589_v18 }
0x17a4   :  { %7380 = vmatpush3.msra.mxu1 %v6589_v18  ;;  %v6615_v18 = vld [vmem:[%s8877_s25 + $0xf0] sm:$0xff] }
0x17a5   :  { %7381 = vmatprep.subr.mxu1 %v6588_v19 }
0x17a6   :  { %7382 = vmatpush3.msra.mxu1 %v6588_v19  ;;  %v6614_v19 = vld [vmem:[%s8877_s25 + $0xe8] sm:$0xff] }
0x17a7   :  { %7384 = vmatmul.mubr.msk.f32.vlgmr.msra.gmra.mxu1 %vm93_vm0, %v8338_v33  ;;  %7397 = vmatprep.subr.mxu1 %v7669_v50 }
0x17a8   :  { %7399 = vmatprep.mubr.msk.f32.mxu1 %vm7670_vm1, %v7669_v50 }
0x1857   :  { %v4245_v22 = vpop.f32.mrf.mxu0 }
0x1858   :  { %7356 = vmatprep.mubr.msk.f32.mxu0 %vm405_vm2, %v4245_v22  ;;  %v6631_v22 = vld [vmem:[%s8881_s29 + $0xf0] sm:$0xff] }
0x1859   :  { %v7348_v23 = vpop.f32.mrf.mxu0 }
0x185a   :  { %v6630_v23 = vld [vmem:[%s8881_s29 + $0xe8] sm:$0xff] }
0x185b   :  { %v4318_v24 = vpop.f32.mrf.mxu1 }
0x185c   :  { %7357 = vmatmul.mubr.msk.f32.vlgmr.msra.gmra.mxu0 %vm405_vm2, %v4318_v24  ;;  %v6629_v24 = vld [vmem:[%s8881_s29 + $0xe0] sm:$0xff] }
0x185d   :  { %7365 = vmatpush3.msra.mxu0 %v6583_v21  ;;  %v7353_v26 = vpop.f32.mrf.mxu1  ;;  %7372 = vmatprep.mubr.msk.f32.mxu0 %vm93_vm0, %v8336_v32  ;;  %v6632_v21 = vld [vmem:[%s8881_s29 + $0xf8] sm:$0xff] }
0x185e   :  { %7366 = vmatprep.subr.mxu0 %v6582_v25  ;;  %v6624_v26 = vld [vmem:[%s8878_s2 + $0xf8] sm:$0xff] }
0x185f   :  { %7367 = vmatpush3.msra.mxu0 %v6582_v25  ;;  %v8529_v29 = vpop.f32.mrf.mxu1  ;;  %v6610_v25 = vld [vmem:[%s8843_s10 + $0x30] sm:$0xff] }
0x1860   :  { %7368 = vmatprep.subr.mxu0 %v6581_v27 }
0x1861   :  { %7369 = vmatpush3.msra.mxu0 %v6581_v27  ;;  %v8539_v34 = vpop.f32.mrf.mxu1 }
0x1862   :  { %7370 = vmatprep.subr.mxu0 %v6580_v28 }
0x1863   :  { %7371 = vmatpush3.msra.mxu0 %v6580_v28 }
0x1864   :  { %7373 = vmatmul.mubr.msk.f32.vlgmr.msra.gmra.mxu0 %vm93_vm0, %v8338_v33  ;;  %7386 = vmatprep.subr.mxu0 %v6599_v30 }
0x1865   :  { %7387 = vmatpush3.msra.mxu0 %v6599_v30  ;;  %7394 = vmatprep.mubr.msk.f32.mxu0 %vm93_vm0, %v8336_v32 }
0x1866   :  { %7388 = vmatprep.subr.mxu0 %v6598_v31 }
0x1867   :  { %v7385_v37 = vpop.f32.mrf.mxu1  ;;  %7389 = vmatpush3.msra.mxu0 %v6598_v31  ;;  %v6623_v31 = vld [vmem:[%s8878_s2 + $0xf0] sm:$0xff] }
0x1868   :  { %v4659_v45 = vadd.f32 %v7385_v37, %v6593_v35  ;;  %7390 = vmatprep.subr.mxu0 %v6597_v36  ;;  %v6621_v37 = vld [vmem:[%s8878_s2 + $0xe0] sm:$0xff] }
0x1869   :  { %v4653_v46 = vpop.f32.mrf.mxu1  ;;  %7391 = vmatpush3.msra.mxu0 %v6597_v36  ;;  %v6622_v36 = vld [vmem:[%s8878_s2 + $0xe8] sm:$0xff] }
0x186a   :  { %v4654_v39 = vadd.f32 %v6593_v35, %v4653_v46  ;;  %7392 = vmatprep.subr.mxu0 %v6596_v41 }
0x186b   :  { %7393 = vmatpush3.msra.mxu0 %v6596_v41 }
0x186c   :  { %7395 = vmatmul.mubr.msk.f32.vlgmr.msra.gmra.mxu0 %vm93_vm0, %v8338_v33  ;;  %7398 = vmatpush3.xpose.msk.msra.mxu1 %vm405_vm2, %v4654_v39 }
0x186d   :  { %7402 = vmatprep.subr.mxu1 %v7669_v50  ;;  %7407 = vmatprep.subr.mxu0 %v7669_v50 }
0x186e   :  { %7409 = vmatprep.mubr.msk.f32.mxu0 %vm7670_vm1, %v7669_v50 }
0x191c   :  { %v8559_v5 = vpop.f32.mrf.mxu0 }
0x191e   :  { %v8561_v47 = vpop.f32.mrf.mxu0 }
0x1924   :  { %v7374_v4 = vpop.f32.mrf.mxu0 }
0x1925   :  { %v4571_v55 = vadd.f32 %v7374_v4, %v6585_v48 }
0x1926   :  { %v4565_v49 = vpop.f32.mrf.mxu0 }
0x1927   :  { %v4566_v51 = vadd.f32 %v6585_v48, %v4565_v49  ;;  %v4483_v49 = vadd.f32 %v8529_v29, %v8559_v5  ;;  %v6618_v29 = vld [vmem:[%s8883_s0 + $0x7] ss:$0 sm:$0xff] }
0x1929   :  { %7400 = vmatmul.mubr.msk.f32.vlgmr.msra.gmra.mxu1 %vm405_vm2, %v4566_v51  ;;  %v4478_v51 = vadd.f32 %v8539_v34, %v8561_v47 }
0x192a   :  { %7403 = vmatpush3.xpose.msk.msra.mxu1 %vm405_vm2, %v4659_v45  ;;  %7404 = vmatprep.mubr.msk.f32.mxu1 %vm7670_vm1, %v7669_v50  ;;  %v6634_v45 = vld [vmem:[%s8842_s9 + $0x7] ss:$0 sm:$0xff] }
0x192b   :  { %7412 = vmatprep.subr.mxu1 %v7669_v50 }
0x192c   :  { %v7396_v56 = vpop.f32.mrf.mxu0 }
0x192d   :  { %v4747_v42 = vadd.f32 %v7396_v56, %v6601_v54  ;;  %7405 = vmatmul.mubr.msk.f32.vlgmr.msra.gmra.mxu1 %vm405_vm2, %v4571_v55 }
0x192e   :  { %v4741_v57 = vpop.f32.mrf.mxu0  ;;  %7414 = vmatprep.mubr.msk.f32.mxu1 %vm7670_vm1, %v7669_v50 }
0x192f   :  { %v4742_v58 = vadd.f32 %v6601_v54, %v4741_v57  ;;  %7413 = vmatpush3.msra.mxu1 %v4747_v42  ;;  %v6626_v57 = vld [vmem:[%s8882_s27 + $0x7] ss:$0 sm:$0xff] }
0x1930   :  { %7422 = vmatprep.subr.mxu1 %v6616_v11 }
0x1931   :  { %7408 = vmatpush3.msra.mxu0 %v4742_v58 }
0x1932   :  { %7417 = vmatprep.subr.mxu0 %v6610_v25 }
0x19e9   :  { %v4822_v59 = vpop.f32.mrf.mxu1 }
0x19ea   :  { %v4902_v60 = vmul.f32 0.35355338, %v4822_v59 }
0x19eb   :  { %v7401_v61 = vpop.f32.mrf.mxu1 }
0x19ec   :  { %v4904_v63 = vsel %vm405_vm2, %v4902_v60, -inf }
0x19ed   :  { %4905 = vmax.xlane.f32.xlu0 %v4904_v63  ;;  %v4898_v38 = vpop.f32.mrf.mxu1 }
0x19ee   :  { %v4903_v52 = vmul.f32 0.35355338, %v4898_v38 }
0x19ef   :  { %v7406_v43 = vpop.f32.mrf.mxu1 }
0x19f0   :  { %v4907_v40 = vsel %vm405_vm2, %v4903_v52, -inf }
0x19f1   :  { %4908 = vmax.xlane.f32.xlu1 %v4907_v40 }
0x1a76   :  { %v4906_v53 = vpop.xlane.xlu0 %4905 }
0x1a77   :  { %v4910_v44 = vsub.f32 %v4902_v60, %v4906_v53 }
0x1a79   :  { %v4912_v1 = vmul.f32 1.442695, %v4910_v44 }
0x1a7a   :  { %v4909_v2 = vpop.xlane.xlu1 %4908 }
0x1a7b   :  { %7611 = vpow2.f32 %v4912_v1  ;;  %v4911_v3 = vsub.f32 %v4903_v52, %v4909_v2 }
0x1a7d   :  { %v4914_v6 = vmul.f32 1.442695, %v4911_v3 }
0x1a7f   :  { %7613 = vpow2.f32 %v4914_v6 }
0x1a88   :  { %v7612_v7 = vpop.eup %7611 }
0x1a89   :  { %v4916_v8 = vsel %vm405_vm2, %v7612_v7, 0.0 }
0x1a8a   :  { %4917 = vadd.xlane.f32.xlu0 %v4916_v8 }
0x1a8c   :  { %v7614_v9 = vpop.eup %7613 }
0x1a8d   :  { %v4919_v10 = vsel %vm405_vm2, %v7614_v9, 0.0 }
0x1a8e   :  { %4920 = vadd.xlane.f32.xlu1 %v4919_v10 }
0x1b13   :  { %v4918_v12 = vpop.xlane.xlu0 %4917 }
0x1b14   :  { %7615 = vrcp.f32 %v4918_v12 }
0x1b17   :  { %v4921_v13 = vpop.xlane.xlu1 %4920 }
0x1b18   :  { %7617 = vrcp.f32 %v4921_v13 }
0x1b21   :  { %v7616_v14 = vpop.eup %7615 }
0x1b22   :  { %v4924_v15 = vmul.f32 %v7616_v14, %v7612_v7 }
0x1b24   :  { %7410 = vmatmul.mubr.msk.f32.vlgmr.msra.gmra.mxu0 %vm405_vm2, %v4924_v15 }
0x1b25   :  { %v7618_v16 = vpop.eup %7617  ;;  %7418 = vmatpush3.msra.mxu0 %v6610_v25  ;;  %v6647_v25 = vld [vmem:[%s8844_s11 + $0x1] ss:$0 sm:$0xff] }
0x1b26   :  { %v4925_v17 = vmul.f32 %v7618_v16, %v7614_v9  ;;  %7433 = vmatprep.subr.mxu0 %v6624_v26 }
0x1b28   :  { %7415 = vmatmul.mubr.msk.f32.vlgmr.msra.gmra.mxu1 %vm405_vm2, %v4925_v17 }
0x1b29   :  { %7423 = vmatpush3.msra.mxu1 %v6616_v11  ;;  %7430 = vmatprep.mubr.msk.f32.mxu1 %vm93_vm0, %v8336_v32 }
0x1b2a   :  { %7424 = vmatprep.subr.mxu1 %v6615_v18 }
0x1b2b   :  { %7425 = vmatpush3.msra.mxu1 %v6615_v18  ;;  %v6643_v18 = vld [vmem:[%s8843_s10 + $0x38] sm:$0xff] }
0x1b2c   :  { %7426 = vmatprep.subr.mxu1 %v6614_v19 }
0x1b2d   :  { %7427 = vmatpush3.msra.mxu1 %v6614_v19 }
0x1b2e   :  { %7428 = vmatprep.subr.mxu1 %v6613_v20 }
0x1b2f   :  { %7429 = vmatpush3.msra.mxu1 %v6613_v20 }
0x1b30   :  { %7431 = vmatmul.mubr.msk.f32.vlgmr.msra.gmra.mxu1 %vm93_vm0, %v8338_v33  ;;  %7444 = vmatprep.subr.mxu1 %v6632_v21 }
0x1b31   :  { %7445 = vmatpush3.msra.mxu1 %v6632_v21  ;;  %7452 = vmatprep.mubr.msk.f32.mxu1 %vm93_vm0, %v8336_v32 }
0x1b32   :  { %7446 = vmatprep.subr.mxu1 %v6631_v22 }
0x1b33   :  { %7447 = vmatpush3.msra.mxu1 %v6631_v22 }
0x1b34   :  { %7448 = vmatprep.subr.mxu1 %v6630_v23 }
0x1b35   :  { %7449 = vmatpush3.msra.mxu1 %v6630_v23 }
0x1b36   :  { %7450 = vmatprep.subr.mxu1 %v6629_v24 }
0x1b37   :  { %7451 = vmatpush3.msra.mxu1 %v6629_v24 }
0x1b38   :  { %7453 = vmatmul.mubr.msk.f32.vlgmr.msra.gmra.mxu1 %vm93_vm0, %v8338_v33  ;;  %7465 = vmatprep.subr.mxu1 %v7669_v50 }
0x1b39   :  { %7467 = vmatprep.mubr.msk.f32.mxu1 %vm7670_vm1, %v7669_v50 }
0x1be4   :  { %v4995_v27 = vpop.f32.mrf.mxu0 }
0x1be5   :  { %7419 = vmatprep.mubr.msk.f32.mxu0 %vm405_vm2, %v4995_v27 }
0x1be6   :  { %v7411_v28 = vpop.f32.mrf.mxu0 }
0x1be8   :  { %v5068_v30 = vpop.f32.mrf.mxu1 }
0x1be9   :  { %7420 = vmatmul.mubr.msk.f32.vlgmr.msra.gmra.mxu0 %vm405_vm2, %v5068_v30 }
0x1bea   :  { %7434 = vmatpush3.msra.mxu0 %v6624_v26  ;;  %v7416_v35 = vpop.f32.mrf.mxu1  ;;  %7441 = vmatprep.mubr.msk.f32.mxu0 %vm93_vm0, %v8336_v32 }
0x1beb   :  { %7435 = vmatprep.subr.mxu0 %v6623_v31 }
0x1bec   :  { %7436 = vmatpush3.msra.mxu0 %v6623_v31 }
0x1bed   :  { %7437 = vmatprep.subr.mxu0 %v6622_v36 }
0x1bee   :  { %7438 = vmatpush3.msra.mxu0 %v6622_v36 }
0x1bef   :  { %7439 = vmatprep.subr.mxu0 %v6621_v37 }
0x1bf0   :  { %7440 = vmatpush3.msra.mxu0 %v6621_v37  ;;  %v7432_v32 = vpop.f32.mrf.mxu1 }
0x1bf1   :  { %7442 = vmatmul.mubr.msk.f32.vlgmr.msra.gmra.mxu0 %vm93_vm0, %v8338_v33  ;;  %7455 = vmatprep.subr.mxu0 %v7669_v50  ;;  %v5242_v47 = vadd.f32 %v7432_v32, %v6618_v29 }
0x1bf2   :  { %7457 = vmatprep.mubr.msk.f32.mxu0 %vm7670_vm1, %v7669_v50  ;;  %v5236_v41 = vpop.f32.mrf.mxu1 }
0x1bf3   :  { %v5237_v5 = vadd.f32 %v6618_v29, %v5236_v41 }
0x1bf8   :  { %v7454_v46 = vpop.f32.mrf.mxu1 }
0x1bf9   :  { %v5418_v39 = vadd.f32 %v7454_v46, %v6634_v45  ;;  %v6654_v46 = vld [vmem:[%s8847_s14 + $0x30] sm:$0xff] }
0x1bfa   :  { %v5412_v4 = vpop.f32.mrf.mxu1 }
0x1bfb   :  { %v5413_v48 = vadd.f32 %v6634_v45, %v5412_v4  ;;  %v6655_v45 = vld [vmem:[%s8847_s14 + $0x38] sm:$0xff]  ;;  %v6652_v4 = vld [vmem:[%s8847_s14 + $0x20] sm:$0xff] }
0x1bfd   :  { %7466 = vmatpush3.msra.mxu1 %v5413_v48 }
0x1bfe   :  { %7475 = vmatprep.subr.mxu1 %v6643_v18 }
0x1ca9   :  { %v7421_v33 = vpop.f32.mrf.mxu0 }
0x1caa   :  { %v8649_v54 = vadd.f32 %v7421_v33, %v4483_v49 }
0x1cab   :  { %v5146_v55 = vpop.f32.mrf.mxu0 }
0x1cac   :  { %v8651_v56 = vadd.f32 %v5146_v55, %v4478_v51 }
0x1cb1   :  { %v7443_v42 = vpop.f32.mrf.mxu0 }
0x1cb2   :  { %v5330_v34 = vadd.f32 %v7443_v42, %v6626_v57 }
0x1cb3   :  { %v5324_v58 = vpop.f32.mrf.mxu0 }
0x1cb4   :  { %v5325_v59 = vadd.f32 %v6626_v57, %v5324_v58 }
0x1cb6   :  { %7456 = vmatpush3.xpose.msk.msra.mxu0 %vm405_vm2, %v5325_v59 }
0x1cb7   :  { %7460 = vmatprep.subr.mxu0 %v7669_v50 }
0x1cb9   :  { %7458 = vmatmul.mubr.msk.f32.vlgmr.msra.gmra.mxu0 %vm405_vm2, %v5237_v5 }
0x1cba   :  { %7461 = vmatpush3.xpose.msk.msra.mxu0 %vm405_vm2, %v5330_v34  ;;  %7462 = vmatprep.mubr.msk.f32.mxu0 %vm7670_vm1, %v7669_v50 }
0x1cbb   :  { %7470 = vmatprep.subr.mxu0 %v7669_v50 }
0x1cbd   :  { %7463 = vmatmul.mubr.msk.f32.vlgmr.msra.gmra.mxu0 %vm405_vm2, %v5242_v47 }
0x1cbe   :  { %7471 = vmatpush3.msra.mxu0 %v5418_v39  ;;  %7472 = vmatprep.mubr.msk.f32.mxu0 %vm7670_vm1, %v7669_v50  ;;  %v6653_v39 = vld [vmem:[%s8847_s14 + $0x28] sm:$0xff] }
0x1cbf   :  { %7480 = vmatprep.subr.mxu0 %v6655_v45 }
0x1d79   :  { %v5493_v60 = vpop.f32.mrf.mxu0 }
0x1d7a   :  { %v5573_v61 = vmul.f32 0.35355338, %v5493_v60 }
0x1d7b   :  { %v7459_v63 = vpop.f32.mrf.mxu0 }
0x1d7c   :  { %v5575_v38 = vsel %vm405_vm2, %v5573_v61, -inf  ;;  %v6650_v63 = vld [vmem:[%s8845_s12 + $0x1] ss:$0 sm:$0xff]  ;;  %s7673_s12 = smov [#allocation3]  }
0x1d7d   :  { %5576 = vmax.xlane.f32.xlu0 %v5575_v38  ;;  %v5569_v52 = vpop.f32.mrf.mxu0  ;;  %s6373_s9 = sshll.u32 %s7673_s12, 4  ;;  %s6374_s9 = int_to_ptr.vmem [resolvable:$true] %s6373_s9 }
0x1d7e   :  { %v5574_v43 = vmul.f32 0.35355338, %v5569_v52  ;;  %s7647_s21 = scalar_lea.vmem %s6374_s9, 32  ;;  %p7652_p1 = scmp.lt.s32.totalorder %s6374_s9, %s6374_s9 }
0x1d7f   :  { %v7464_v40 = vpop.f32.mrf.mxu0  ;;  %p7648_p0 = scmp.ne.s32.totalorder %s6374_s9, %s7647_s21  ;;  %p7653_p2 = scmp.lt.s32.totalorder %s7647_s21, %s7647_s21 }
0x1d80   :  { %v5578_v53 = vsel %vm405_vm2, %v5574_v43, -inf }
0x1d81   :  { %5579 = vmax.xlane.f32.xlu1 %v5578_v53  ;;  %v6651_v53 = vld [vmem:[%s8846_s13 + $0x1] ss:$0 sm:$0xff]  ;;  %p7654_p3 = por %p7653_p2, %p7652_p1 }
0x1d83   :  { %p7655_p4 = pnand %p7654_p3, %p7648_p0 }
0x1e06   :  { %v5577_v44 = vpop.xlane.xlu0 %5576 }
0x1e07   :  { %v5581_v1 = vsub.f32 %v5573_v61, %v5577_v44 }
0x1e09   :  { %v5583_v2 = vmul.f32 1.442695, %v5581_v1 }
0x1e0a   :  { %v5580_v3 = vpop.xlane.xlu1 %5579 }
0x1e0b   :  { %7619 = vpow2.f32 %v5583_v2  ;;  %v5582_v6 = vsub.f32 %v5574_v43, %v5580_v3  ;;  %v6675_v3 = vld [vmem:[%s8849_s16 + $0xf8] sm:$0xff] }
0x1e0d   :  { %v5585_v7 = vmul.f32 1.442695, %v5582_v6  ;;  %v6674_v6 = vld [vmem:[%s8849_s16 + $0xf0] sm:$0xff] }
0x1e0f   :  { %7621 = vpow2.f32 %v5585_v7  ;;  %v6673_v7 = vld [vmem:[%s8849_s16 + $0xe8] sm:$0xff] }
0x1e18   :  { %v7620_v8 = vpop.eup %7619 }
0x1e19   :  { %v5587_v9 = vsel %vm405_vm2, %v7620_v8, 0.0 }
0x1e1a   :  { %5588 = vadd.xlane.f32.xlu0 %v5587_v9  ;;  %v6671_v9 = vld [vmem:[%s8849_s16 + $0xd8] sm:$0xff] }
0x1e1c   :  { %v7622_v10 = vpop.eup %7621 }
0x1e1d   :  { %v5590_v11 = vsel %vm405_vm2, %v7622_v10, 0.0 }
0x1e1e   :  { %5591 = vadd.xlane.f32.xlu1 %v5590_v11  ;;  %v6669_v11 = vld [vmem:[%s8849_s16 + $0xc8] sm:$0xff] }
0x1ea3   :  { %v5589_v12 = vpop.xlane.xlu0 %5588 }
0x1ea4   :  { %7623 = vrcp.f32 %v5589_v12  ;;  %v6668_v12 = vld [vmem:[%s8849_s16 + $0xc0] sm:$0xff] }
0x1ea7   :  { %v5592_v13 = vpop.xlane.xlu1 %5591 }
0x1ea8   :  { %7625 = vrcp.f32 %v5592_v13  ;;  %v6667_v13 = vld [vmem:[%s8849_s16 + $0xb8] sm:$0xff] }
0x1eb1   :  { %v7624_v14 = vpop.eup %7623 }
0x1eb2   :  { %v5595_v15 = vmul.f32 %v7624_v14, %v7620_v8  ;;  %v6672_v8 = vld [vmem:[%s8849_s16 + $0xe0] sm:$0xff]  ;;  %v6666_v14 = vld [vmem:[%s8849_s16 + $0xb0] sm:$0xff] }
0x1eb4   :  { %7468 = vmatmul.mubr.msk.f32.vlgmr.msra.gmra.mxu1 %vm405_vm2, %v5595_v15  ;;  %v6665_v15 = vld [vmem:[%s8849_s16 + $0xa8] sm:$0xff] }
0x1eb5   :  { %v7626_v16 = vpop.eup %7625  ;;  %7476 = vmatpush3.msra.mxu1 %v6643_v18  ;;  %v6662_v18 = vld [vmem:[%s8849_s16 + $0x90] sm:$0xff] }
0x1eb6   :  { %v5596_v17 = vmul.f32 %v7626_v16, %v7622_v10  ;;  %7491 = vmatprep.subr.mxu1 %v6675_v3  ;;  %v6670_v10 = vld [vmem:[%s8849_s16 + $0xd0] sm:$0xff]  ;;  %v6664_v16 = vld [vmem:[%s8849_s16 + $0xa0] sm:$0xff] }
0x1eb8   :  { %7473 = vmatmul.mubr.msk.f32.vlgmr.msra.gmra.mxu0 %vm405_vm2, %v5596_v17  ;;  %v6663_v17 = vld [vmem:[%s8849_s16 + $0x98] sm:$0xff] }
0x1eb9   :  { %7481 = vmatpush3.msra.mxu0 %v6655_v45 }
0x1eba   :  { %7482 = vmatprep.subr.mxu0 %v6654_v46 }
0x1ebb   :  { %7483 = vmatpush3.msra.mxu0 %v6654_v46 }
0x1ebc   :  { %7484 = vmatprep.subr.mxu0 %v6653_v39 }
0x1ebd   :  { %7485 = vmatpush3.msra.mxu0 %v6653_v39 }
0x1ebe   :  { %7486 = vmatprep.subr.mxu0 %v6652_v4 }
0x1ebf   :  { %7487 = vmatpush3.msra.mxu0 %v6652_v4 }
0x1ec0   :  { %7526 = vmatprep.subr.mxu0 %v7669_v50 }
0x1f74   :  { %v5666_v19 = vpop.f32.mrf.mxu1 }
0x1f75   :  { %7477 = vmatprep.mubr.msk.f32.mxu1 %vm405_vm2, %v5666_v19  ;;  %v6661_v19 = vld [vmem:[%s8849_s16 + $0x88] sm:$0xff] }
0x1f76   :  { %v7469_v20 = vpop.f32.mrf.mxu1 }
0x1f77   :  { %v6660_v20 = vld [vmem:[%s8849_s16 + $0x80] sm:$0xff] }
0x1f78   :  { %v5739_v21 = vpop.f32.mrf.mxu0 }
0x1f79   :  { %7478 = vmatmul.mubr.msk.f32.vlgmr.msra.gmra.mxu1 %vm405_vm2, %v5739_v21  ;;  %v6657_v21 = vld [vmem:[%s8848_s15 + $0x1] ss:$0 sm:$0xff] }
0x1f7a   :  { %v7474_v22 = vpop.f32.mrf.mxu0  ;;  %7492 = vmatpush3.msra.mxu1 %v6675_v3 }
0x1f7b   :  { %7493 = vmatprep.subr.mxu1 %v6674_v6 }
0x1f7c   :  { %7494 = vmatpush3.msra.mxu1 %v6674_v6 }
0x1f7d   :  { %7495 = vmatprep.subr.mxu1 %v6673_v7 }
0x1f7e   :  { %7496 = vmatpush3.msra.mxu1 %v6673_v7 }
0x1f7f   :  { %7497 = vmatprep.subr.mxu1 %v6672_v8 }
0x1f80   :  { %7498 = vmatpush3.msra.mxu1 %v6672_v8 }
0x1f81   :  { %7499 = vmatprep.subr.mxu1 %v6671_v9 }
0x1f82   :  { %7500 = vmatpush3.msra.mxu1 %v6671_v9 }
0x1f83   :  { %7501 = vmatprep.subr.mxu1 %v6670_v10 }
0x1f84   :  { %7502 = vmatpush3.msra.mxu1 %v6670_v10  ;;  %v6678_v10 = vld [vmem:[%s8851_s18] ss:$0 sm:$0xff] }
0x1f85   :  { %7503 = vmatprep.subr.mxu1 %v6669_v11 }
0x1f86   :  { %7504 = vmatpush3.msra.mxu1 %v6669_v11 }
0x1f87   :  { %7505 = vmatprep.subr.mxu1 %v6668_v12 }
0x1f88   :  { %7506 = vmatpush3.msra.mxu1 %v6668_v12 }
0x1f89   :  { %7507 = vmatprep.subr.mxu1 %v6667_v13 }
0x1f8a   :  { %7508 = vmatpush3.msra.mxu1 %v6667_v13 }
0x1f8b   :  { %7509 = vmatprep.subr.mxu1 %v6666_v14 }
0x1f8c   :  { %7510 = vmatpush3.msra.mxu1 %v6666_v14  ;;  %v6679_v14 = vld [vmem:[%s8852_s19] ss:$0 sm:$0xff] }
0x1f8d   :  { %7511 = vmatprep.subr.mxu1 %v6665_v15 }
0x1f8e   :  { %7512 = vmatpush3.msra.mxu1 %v6665_v15 }
0x1f8f   :  { %7513 = vmatprep.subr.mxu1 %v6664_v16 }
0x1f90   :  { %7514 = vmatpush3.msra.mxu1 %v6664_v16 }
0x1f91   :  { %7515 = vmatprep.subr.mxu1 %v6663_v17 }
0x1f92   :  { %7516 = vmatpush3.msra.mxu1 %v6663_v17  ;;  %v6680_v17 = vld [vmem:[%s8853_s20] ss:$0 sm:$0xff] }
0x1f93   :  { %7517 = vmatprep.subr.mxu1 %v6662_v18 }
0x1f94   :  { %7518 = vmatpush3.msra.mxu1 %v6662_v18 }
0x1f95   :  { %7519 = vmatprep.subr.mxu1 %v6661_v19 }
0x1f96   :  { %7520 = vmatpush3.msra.mxu1 %v6661_v19 }
0x1f97   :  { %7521 = vmatprep.subr.mxu1 %v6660_v20 }
0x1f98   :  { %7522 = vmatpush3.msra.mxu1 %v6660_v20 }
0x2039   :  { %v7479_v23 = vpop.f32.mrf.mxu1 }
0x203a   :  { %v5827_v24 = vadd.f32 %v7479_v23, %v8649_v54 }
0x203b   :  { %v5817_v26 = vpop.f32.mrf.mxu1 }
0x203c   :  { %v5829_v27 = vadd.f32 %v5827_v24, %v8298_v62  ;;  %v5826_v28 = vadd.f32 %v5817_v26, %v8651_v56 }
0x203e   :  { %v8686_v30 = vadd.f32 %v6647_v25, %v5829_v27  ;;  %v5828_v31 = vadd.f32 %v5826_v28, %v8301_v0 }
0x2040   :  { %v8689_v35 = vadd.f32 %v6647_v25, %v5828_v31  ;;  %v5847_v36 = vsel %vm93_vm0, %v8686_v30, 0.0  ;;  %v5853_v37 = vmul.f32 %v8686_v30, %v8686_v30 }
0x2041   :  { %5848 = vadd.xlane.f32.xlu1 %v5847_v36 }
0x2042   :  { %v5844_v32 = vsel %vm93_vm0, %v8689_v35, 0.0  ;;  %v5852_v62 = vmul.f32 %v8689_v35, %v8689_v35  ;;  %v5857_v41 = vsel %vm93_vm0, %v5853_v37, 0.0 }
0x2043   :  { %5845 = vadd.xlane.f32.xlu0 %v5844_v32 }
0x2044   :  { %v5854_v0 = vsel %vm93_vm0, %v5852_v62, 0.0 }
0x2045   :  { %5858 = vadd.xlane.f32.xlu1 %v5857_v41 }
0x2047   :  { %5855 = vadd.xlane.f32.xlu0 %v5854_v0 }
0x20ca   :  { %v5849_v48 = vpop.xlane.xlu1 %5848 }
0x20cb   :  { %v5851_v49 = vmul.f32 0.03125, %v5849_v48 }
0x20cc   :  { %v5846_v33 = vpop.xlane.xlu0 %5845 }
0x20cd   :  { %v5850_v51 = vmul.f32 0.03125, %v5846_v33  ;;  %v5863_v55 = vmul.f32 %v5851_v49, %v5851_v49  ;;  %v5867_v47 = vsub.f32 %v8686_v30, %v5851_v49 }
0x20ce   :  { %v5859_v54 = vpop.xlane.xlu1 %5858 }
0x20cf   :  { %v5861_v56 = vmul.f32 0.03125, %v5859_v54  ;;  %v5862_v57 = vmul.f32 %v5850_v51, %v5850_v51  ;;  %v5866_v61 = vsub.f32 %v8689_v35, %v5850_v51 }
0x20d0   :  { %v5856_v42 = vpop.xlane.xlu0 %5855 }
0x20d1   :  { %v5865_v58 = vsub.f32 %v5861_v56, %v5863_v55  ;;  %v5860_v59 = vmul.f32 0.03125, %v5856_v42  ;;  %v6677_v55 = vld [vmem:[%s8850_s17 + $0x1] ss:$0 sm:$0xff] }
0x20d3   :  { %v5869_v29 = vadd.f32 1e-05, %v5865_v58  ;;  %v5864_v5 = vsub.f32 %v5860_v59, %v5862_v57 }
0x20d5   :  { %7627 = vrsqrt.f32 %v5869_v29  ;;  %v5868_v34 = vadd.f32 1e-05, %v5864_v5 }
0x20d7   :  { %7629 = vrsqrt.f32 %v5868_v34 }
0x20e2   :  { %v7628_v60 = vpop.eup %7627 }
0x20e3   :  { %v5873_v38 = vmul.f32 %v7628_v60, %v5867_v47 }
0x20e4   :  { %v7630_v52 = vpop.eup %7629 }
0x20e5   :  { %v5872_v43 = vmul.f32 %v7630_v52, %v5866_v61  ;;  %v5881_v40 = vmul.f32 %v6650_v63, %v5873_v38 }
0x20e7   :  { %v5880_v44 = vmul.f32 %v6650_v63, %v5872_v43  ;;  %v5889_v2 = vadd.f32 %v6651_v53, %v5881_v40 }
0x20e9   :  { %v5888_v1 = vadd.f32 %v6651_v53, %v5880_v44 }
0x20eb   :  { %7488 = vmatprep.mubr.msk.f32.mxu0 %vm93_vm0, %v5888_v1 }
0x20ec   :  { %7489 = vmatmul.mubr.msk.f32.vlgmr.msra.gmra.mxu0 %vm93_vm0, %v5889_v2 }
0x20ed   :  { %7534 = vmatprep.mubr.msk.f32.mxu0 %vm7670_vm1, %v7669_v50 }
0x21ac   :  { %v7490_v22 = vpop.f32.mrf.mxu0 }
0x21ad   :  { %v5981_v23 = vadd.f32 %v7490_v22, %v6657_v21 }
0x21ae   :  { %v5975_v24 = vpop.f32.mrf.mxu0 }
0x21af   :  { %v5987_v25 = vmul.f32 0.044715, %v5981_v23  ;;  %v5976_v26 = vadd.f32 %v6657_v21, %v5975_v24  ;;  %v5985_v49 = vmul.f32 0.5, %v5981_v23 }
0x21b1   :  { %v5989_v27 = vmul.f32 %v5987_v25, %v5981_v23  ;;  %v5986_v28 = vmul.f32 0.044715, %v5976_v26  ;;  %v5984_v4 = vmul.f32 0.5, %v5976_v26  ;;  %v7671_v25 = vmov 0  }
0x21b2   :  { %7545 = vset.pattern.permute.xlu1 %v7671_v25  ;;  %7544 = vset.pattern.permute.xlu0 %v7671_v25 }
0x21b3   :  { %v5991_v31 = vmul.f32 %v5989_v27, %v5981_v23  ;;  %v5988_v36 = vmul.f32 %v5986_v28, %v5976_v26 }
0x21b5   :  { %v5993_v37 = vadd.f32 %v5991_v31, %v5981_v23  ;;  %v5990_v32 = vmul.f32 %v5988_v36, %v5976_v26 }
0x21b7   :  { %v5992_v62 = vadd.f32 %v5990_v32, %v5976_v26  ;;  %v5995_v41 = vmul.f32 0.7978846, %v5993_v37  ;;  %v6681_v26 = vld [vmem:[#allocation2] ss:$0 sm:$0xff] }
0x21b9   :  { %v5994_v0 = vmul.f32 0.7978846, %v5992_v62  ;;  %7631 = vtanh.f32 %v5995_v41 }
0x21bb   :  { %7633 = vtanh.f32 %v5994_v0 }
0x21c6   :  { %v7632_v45 = vpop.eup %7631 }
0x21c7   :  { %v5999_v39 = vadd.f32 1.0, %v7632_v45 }
0x21c8   :  { %v7634_v46 = vpop.eup %7633 }
0x21c9   :  { %v5998_v48 = vadd.f32 1.0, %v7634_v46  ;;  %v6001_v51 = vmul.f32 %v5999_v39, %v5985_v49 }
0x21cb   :  { %v6000_v33 = vmul.f32 %v5998_v48, %v5984_v4 }
0x21cd   :  { %7523 = vmatprep.mubr.f32.mxu1 %v6000_v33 }
0x21ce   :  { %7524 = vmatmul.mubr.f32.vlgmr.msra.gmra.mxu1 %v6001_v51 }
0x228e   :  { %v7525_v54 = vpop.f32.mrf.mxu1 }
0x228f   :  { %v6095_v56 = vadd.f32 %v7525_v54, %v8686_v30 }
0x2290   :  { %v6085_v42 = vpop.f32.mrf.mxu1 }
0x2291   :  { %v6105_v57 = vadd.f32 %v6677_v55, %v6095_v56  ;;  %v6094_v58 = vadd.f32 %v6085_v42, %v8689_v35 }
0x2293   :  { %v6104_v59 = vadd.f32 %v6677_v55, %v6094_v58  ;;  %v6111_v29 = vsel %vm93_vm0, %v6105_v57, 0.0  ;;  %v6117_v5 = vmul.f32 %v6105_v57, %v6105_v57 }
0x2294   :  { %6112 = vadd.xlane.f32.xlu1 %v6111_v29 }
0x2295   :  { %v6108_v34 = vsel %vm93_vm0, %v6104_v59, 0.0  ;;  %v6116_v47 = vmul.f32 %v6104_v59, %v6104_v59  ;;  %v6121_v60 = vsel %vm93_vm0, %v6117_v5, 0.0 }
0x2296   :  { %6109 = vadd.xlane.f32.xlu0 %v6108_v34 }
0x2297   :  { %v6118_v61 = vsel %vm93_vm0, %v6116_v47, 0.0 }
0x2298   :  { %6122 = vadd.xlane.f32.xlu1 %v6121_v60 }
0x229a   :  { %6119 = vadd.xlane.f32.xlu0 %v6118_v61 }
0x231d   :  { %v6113_v30 = vpop.xlane.xlu1 %6112 }
0x231e   :  { %v6115_v63 = vmul.f32 0.03125, %v6113_v30 }
0x231f   :  { %v6110_v38 = vpop.xlane.xlu0 %6109 }
0x2320   :  { %v6114_v52 = vmul.f32 0.03125, %v6110_v38  ;;  %v6127_v43 = vmul.f32 %v6115_v63, %v6115_v63  ;;  %v6131_v8 = vsub.f32 %v6105_v57, %v6115_v63 }
0x2321   :  { %v6123_v35 = vpop.xlane.xlu1 %6122 }
0x2322   :  { %v6125_v40 = vmul.f32 0.03125, %v6123_v35  ;;  %v6126_v44 = vmul.f32 %v6114_v52, %v6114_v52  ;;  %v6130_v11 = vsub.f32 %v6104_v59, %v6114_v52 }
0x2323   :  { %v6120_v53 = vpop.xlane.xlu0 %6119 }
0x2324   :  { %v6129_v1 = vsub.f32 %v6125_v40, %v6127_v43  ;;  %v6124_v2 = vmul.f32 0.03125, %v6120_v53 }
0x2326   :  { %v6133_v3 = vadd.f32 1e-05, %v6129_v1  ;;  %v6128_v6 = vsub.f32 %v6124_v2, %v6126_v44 }
0x2328   :  { %7635 = vrsqrt.f32 %v6133_v3  ;;  %v6132_v7 = vadd.f32 1e-05, %v6128_v6  ;;  %v6246_v6 = vld [vmem:[%s8855_s22 + $0x18] sm:$0xff] }
0x2329   :  { %7527 = vmatpush3.msra.mxu0 %v6246_v6 }
0x232a   :  { %7637 = vrsqrt.f32 %v6132_v7  ;;  %7528 = vmatprep.subr.mxu0 %v7669_v50  ;;  %v6245_v7 = vld [vmem:[%s8855_s22 + $0x10] sm:$0xff] }
0x232b   :  { %7529 = vmatpush3.msra.mxu0 %v6245_v7 }
0x232c   :  { %7530 = vmatprep.subr.mxu0 %v7669_v50 }
0x2335   :  { %v7636_v9 = vpop.eup %7635 }
0x2336   :  { %v6137_v12 = vmul.f32 %v7636_v9, %v6131_v8  ;;  %v6244_v8 = vld [vmem:[%s8855_s22 + $0x8] sm:$0xff]  ;;  %v6243_v9 = vld [vmem:[%s8855_s22] sm:$0xff] }
0x2337   :  { %v7638_v13 = vpop.eup %7637  ;;  %7531 = vmatpush3.msra.mxu0 %v6244_v8 }
0x2338   :  { %v6145_v15 = vmul.f32 %v6678_v10, %v6137_v12  ;;  %v6136_v16 = vmul.f32 %v7638_v13, %v6130_v11  ;;  %7532 = vmatprep.subr.mxu0 %v7669_v50 }
0x2339   :  { %7533 = vmatpush3.msra.mxu0 %v6243_v9 }
0x233a   :  { %v8795_v18 = vadd.f32 %v6679_v14, %v6145_v15  ;;  %v6144_v19 = vmul.f32 %v6678_v10, %v6136_v16 }
0x233c   :  { %v6162_v20 = vmul.f32 %v6680_v17, %v8795_v18  ;;  %v8798_v21 = vadd.f32 %v6679_v14, %v6144_v19 }
0x233e   :  { %v6166_v22 = vsel %vm93_vm0, %v6162_v20, 0.0  ;;  %v6161_v23 = vmul.f32 %v6680_v17, %v8798_v21 }
0x233f   :  { %6167 = vadd.xlane.f32.xlu1 %v6166_v22 }
0x2340   :  { %v6163_v24 = vsel %vm93_vm0, %v6161_v23, 0.0 }
0x2341   :  { %6164 = vadd.xlane.f32.xlu0 %v6163_v24 }
0x23c8   :  { %v6168_v27 = vpop.xlane.xlu1 %6167 }
0x23c9   :  { %v6177_v28 = vadd.f32 %v6681_v26, %v6168_v27 }
0x23ca   :  { %v6165_v31 = vpop.xlane.xlu0 %6164 }
0x23cb   :  { %v6186_v36 = vsel %vm6178_vm3, %v6177_v28, -inf  ;;  %v6176_v37 = vadd.f32 %v6681_v26, %v6165_v31  ;;  %v7672_v31 = vmov 1966171168  }
0x23cc   :  { %v6187_v32 = vrot.slane %v6186_v36, 4 }
0x23cd   :  { %v6179_v62 = vsel %vm6178_vm3, %v6176_v37, -inf }
0x23ce   :  { %v6188_v41 = vmax.f32 %v6186_v36, %v6187_v32  ;;  %v6180_v0 = vrot.slane %v6179_v62, 4  ;;  %v6257_v36 = vlaneseq }
0x23d0   :  { %v6189_v45 = vrot.slane %v6188_v41, 2  ;;  %v6181_v46 = vmax.f32 %v6179_v62, %v6180_v0  ;;  %v6258_v32 = vshrl.u32 %v6257_v36, 7  ;;  %v7546_v62 = vld [vmem:[%s8856_s23] ss:$0 sps:$4 sm:$0x11]  }
0x23d2   :  { %v6190_v39 = vmax.f32 %v6188_v41, %v6189_v45  ;;  %v6182_v4 = vrot.slane %v6181_v46, 2 }
0x23d4   :  { %v6191_v48 = vrot.slane %v6190_v39, 1  ;;  %v6183_v49 = vmax.f32 %v6181_v46, %v6182_v4 }
0x23d6   :  { %v6192_v33 = vmax.f32 %v6190_v39, %v6191_v48  ;;  %v6184_v51 = vrot.slane %v6183_v49, 1 }
0x23d8   :  { %v6194_v54 = vsub.f32 %v6177_v28, %v6192_v33  ;;  %v6185_v55 = vmax.f32 %v6183_v49, %v6184_v51 }
0x23da   :  { %v6197_v56 = vmul.f32 1.442695, %v6194_v54  ;;  %v6193_v42 = vsub.f32 %v6176_v37, %v6185_v55 }
0x23dc   :  { %7639 = vpow2.f32 %v6197_v56  ;;  %v6195_v57 = vmul.f32 1.442695, %v6193_v42 }
0x23de   :  { %7641 = vpow2.f32 %v6195_v57 }
0x23e9   :  { %v7640_v58 = vpop.eup %7639 }
0x23ea   :  { %v6206_v59 = vsel %vm6178_vm3, %v7640_v58, 0.0 }
0x23eb   :  { %v7642_v29 = vpop.eup %7641  ;;  %v6207_v5 = vrot.slane %v6206_v59, 4 }
0x23ec   :  { %v6199_v34 = vsel %vm6178_vm3, %v7642_v29, 0.0 }
0x23ed   :  { %v6208_v47 = vadd.f32 %v6207_v5, %v6206_v59  ;;  %v6200_v60 = vrot.slane %v6199_v34, 4 }
0x23ef   :  { %v6209_v61 = vrot.slane %v6208_v47, 2  ;;  %v6201_v30 = vadd.f32 %v6200_v60, %v6199_v34 }
0x23f1   :  { %v6210_v63 = vadd.f32 %v6209_v61, %v6208_v47  ;;  %v6202_v38 = vrot.slane %v6201_v30, 2 }
0x23f3   :  { %v6211_v52 = vrot.slane %v6210_v63, 1  ;;  %v6203_v35 = vadd.f32 %v6202_v38, %v6201_v30 }
0x23f5   :  { %v6212_v43 = vadd.f32 %v6211_v52, %v6210_v63  ;;  %v6204_v40 = vrot.slane %v6203_v35, 1 }
0x23f7   :  { %7643 = vrcp.f32 %v6212_v43  ;;  %v6205_v53 = vadd.f32 %v6204_v40, %v6203_v35 }
0x23f9   :  { %7645 = vrcp.f32 %v6205_v53 }
0x2404   :  { %v7644_v44 = vpop.eup %7643 }
0x2405   :  { %v6216_v1 = vmul.f32 %v7644_v44, %v7640_v58 }
0x2406   :  { %v7646_v2 = vpop.eup %7645 }
0x2407   :  { %6224 = vperm.xlu1 %7545, %v6216_v1   ;;  %v6215_v3 = vmul.f32 %v7646_v2, %v7642_v29 }
0x2409   :  { %6219 = vperm.xlu0 %7544, %v6215_v3  }
0x2482   :  { %v6225_v10 = vpop.permute.xlu1 %6224 }
0x2483   :  { %v6228_v11 = vmul.f32 %v6225_v10, %v8795_v18 }
0x2484   :  { %v6220_v12 = vpop.permute.xlu0 %6219 }
0x2485   :  { %v6236_v13 = vsel %vm93_vm0, %v6228_v11, 0.0  ;;  %v6227_v14 = vmul.f32 %v6220_v12, %v8798_v21  ;;  %v6255_v21 = vunpack.c.l.s4 %v7672_v31 }
0x2486   :  { %v6237_v15 = vrot.slane %v6236_v13, 4 }
0x2487   :  { %v6229_v16 = vsel %vm93_vm0, %v6227_v14, 0.0  ;;  %v6256_v37 = vunpack.c.0.s8 %v6255_v21 }
0x2488   :  { %v6238_v17 = vadd.f32 %v6237_v15, %v6236_v13  ;;  %v6230_v19 = vrot.slane %v6229_v16, 4 }
0x2489   :  { %v6259_v41 = vsub.s32 %v6256_v37, %v6258_v32 }
0x248a   :  { %v6239_v20 = vrot.slane %v6238_v17, 2  ;;  %v6231_v22 = vadd.f32 %v6230_v19, %v6229_v16 }
0x248b   :  { %v6260_v0 = vrot.slane %v7546_v62, %v6259_v41 }
0x248c   :  { %v6240_v23 = vadd.f32 %v6239_v20, %v6238_v17  ;;  %v6232_v24 = vrot.slane %v6231_v22, 2 }
0x248d   :  { %v6267_v45 = vrot.slane %v6260_v0, %v6259_v41 }
0x248e   :  { %v6241_v25 = vrot.slane %v6240_v23, 1  ;;  %v6233_v50 = vadd.f32 %v6232_v24, %v6231_v22 }
0x2490   :  { %v6234_v26 = vrot.slane %v6233_v50, 1  ;;  %v6242_v27 = vadd.f32 %v6241_v25, %v6240_v23 }
0x2492   :  { %v6235_v18 = vadd.f32 %v6234_v26, %v6233_v50 }
0x2494   :  { %v6251_v28 = vsel %vm6250_vm4, %v6242_v27, %v6235_v18 }
0x2495   :  { %7535 = vmatmul.mubr.msk.f32.vlgmr.msra.gmra.mxu0 %vm93_vm0, %v6251_v28 }
0x2555   :  { %v6337_v46 = vpop.f32.mrf.mxu0 }
0x2556   :  { %v6338_v39 = vadd.f32 %v6337_v46, %v6267_v45 }
0x2557   :  { %v7536_v4 = vpop.f32.mrf.mxu0 }
0x2558   :  { %v6348_v48 = vrot.slane %v6338_v39, %v6259_v41 }
0x255a   :  { %v6349_v49 = vcombine.high %v6348_v48, %v6348_v48  ;;  %6683 = vst.sshfl [vmem:[#allocation3] sm:$0x1 pattern:$0x73625140] %v6348_v48 }
0x255c   :  { %6684 = vst.sshfl [vmem:[#allocation3 + $0x1] sm:$0x1 pattern:$0x73625140] %v6349_v49 }
0x255d   :  { %7658 = shalt.err (!%p7655_p4)
}
0x255e   :  { %s7674_s23 = smov 16   ;;  %s7675_s13 = smov 1  }
0x255f   :  { %6379 = dma.vmem_to_hbm [thread:$0]  %s6374_s9, 32, %s8857_s24, [#allocation4], %s7674_s23, %s7674_s23, %s7675_s13  }
0x2560   :  { %7667 = dma.done.wait [#allocation4], 32  }
0x2561   :  { %7668 = vsyncadd [#allocation4], 4294967264 }
0x2562   :  { %6383 = vsyncpa [#allocation4], 1 }

</bundles_post_ra>
